<compile_context>
chip_gen: v7x
topology: tpu7x:2x2x1
jax: 0.10.0
libtpu: 0.0.40
codegen_flags: <defaults>
</compile_context>

<pallas_src>
from functools import partial

import jax
import jax.numpy as jnp
from jax.experimental import pallas as pl
from jax.experimental.pallas import tpu as pltpu

F32 = jnp.float32
BF16 = jnp.bfloat16


# ----------------------------------------------------------------------------
# in-kernel helpers
# ----------------------------------------------------------------------------
def _sigmoid(x):
    # numerically stable sigmoid (single exp, no overflow for large |x|)
    e = jnp.exp(-jnp.abs(x))
    return jnp.where(x >= 0, 1.0 / (1.0 + e), e / (1.0 + e))


# ----------------------------------------------------------------------------
# fused GIN kernel: one grid step == one GROUP of G graphs
# ----------------------------------------------------------------------------
def _gin_kernel(a_ref, x_ref, pool_ref, bcast_ref,
                w1a_ref, w1b_ref, w2a_ref, w2b_ref, w3a_ref, w3b_ref,
                bias_ref, rw_ref, wl_ref, bl_ref, o_ref,
                *, self_scale, inv_n):
    a = a_ref[0]             # [GN, GN] block-diag adjacency (bf16, no self loops)
    x = x_ref[0]             # [GN, F]  node features        (bf16)
    pool = pool_ref[...]     # [G, GN]  per-graph sum-pool    (bf16, 0/1)
    bcast = bcast_ref[...]   # [GN, G]  per-graph broadcast   (bf16, 0/1)
    bias = bias_ref[...]     # [6, nhid] f32: (b1a', b1b, b2a', b2b, b3a', b3b)
    nhid = rw_ref.shape[0]

    def dot(u, v):
        # bf16 MXU operands, f32 accumulation
        return jnp.dot(u, v, preferred_element_type=F32)

    def gin_layer(h, wa_ref, wb_ref, ba, bb):
        # GINConv: MLP( (1+eps) x_i + sum_{j in N(i)} x_j ); BN folded into wa/ba
        agg = dot(a, h) + self_scale * h.astype(F32)                 # f32
        z = jnp.maximum(dot(agg.astype(BF16), wa_ref[...]) + ba, 0.0)
        z = jnp.maximum(dot(z.astype(BF16), wb_ref[...]) + bb, 0.0)
        return z.astype(BF16)                                        # bf16 inter-layer

    def readout(h):
        # shared attention readout: mean-pool -> tanh(W) -> sigmoid coefs -> add-pool
        hf = h.astype(F32)
        mean = dot(pool, h) * inv_n                                  # [G, nhid]
        tg = jnp.tanh(dot(mean.astype(BF16), rw_ref[...]))           # [G, nhid]
        tg_nodes = dot(bcast, tg.astype(BF16))                       # [GN, nhid]
        coefs = _sigmoid(jnp.sum(hf * tg_nodes, axis=-1, keepdims=True))
        return dot(pool, (coefs * hf).astype(BF16))                  # [G, nhid]

    # readouts interleaved with layers -> bounds peak live activation slabs
    h1 = gin_layer(x, w1a_ref, w1b_ref, bias[0:1], bias[1:2]); r1 = readout(h1)
    h2 = gin_layer(h1, w2a_ref, w2b_ref, bias[2:3], bias[3:4]); r2 = readout(h2)
    h3 = gin_layer(h2, w3a_ref, w3b_ref, bias[4:5], bias[5:6]); r3 = readout(h3)

    # final Linear on cat(r1, r2, r3): split the weight instead of a lane concat
    wl = wl_ref[...]                                                 # [3*nhid, nhid]
    out = (dot(r1.astype(BF16), wl[0:nhid, :])
           + dot(r2.astype(BF16), wl[nhid:2 * nhid, :])
           + dot(r3.astype(BF16), wl[2 * nhid:3 * nhid, :])
           + bl_ref[...])
    o_ref[0] = out


# ----------------------------------------------------------------------------
# wrapper
# ----------------------------------------------------------------------------
def _fold_bn(w, b, bn, bn_eps=1e-5):
    # fold inference-mode BatchNorm1d into the preceding Linear
    scale = bn['gamma'] / jnp.sqrt(bn['var'] + bn_eps)
    return w * scale[None, :], b * scale + (bn['beta'] - bn['mean'] * scale)


def _pick_group_size(B, n, target_rows=128):
    """Largest divisor G of B with G*n <= target_rows and at least 2 grid steps."""
    cap = max(1, target_rows // max(n, 1))
    best = 1
    for g in range(1, min(B, cap) + 1):
        if B % g == 0 and B // g >= 2:
            best = g
    return best


def gin_forward(params, adj, x, *, eps=0.0, group_size=None):
    """adj: [B, n, n] dense per-graph adjacency (no self loops); x: [B*n, F]."""
    B, n, _ = adj.shape
    f_in = x.shape[-1]
    nhid = params['read_w'].shape[0]

    G = _pick_group_size(B, n) if group_size is None else group_size
    assert B % G == 0, (B, G)
    ng = B // G
    gn = G * n

    # per-group block-diagonal adjacency (raw A; (1+eps)*I self term is added
    # inside the kernel -> no extra HBM pass over a second adjacency array).
    adj_g = adj.astype(F32).reshape(ng, G, n, n)
    a_blk = jnp.einsum('bgij,gh->bgihj', adj_g,
                       jnp.eye(G, dtype=F32)).reshape(ng, gn, gn).astype(BF16)
    x_g = x.reshape(ng, gn, f_in).astype(BF16)

    # constant in-group pooling / broadcast operators (identical for all groups)
    pool = jnp.repeat(jnp.eye(G, dtype=F32), n, axis=1)              # [G, gn]
    bcast = pool.T                                                   # [gn, G]

    # TODO(synk): training-mode BatchNorm (batch statistics over all nodes of
    # all graphs) couples graphs and is not implemented; inference-mode BN only.
    # TODO(synk): ragged graphs (per-graph node counts) are not handled; every
    # graph must have exactly n real nodes.
    w1a, b1a = _fold_bn(params['w1a'], params['b1a'], params['bn1'])
    w2a, b2a = _fold_bn(params['w2a'], params['b2a'], params['bn2'])
    w3a, b3a = _fold_bn(params['w3a'], params['b3a'], params['bn3'])
    biases = jnp.stack([b1a, params['b1b'], b2a, params['b2b'],
                        b3a, params['b3b']], axis=0)                 # [6, nhid] f32
    weights = [w.astype(BF16) for w in
               (w1a, params['w1b'], w2a, params['w2b'], w3a, params['w3b'])]

    def full(shape):
        nd = len(shape)
        return pl.BlockSpec(shape, lambda g, nd=nd: (0,) * nd)

    kernel = partial(_gin_kernel, self_scale=1.0 + eps, inv_n=1.0 / n)
    out = pl.pallas_call(
        kernel,
        grid=(ng,),
        in_specs=[pl.BlockSpec((1, gn, gn), lambda g: (g, 0, 0)),
                  pl.BlockSpec((1, gn, f_in), lambda g: (g, 0, 0)),
                  full((G, gn)), full((gn, G)),
                  full((f_in, nhid)), full((nhid, nhid)),
                  full((nhid, nhid)), full((nhid, nhid)),
                  full((nhid, nhid)), full((nhid, nhid)),
                  full((6, nhid)), full((nhid, nhid)),
                  full((3 * nhid, nhid)), full((1, nhid))],
        out_specs=pl.BlockSpec((1, G, nhid), lambda g: (g, 0, 0)),
        out_shape=jax.ShapeDtypeStruct((ng, G, nhid), F32),
        compiler_params=pltpu.CompilerParams(
            dimension_semantics=("parallel",)),
    )(a_blk, x_g, pool.astype(BF16), bcast.astype(BF16),
      *weights, biases, params['read_w'].astype(BF16),
      params['lin_w'].astype(BF16), params['lin_b'].reshape(1, nhid))
    return out.reshape(B, nhid)


# ----------------------------------------------------------------------------
# parameters
# ----------------------------------------------------------------------------
def init_params(key, node_feature_dim, nhid):
    ks = jax.random.split(key, 20)

    def glorot(k, shape):
        lim = (6.0 / (shape[0] + shape[1])) ** 0.5
        return jax.random.uniform(k, shape, F32, -lim, lim)

    def bn(k):
        kg, kb, km, kv = jax.random.split(k, 4)
        return dict(gamma=jax.random.uniform(kg, (nhid,), F32, 0.5, 1.5),
                    beta=0.1 * jax.random.normal(kb, (nhid,), F32),
                    mean=0.1 * jax.random.normal(km, (nhid,), F32),
                    var=jax.random.uniform(kv, (nhid,), F32, 0.5, 1.5))

    small = lambda k: 0.1 * jax.random.normal(k, (nhid,), F32)
    return {
        'w1a': glorot(ks[0], (node_feature_dim, nhid)), 'b1a': small(ks[11]),
        'w1b': glorot(ks[1], (nhid, nhid)),             'b1b': small(ks[12]),
        'w2a': glorot(ks[2], (nhid, nhid)),             'b2a': small(ks[13]),
        'w2b': glorot(ks[3], (nhid, nhid)),             'b2b': small(ks[14]),
        'w3a': glorot(ks[4], (nhid, nhid)),             'b3a': small(ks[15]),
        'w3b': glorot(ks[5], (nhid, nhid)),             'b3b': small(ks[16]),
        'bn1': bn(ks[6]), 'bn2': bn(ks[7]), 'bn3': bn(ks[8]),
        'read_w': glorot(ks[9], (nhid, nhid)),
        'lin_w': glorot(ks[10], (3 * nhid, nhid)),
        'lin_b': small(ks[17]),
    }


# ----------------------------------------------------------------------------
# pure-JAX reference (unfolded BN, f32) for a correctness check
# ----------------------------------------------------------------------------
def gin_reference(params, adj, x, *, eps=0.0, bn_eps=1e-5):
    B, n, _ = adj.shape
    f_in = x.shape[-1]
    x3 = x.reshape(B, n, f_in)
    a = adj + (1.0 + eps) * jnp.eye(n, dtype=F32)[None]

    def conv(h, w_a, b_a, bn, w_b, b_b):
        agg = jnp.einsum('bij,bjf->bif', a, h)
        z = agg @ w_a + b_a
        z = (z - bn['mean']) / jnp.sqrt(bn['var'] + bn_eps) * bn['gamma'] + bn['beta']
        z = jax.nn.relu(z)
        return jax.nn.relu(z @ w_b + b_b)

    h1 = conv(x3, params['w1a'], params['b1a'], params['bn1'], params['w1b'], params['b1b'])
    h2 = conv(h1, params['w2a'], params['b2a'], params['bn2'], params['w2b'], params['b2b'])
    h3 = conv(h2, params['w3a'], params['b3a'], params['bn3'], params['w3b'], params['b3b'])

    def readout(h):
        mean = h.mean(axis=1)
        tg = jnp.tanh(mean @ params['read_w'])
        coefs = jax.nn.sigmoid(jnp.sum(h * tg[:, None, :], axis=-1, keepdims=True))
        return jnp.sum(coefs * h, axis=1)

    r = jnp.concatenate([readout(h1), readout(h2), readout(h3)], axis=1)
    return r @ params['lin_w'] + params['lin_b']


# ----------------------------------------------------------------------------
# demo
# ----------------------------------------------------------------------------
if __name__ == "__main__":
    B = 32                # graphs in the batch (grouped 16 per grid step -> grid=(2,))
    n_per = 8             # nodes per graph
    node_feature_dim = 16
    nhid = 32

    key = jax.random.PRNGKey(0)
    k_p, k_a, k_x = jax.random.split(key, 3)
    params = init_params(k_p, node_feature_dim, nhid)

    # random undirected graphs; PyG edge_index/batch -> dense per-graph adjacency
    # is host-side glue for this interface.
    u = jax.random.uniform(k_a, (B, n_per, n_per))
    adj = (u < 0.4).astype(F32)
    adj = jnp.maximum(adj, jnp.transpose(adj, (0, 2, 1)))
    adj = adj * (1.0 - jnp.eye(n_per, dtype=F32))
    x = jax.random.normal(k_x, (B * n_per, node_feature_dim), F32)

    fwd = jax.jit(gin_forward)
    out = fwd(params, adj, x)
    jax.block_until_ready(out)
    assert out.shape == (B, nhid)

    ref = gin_reference(params, adj, x)
    err = float(jnp.max(jnp.abs(out - ref)))
    scale = float(jnp.max(jnp.abs(ref))) + 1e-6
    assert err / scale < 5e-2, (err, scale)

    print("KERNEL_OK")
</pallas_src>

<mosaic_0001>
module attributes {stable_mosaic.version = 11 : i64} {
  func.func @_gin_kernel(%arg0: i32, %arg1: memref<1x128x128xbf16, #tpu.memory_space<vmem>>, %arg2: memref<1x128x16xbf16, #tpu.memory_space<vmem>>, %arg3: memref<16x128xbf16, #tpu.memory_space<vmem>>, %arg4: memref<128x16xbf16, #tpu.memory_space<vmem>>, %arg5: memref<16x32xbf16, #tpu.memory_space<vmem>>, %arg6: memref<32x32xbf16, #tpu.memory_space<vmem>>, %arg7: memref<32x32xbf16, #tpu.memory_space<vmem>>, %arg8: memref<32x32xbf16, #tpu.memory_space<vmem>>, %arg9: memref<32x32xbf16, #tpu.memory_space<vmem>>, %arg10: memref<32x32xbf16, #tpu.memory_space<vmem>>, %arg11: memref<6x32xf32, #tpu.memory_space<vmem>>, %arg12: memref<32x32xbf16, #tpu.memory_space<vmem>>, %arg13: memref<96x32xbf16, #tpu.memory_space<vmem>>, %arg14: memref<1x32xf32, #tpu.memory_space<vmem>>, %arg15: memref<1x16x32xf32, #tpu.memory_space<vmem>>) attributes {dimension_semantics = [#tpu.dimension_semantics<parallel>], iteration_bounds = array<i64: 2>, scalar_prefetch = 0 : i64, scratch_operands = 0 : i64, tpu.core_type = #tpu.core_type<tc>, window_params = [{transform_indices = @transform_0, window_bounds = array<i64: 1, 128, 128>}, {transform_indices = @transform_1, window_bounds = array<i64: 1, 128, 16>}, {pipeline_mode = #tpu.pipeline_mode<synchronous>, transform_indices = @transform_2, window_bounds = array<i64: 16, 128>}, {pipeline_mode = #tpu.pipeline_mode<synchronous>, transform_indices = @transform_3, window_bounds = array<i64: 128, 16>}, {pipeline_mode = #tpu.pipeline_mode<synchronous>, transform_indices = @transform_4, window_bounds = array<i64: 16, 32>}, {pipeline_mode = #tpu.pipeline_mode<synchronous>, transform_indices = @transform_5, window_bounds = array<i64: 32, 32>}, {pipeline_mode = #tpu.pipeline_mode<synchronous>, transform_indices = @transform_6, window_bounds = array<i64: 32, 32>}, {pipeline_mode = #tpu.pipeline_mode<synchronous>, transform_indices = @transform_7, window_bounds = array<i64: 32, 32>}, {pipeline_mode = #tpu.pipeline_mode<synchronous>, transform_indices = @transform_8, window_bounds = array<i64: 32, 32>}, {pipeline_mode = #tpu.pipeline_mode<synchronous>, transform_indices = @transform_9, window_bounds = array<i64: 32, 32>}, {pipeline_mode = #tpu.pipeline_mode<synchronous>, transform_indices = @transform_10, window_bounds = array<i64: 6, 32>}, {pipeline_mode = #tpu.pipeline_mode<synchronous>, transform_indices = @transform_11, window_bounds = array<i64: 32, 32>}, {pipeline_mode = #tpu.pipeline_mode<synchronous>, transform_indices = @transform_12, window_bounds = array<i64: 96, 32>}, {pipeline_mode = #tpu.pipeline_mode<synchronous>, transform_indices = @transform_13, window_bounds = array<i64: 1, 32>}, {transform_indices = @transform_14, window_bounds = array<i64: 1, 16, 32>}]} {
    %c0 = arith.constant 0 : index
    %c0_0 = arith.constant 0 : index
    %c0_1 = arith.constant 0 : index
    %0 = vector.load %arg1[%c0, %c0_0, %c0_1] : memref<1x128x128xbf16, #tpu.memory_space<vmem>>, vector<1x128x128xbf16>
    %1 = vector.shape_cast %0 : vector<1x128x128xbf16> to vector<128x128xbf16>
    %c0_2 = arith.constant 0 : index
    %c0_3 = arith.constant 0 : index
    %c0_4 = arith.constant 0 : index
    %2 = vector.load %arg2[%c0_2, %c0_3, %c0_4] : memref<1x128x16xbf16, #tpu.memory_space<vmem>>, vector<1x128x16xbf16>
    %3 = vector.shape_cast %2 : vector<1x128x16xbf16> to vector<128x16xbf16>
    %c0_5 = arith.constant 0 : index
    %c0_6 = arith.constant 0 : index
    %4 = vector.load %arg3[%c0_5, %c0_6] : memref<16x128xbf16, #tpu.memory_space<vmem>>, vector<16x128xbf16>
    %c0_7 = arith.constant 0 : index
    %c0_8 = arith.constant 0 : index
    %5 = vector.load %arg4[%c0_7, %c0_8] : memref<128x16xbf16, #tpu.memory_space<vmem>>, vector<128x16xbf16>
    %c0_9 = arith.constant 0 : index
    %c0_10 = arith.constant 0 : index
    %6 = vector.load %arg11[%c0_9, %c0_10] : memref<6x32xf32, #tpu.memory_space<vmem>>, vector<6x32xf32>
    %7 = vector.extract_strided_slice %6 {offsets = [0, 0], sizes = [1, 32], strides = [1, 1]} : vector<6x32xf32> to vector<1x32xf32>
    %8 = vector.extract_strided_slice %6 {offsets = [1, 0], sizes = [1, 32], strides = [1, 1]} : vector<6x32xf32> to vector<1x32xf32>
    %cst = arith.constant dense<0.000000e+00> : vector<128x16xf32>
    %9 = tpu.matmul %1, %3, %cst {dimension_numbers = #tpu.dot_dimension_numbers<[1], [0], [0], [1], [0, 0, 1, 1], [], []>} : vector<128x128xbf16>, vector<128x16xbf16>, vector<128x16xf32> -> vector<128x16xf32>
    %10 = arith.extf %3 : vector<128x16xbf16> to vector<128x16xf32>
    %cst_11 = arith.constant 1.000000e+00 : f32
    %11 = vector.broadcast %cst_11 : f32 to vector<128x16xf32>
    %12 = arith.mulf %11, %10 : vector<128x16xf32>
    %13 = arith.addf %9, %12 : vector<128x16xf32>
    %14 = arith.truncf %13 : vector<128x16xf32> to vector<128x16xbf16>
    %c0_12 = arith.constant 0 : index
    %c0_13 = arith.constant 0 : index
    %15 = vector.load %arg5[%c0_12, %c0_13] : memref<16x32xbf16, #tpu.memory_space<vmem>>, vector<16x32xbf16>
    %cst_14 = arith.constant dense<0.000000e+00> : vector<128x32xf32>
    %16 = tpu.matmul %14, %15, %cst_14 {dimension_numbers = #tpu.dot_dimension_numbers<[1], [0], [0], [1], [0, 0, 1, 1], [], []>} : vector<128x16xbf16>, vector<16x32xbf16>, vector<128x32xf32> -> vector<128x32xf32>
    %17 = vector.broadcast %7 : vector<1x32xf32> to vector<128x32xf32>
    %18 = arith.addf %16, %17 : vector<128x32xf32>
    %cst_15 = arith.constant 0.000000e+00 : f32
    %19 = vector.broadcast %cst_15 : f32 to vector<128x32xf32>
    %20 = arith.maximumf %18, %19 : vector<128x32xf32>
    %21 = arith.truncf %20 : vector<128x32xf32> to vector<128x32xbf16>
    %c0_16 = arith.constant 0 : index
    %c0_17 = arith.constant 0 : index
    %22 = vector.load %arg6[%c0_16, %c0_17] : memref<32x32xbf16, #tpu.memory_space<vmem>>, vector<32x32xbf16>
    %cst_18 = arith.constant dense<0.000000e+00> : vector<128x32xf32>
    %23 = tpu.matmul %21, %22, %cst_18 {dimension_numbers = #tpu.dot_dimension_numbers<[1], [0], [0], [1], [0, 0, 1, 1], [], []>} : vector<128x32xbf16>, vector<32x32xbf16>, vector<128x32xf32> -> vector<128x32xf32>
    %24 = vector.broadcast %8 : vector<1x32xf32> to vector<128x32xf32>
    %25 = arith.addf %23, %24 : vector<128x32xf32>
    %cst_19 = arith.constant 0.000000e+00 : f32
    %26 = vector.broadcast %cst_19 : f32 to vector<128x32xf32>
    %27 = arith.maximumf %25, %26 : vector<128x32xf32>
    %28 = arith.truncf %27 : vector<128x32xf32> to vector<128x32xbf16>
    %29 = arith.extf %28 : vector<128x32xbf16> to vector<128x32xf32>
    %cst_20 = arith.constant dense<0.000000e+00> : vector<16x32xf32>
    %30 = tpu.matmul %4, %28, %cst_20 {dimension_numbers = #tpu.dot_dimension_numbers<[1], [0], [0], [1], [0, 0, 1, 1], [], []>} : vector<16x128xbf16>, vector<128x32xbf16>, vector<16x32xf32> -> vector<16x32xf32>
    %cst_21 = arith.constant 1.250000e-01 : f32
    %31 = vector.broadcast %cst_21 : f32 to vector<16x32xf32>
    %32 = arith.mulf %30, %31 : vector<16x32xf32>
    %33 = arith.truncf %32 : vector<16x32xf32> to vector<16x32xbf16>
    %c0_22 = arith.constant 0 : index
    %c0_23 = arith.constant 0 : index
    %34 = vector.load %arg12[%c0_22, %c0_23] : memref<32x32xbf16, #tpu.memory_space<vmem>>, vector<32x32xbf16>
    %cst_24 = arith.constant dense<0.000000e+00> : vector<16x32xf32>
    %35 = tpu.matmul %33, %34, %cst_24 {dimension_numbers = #tpu.dot_dimension_numbers<[1], [0], [0], [1], [0, 0, 1, 1], [], []>} : vector<16x32xbf16>, vector<32x32xbf16>, vector<16x32xf32> -> vector<16x32xf32>
    %36 = math.tanh %35 : vector<16x32xf32>
    %37 = arith.truncf %36 : vector<16x32xf32> to vector<16x32xbf16>
    %cst_25 = arith.constant dense<0.000000e+00> : vector<128x32xf32>
    %38 = tpu.matmul %5, %37, %cst_25 {dimension_numbers = #tpu.dot_dimension_numbers<[1], [0], [0], [1], [0, 0, 1, 1], [], []>} : vector<128x16xbf16>, vector<16x32xbf16>, vector<128x32xf32> -> vector<128x32xf32>
    %39 = arith.mulf %29, %38 : vector<128x32xf32>
    %cst_26 = arith.constant dense<0.000000e+00> : vector<128xf32>
    %40 = vector.multi_reduction <add>, %39, %cst_26 [1] : vector<128x32xf32> to vector<128xf32>
    %41 = vector.shape_cast %40 : vector<128xf32> to vector<128x1xf32>
    %42 = math.absf %41 : vector<128x1xf32>
    %cst_27 = arith.constant 0.000000e+00 : f32
    %43 = vector.broadcast %cst_27 : f32 to vector<128x1xf32>
    %44 = arith.subf %43, %42 : vector<128x1xf32>
    %45 = math.exp %44 : vector<128x1xf32>
    %cst_28 = arith.constant 0.000000e+00 : f32
    %46 = vector.broadcast %cst_28 : f32 to vector<128x1xf32>
    %47 = arith.cmpf oge, %41, %46 : vector<128x1xf32>
    %cst_29 = arith.constant 1.000000e+00 : f32
    %48 = vector.broadcast %cst_29 : f32 to vector<128x1xf32>
    %49 = arith.addf %48, %45 : vector<128x1xf32>
    %cst_30 = arith.constant 1.000000e+00 : f32
    %50 = vector.broadcast %cst_30 : f32 to vector<128x1xf32>
    %51 = arith.divf %50, %49 : vector<128x1xf32>
    %cst_31 = arith.constant 1.000000e+00 : f32
    %52 = vector.broadcast %cst_31 : f32 to vector<128x1xf32>
    %53 = arith.addf %52, %45 : vector<128x1xf32>
    %54 = arith.divf %45, %53 : vector<128x1xf32>
    %55 = arith.select %47, %51, %54 : vector<128x1xi1>, vector<128x1xf32>
    %56 = vector.broadcast %55 : vector<128x1xf32> to vector<128x32xf32>
    %57 = arith.mulf %56, %29 : vector<128x32xf32>
    %58 = arith.truncf %57 : vector<128x32xf32> to vector<128x32xbf16>
    %cst_32 = arith.constant dense<0.000000e+00> : vector<16x32xf32>
    %59 = tpu.matmul %4, %58, %cst_32 {dimension_numbers = #tpu.dot_dimension_numbers<[1], [0], [0], [1], [0, 0, 1, 1], [], []>} : vector<16x128xbf16>, vector<128x32xbf16>, vector<16x32xf32> -> vector<16x32xf32>
    %60 = vector.extract_strided_slice %6 {offsets = [2, 0], sizes = [1, 32], strides = [1, 1]} : vector<6x32xf32> to vector<1x32xf32>
    %61 = vector.extract_strided_slice %6 {offsets = [3, 0], sizes = [1, 32], strides = [1, 1]} : vector<6x32xf32> to vector<1x32xf32>
    %cst_33 = arith.constant dense<0.000000e+00> : vector<128x32xf32>
    %62 = tpu.matmul %1, %28, %cst_33 {dimension_numbers = #tpu.dot_dimension_numbers<[1], [0], [0], [1], [0, 0, 1, 1], [], []>} : vector<128x128xbf16>, vector<128x32xbf16>, vector<128x32xf32> -> vector<128x32xf32>
    %63 = arith.extf %28 : vector<128x32xbf16> to vector<128x32xf32>
    %cst_34 = arith.constant 1.000000e+00 : f32
    %64 = vector.broadcast %cst_34 : f32 to vector<128x32xf32>
    %65 = arith.mulf %64, %63 : vector<128x32xf32>
    %66 = arith.addf %62, %65 : vector<128x32xf32>
    %67 = arith.truncf %66 : vector<128x32xf32> to vector<128x32xbf16>
    %c0_35 = arith.constant 0 : index
    %c0_36 = arith.constant 0 : index
    %68 = vector.load %arg7[%c0_35, %c0_36] : memref<32x32xbf16, #tpu.memory_space<vmem>>, vector<32x32xbf16>
    %cst_37 = arith.constant dense<0.000000e+00> : vector<128x32xf32>
    %69 = tpu.matmul %67, %68, %cst_37 {dimension_numbers = #tpu.dot_dimension_numbers<[1], [0], [0], [1], [0, 0, 1, 1], [], []>} : vector<128x32xbf16>, vector<32x32xbf16>, vector<128x32xf32> -> vector<128x32xf32>
    %70 = vector.broadcast %60 : vector<1x32xf32> to vector<128x32xf32>
    %71 = arith.addf %69, %70 : vector<128x32xf32>
    %cst_38 = arith.constant 0.000000e+00 : f32
    %72 = vector.broadcast %cst_38 : f32 to vector<128x32xf32>
    %73 = arith.maximumf %71, %72 : vector<128x32xf32>
    %74 = arith.truncf %73 : vector<128x32xf32> to vector<128x32xbf16>
    %c0_39 = arith.constant 0 : index
    %c0_40 = arith.constant 0 : index
    %75 = vector.load %arg8[%c0_39, %c0_40] : memref<32x32xbf16, #tpu.memory_space<vmem>>, vector<32x32xbf16>
    %cst_41 = arith.constant dense<0.000000e+00> : vector<128x32xf32>
    %76 = tpu.matmul %74, %75, %cst_41 {dimension_numbers = #tpu.dot_dimension_numbers<[1], [0], [0], [1], [0, 0, 1, 1], [], []>} : vector<128x32xbf16>, vector<32x32xbf16>, vector<128x32xf32> -> vector<128x32xf32>
    %77 = vector.broadcast %61 : vector<1x32xf32> to vector<128x32xf32>
    %78 = arith.addf %76, %77 : vector<128x32xf32>
    %cst_42 = arith.constant 0.000000e+00 : f32
    %79 = vector.broadcast %cst_42 : f32 to vector<128x32xf32>
    %80 = arith.maximumf %78, %79 : vector<128x32xf32>
    %81 = arith.truncf %80 : vector<128x32xf32> to vector<128x32xbf16>
    %82 = arith.extf %81 : vector<128x32xbf16> to vector<128x32xf32>
    %cst_43 = arith.constant dense<0.000000e+00> : vector<16x32xf32>
    %83 = tpu.matmul %4, %81, %cst_43 {dimension_numbers = #tpu.dot_dimension_numbers<[1], [0], [0], [1], [0, 0, 1, 1], [], []>} : vector<16x128xbf16>, vector<128x32xbf16>, vector<16x32xf32> -> vector<16x32xf32>
    %cst_44 = arith.constant 1.250000e-01 : f32
    %84 = vector.broadcast %cst_44 : f32 to vector<16x32xf32>
    %85 = arith.mulf %83, %84 : vector<16x32xf32>
    %86 = arith.truncf %85 : vector<16x32xf32> to vector<16x32xbf16>
    %c0_45 = arith.constant 0 : index
    %c0_46 = arith.constant 0 : index
    %87 = vector.load %arg12[%c0_45, %c0_46] : memref<32x32xbf16, #tpu.memory_space<vmem>>, vector<32x32xbf16>
    %cst_47 = arith.constant dense<0.000000e+00> : vector<16x32xf32>
    %88 = tpu.matmul %86, %87, %cst_47 {dimension_numbers = #tpu.dot_dimension_numbers<[1], [0], [0], [1], [0, 0, 1, 1], [], []>} : vector<16x32xbf16>, vector<32x32xbf16>, vector<16x32xf32> -> vector<16x32xf32>
    %89 = math.tanh %88 : vector<16x32xf32>
    %90 = arith.truncf %89 : vector<16x32xf32> to vector<16x32xbf16>
    %cst_48 = arith.constant dense<0.000000e+00> : vector<128x32xf32>
    %91 = tpu.matmul %5, %90, %cst_48 {dimension_numbers = #tpu.dot_dimension_numbers<[1], [0], [0], [1], [0, 0, 1, 1], [], []>} : vector<128x16xbf16>, vector<16x32xbf16>, vector<128x32xf32> -> vector<128x32xf32>
    %92 = arith.mulf %82, %91 : vector<128x32xf32>
    %cst_49 = arith.constant dense<0.000000e+00> : vector<128xf32>
    %93 = vector.multi_reduction <add>, %92, %cst_49 [1] : vector<128x32xf32> to vector<128xf32>
    %94 = vector.shape_cast %93 : vector<128xf32> to vector<128x1xf32>
    %95 = math.absf %94 : vector<128x1xf32>
    %cst_50 = arith.constant 0.000000e+00 : f32
    %96 = vector.broadcast %cst_50 : f32 to vector<128x1xf32>
    %97 = arith.subf %96, %95 : vector<128x1xf32>
    %98 = math.exp %97 : vector<128x1xf32>
    %cst_51 = arith.constant 0.000000e+00 : f32
    %99 = vector.broadcast %cst_51 : f32 to vector<128x1xf32>
    %100 = arith.cmpf oge, %94, %99 : vector<128x1xf32>
    %cst_52 = arith.constant 1.000000e+00 : f32
    %101 = vector.broadcast %cst_52 : f32 to vector<128x1xf32>
    %102 = arith.addf %101, %98 : vector<128x1xf32>
    %cst_53 = arith.constant 1.000000e+00 : f32
    %103 = vector.broadcast %cst_53 : f32 to vector<128x1xf32>
    %104 = arith.divf %103, %102 : vector<128x1xf32>
    %cst_54 = arith.constant 1.000000e+00 : f32
    %105 = vector.broadcast %cst_54 : f32 to vector<128x1xf32>
    %106 = arith.addf %105, %98 : vector<128x1xf32>
    %107 = arith.divf %98, %106 : vector<128x1xf32>
    %108 = arith.select %100, %104, %107 : vector<128x1xi1>, vector<128x1xf32>
    %109 = vector.broadcast %108 : vector<128x1xf32> to vector<128x32xf32>
    %110 = arith.mulf %109, %82 : vector<128x32xf32>
    %111 = arith.truncf %110 : vector<128x32xf32> to vector<128x32xbf16>
    %cst_55 = arith.constant dense<0.000000e+00> : vector<16x32xf32>
    %112 = tpu.matmul %4, %111, %cst_55 {dimension_numbers = #tpu.dot_dimension_numbers<[1], [0], [0], [1], [0, 0, 1, 1], [], []>} : vector<16x128xbf16>, vector<128x32xbf16>, vector<16x32xf32> -> vector<16x32xf32>
    %113 = vector.extract_strided_slice %6 {offsets = [4, 0], sizes = [1, 32], strides = [1, 1]} : vector<6x32xf32> to vector<1x32xf32>
    %114 = vector.extract_strided_slice %6 {offsets = [5, 0], sizes = [1, 32], strides = [1, 1]} : vector<6x32xf32> to vector<1x32xf32>
    %cst_56 = arith.constant dense<0.000000e+00> : vector<128x32xf32>
    %115 = tpu.matmul %1, %81, %cst_56 {dimension_numbers = #tpu.dot_dimension_numbers<[1], [0], [0], [1], [0, 0, 1, 1], [], []>} : vector<128x128xbf16>, vector<128x32xbf16>, vector<128x32xf32> -> vector<128x32xf32>
    %116 = arith.extf %81 : vector<128x32xbf16> to vector<128x32xf32>
    %cst_57 = arith.constant 1.000000e+00 : f32
    %117 = vector.broadcast %cst_57 : f32 to vector<128x32xf32>
    %118 = arith.mulf %117, %116 : vector<128x32xf32>
    %119 = arith.addf %115, %118 : vector<128x32xf32>
    %120 = arith.truncf %119 : vector<128x32xf32> to vector<128x32xbf16>
    %c0_58 = arith.constant 0 : index
    %c0_59 = arith.constant 0 : index
    %121 = vector.load %arg9[%c0_58, %c0_59] : memref<32x32xbf16, #tpu.memory_space<vmem>>, vector<32x32xbf16>
    %cst_60 = arith.constant dense<0.000000e+00> : vector<128x32xf32>
    %122 = tpu.matmul %120, %121, %cst_60 {dimension_numbers = #tpu.dot_dimension_numbers<[1], [0], [0], [1], [0, 0, 1, 1], [], []>} : vector<128x32xbf16>, vector<32x32xbf16>, vector<128x32xf32> -> vector<128x32xf32>
    %123 = vector.broadcast %113 : vector<1x32xf32> to vector<128x32xf32>
    %124 = arith.addf %122, %123 : vector<128x32xf32>
    %cst_61 = arith.constant 0.000000e+00 : f32
    %125 = vector.broadcast %cst_61 : f32 to vector<128x32xf32>
    %126 = arith.maximumf %124, %125 : vector<128x32xf32>
    %127 = arith.truncf %126 : vector<128x32xf32> to vector<128x32xbf16>
    %c0_62 = arith.constant 0 : index
    %c0_63 = arith.constant 0 : index
    %128 = vector.load %arg10[%c0_62, %c0_63] : memref<32x32xbf16, #tpu.memory_space<vmem>>, vector<32x32xbf16>
    %cst_64 = arith.constant dense<0.000000e+00> : vector<128x32xf32>
    %129 = tpu.matmul %127, %128, %cst_64 {dimension_numbers = #tpu.dot_dimension_numbers<[1], [0], [0], [1], [0, 0, 1, 1], [], []>} : vector<128x32xbf16>, vector<32x32xbf16>, vector<128x32xf32> -> vector<128x32xf32>
    %130 = vector.broadcast %114 : vector<1x32xf32> to vector<128x32xf32>
    %131 = arith.addf %129, %130 : vector<128x32xf32>
    %cst_65 = arith.constant 0.000000e+00 : f32
    %132 = vector.broadcast %cst_65 : f32 to vector<128x32xf32>
    %133 = arith.maximumf %131, %132 : vector<128x32xf32>
    %134 = arith.truncf %133 : vector<128x32xf32> to vector<128x32xbf16>
    %135 = arith.extf %134 : vector<128x32xbf16> to vector<128x32xf32>
    %cst_66 = arith.constant dense<0.000000e+00> : vector<16x32xf32>
    %136 = tpu.matmul %4, %134, %cst_66 {dimension_numbers = #tpu.dot_dimension_numbers<[1], [0], [0], [1], [0, 0, 1, 1], [], []>} : vector<16x128xbf16>, vector<128x32xbf16>, vector<16x32xf32> -> vector<16x32xf32>
    %cst_67 = arith.constant 1.250000e-01 : f32
    %137 = vector.broadcast %cst_67 : f32 to vector<16x32xf32>
    %138 = arith.mulf %136, %137 : vector<16x32xf32>
    %139 = arith.truncf %138 : vector<16x32xf32> to vector<16x32xbf16>
    %c0_68 = arith.constant 0 : index
    %c0_69 = arith.constant 0 : index
    %140 = vector.load %arg12[%c0_68, %c0_69] : memref<32x32xbf16, #tpu.memory_space<vmem>>, vector<32x32xbf16>
    %cst_70 = arith.constant dense<0.000000e+00> : vector<16x32xf32>
    %141 = tpu.matmul %139, %140, %cst_70 {dimension_numbers = #tpu.dot_dimension_numbers<[1], [0], [0], [1], [0, 0, 1, 1], [], []>} : vector<16x32xbf16>, vector<32x32xbf16>, vector<16x32xf32> -> vector<16x32xf32>
    %142 = math.tanh %141 : vector<16x32xf32>
    %143 = arith.truncf %142 : vector<16x32xf32> to vector<16x32xbf16>
    %cst_71 = arith.constant dense<0.000000e+00> : vector<128x32xf32>
    %144 = tpu.matmul %5, %143, %cst_71 {dimension_numbers = #tpu.dot_dimension_numbers<[1], [0], [0], [1], [0, 0, 1, 1], [], []>} : vector<128x16xbf16>, vector<16x32xbf16>, vector<128x32xf32> -> vector<128x32xf32>
    %145 = arith.mulf %135, %144 : vector<128x32xf32>
    %cst_72 = arith.constant dense<0.000000e+00> : vector<128xf32>
    %146 = vector.multi_reduction <add>, %145, %cst_72 [1] : vector<128x32xf32> to vector<128xf32>
    %147 = vector.shape_cast %146 : vector<128xf32> to vector<128x1xf32>
    %148 = math.absf %147 : vector<128x1xf32>
    %cst_73 = arith.constant 0.000000e+00 : f32
    %149 = vector.broadcast %cst_73 : f32 to vector<128x1xf32>
    %150 = arith.subf %149, %148 : vector<128x1xf32>
    %151 = math.exp %150 : vector<128x1xf32>
    %cst_74 = arith.constant 0.000000e+00 : f32
    %152 = vector.broadcast %cst_74 : f32 to vector<128x1xf32>
    %153 = arith.cmpf oge, %147, %152 : vector<128x1xf32>
    %cst_75 = arith.constant 1.000000e+00 : f32
    %154 = vector.broadcast %cst_75 : f32 to vector<128x1xf32>
    %155 = arith.addf %154, %151 : vector<128x1xf32>
    %cst_76 = arith.constant 1.000000e+00 : f32
    %156 = vector.broadcast %cst_76 : f32 to vector<128x1xf32>
    %157 = arith.divf %156, %155 : vector<128x1xf32>
    %cst_77 = arith.constant 1.000000e+00 : f32
    %158 = vector.broadcast %cst_77 : f32 to vector<128x1xf32>
    %159 = arith.addf %158, %151 : vector<128x1xf32>
    %160 = arith.divf %151, %159 : vector<128x1xf32>
    %161 = arith.select %153, %157, %160 : vector<128x1xi1>, vector<128x1xf32>
    %162 = vector.broadcast %161 : vector<128x1xf32> to vector<128x32xf32>
    %163 = arith.mulf %162, %135 : vector<128x32xf32>
    %164 = arith.truncf %163 : vector<128x32xf32> to vector<128x32xbf16>
    %cst_78 = arith.constant dense<0.000000e+00> : vector<16x32xf32>
    %165 = tpu.matmul %4, %164, %cst_78 {dimension_numbers = #tpu.dot_dimension_numbers<[1], [0], [0], [1], [0, 0, 1, 1], [], []>} : vector<16x128xbf16>, vector<128x32xbf16>, vector<16x32xf32> -> vector<16x32xf32>
    %c0_79 = arith.constant 0 : index
    %c0_80 = arith.constant 0 : index
    %166 = vector.load %arg13[%c0_79, %c0_80] : memref<96x32xbf16, #tpu.memory_space<vmem>>, vector<96x32xbf16>
    %167 = arith.truncf %59 : vector<16x32xf32> to vector<16x32xbf16>
    %168 = vector.extract_strided_slice %166 {offsets = [0, 0], sizes = [32, 32], strides = [1, 1]} : vector<96x32xbf16> to vector<32x32xbf16>
    %cst_81 = arith.constant dense<0.000000e+00> : vector<16x32xf32>
    %169 = tpu.matmul %167, %168, %cst_81 {dimension_numbers = #tpu.dot_dimension_numbers<[1], [0], [0], [1], [0, 0, 1, 1], [], []>} : vector<16x32xbf16>, vector<32x32xbf16>, vector<16x32xf32> -> vector<16x32xf32>
    %170 = arith.truncf %112 : vector<16x32xf32> to vector<16x32xbf16>
    %171 = vector.extract_strided_slice %166 {offsets = [32, 0], sizes = [32, 32], strides = [1, 1]} : vector<96x32xbf16> to vector<32x32xbf16>
    %cst_82 = arith.constant dense<0.000000e+00> : vector<16x32xf32>
    %172 = tpu.matmul %170, %171, %cst_82 {dimension_numbers = #tpu.dot_dimension_numbers<[1], [0], [0], [1], [0, 0, 1, 1], [], []>} : vector<16x32xbf16>, vector<32x32xbf16>, vector<16x32xf32> -> vector<16x32xf32>
    %173 = arith.addf %169, %172 : vector<16x32xf32>
    %174 = arith.truncf %165 : vector<16x32xf32> to vector<16x32xbf16>
    %175 = vector.extract_strided_slice %166 {offsets = [64, 0], sizes = [32, 32], strides = [1, 1]} : vector<96x32xbf16> to vector<32x32xbf16>
    %cst_83 = arith.constant dense<0.000000e+00> : vector<16x32xf32>
    %176 = tpu.matmul %174, %175, %cst_83 {dimension_numbers = #tpu.dot_dimension_numbers<[1], [0], [0], [1], [0, 0, 1, 1], [], []>} : vector<16x32xbf16>, vector<32x32xbf16>, vector<16x32xf32> -> vector<16x32xf32>
    %177 = arith.addf %173, %176 : vector<16x32xf32>
    %c0_84 = arith.constant 0 : index
    %c0_85 = arith.constant 0 : index
    %178 = vector.load %arg14[%c0_84, %c0_85] : memref<1x32xf32, #tpu.memory_space<vmem>>, vector<1x32xf32>
    %179 = vector.broadcast %178 : vector<1x32xf32> to vector<16x32xf32>
    %180 = arith.addf %177, %179 : vector<16x32xf32>
    %c0_86 = arith.constant 0 : index
    %c0_87 = arith.constant 0 : index
    %c0_88 = arith.constant 0 : index
    %181 = vector.load %arg15[%c0_86, %c0_87, %c0_88] : memref<1x16x32xf32, #tpu.memory_space<vmem>>, vector<1x16x32xf32>
    %182 = vector.shape_cast %181 : vector<1x16x32xf32> to vector<16x32xf32>
    %183 = vector.shape_cast %180 : vector<16x32xf32> to vector<1x16x32xf32>
    tpu.vector_store %arg15[%c0_86, %c0_87, %c0_88], %183 {strides = array<i32>} : memref<1x16x32xf32, #tpu.memory_space<vmem>>, vector<1x16x32xf32>,
    return
  }
  func.func @transform_0(%arg0: i32) -> (i32, i32, i32) {
    %c0_i32 = arith.constant 0 : i32
    %c0_i32_0 = arith.constant 0 : i32
    %c0_i32_1 = arith.constant 0 : i32
    return %arg0, %c0_i32, %c0_i32_0 : i32, i32, i32
  }
  func.func @transform_1(%arg0: i32) -> (i32, i32, i32) {
    %c0_i32 = arith.constant 0 : i32
    %c0_i32_0 = arith.constant 0 : i32
    %c0_i32_1 = arith.constant 0 : i32
    return %arg0, %c0_i32, %c0_i32_0 : i32, i32, i32
  }
  func.func @transform_2(%arg0: i32) -> (i32, i32) {
    %c0_i32 = arith.constant 0 : i32
    %c0_i32_0 = arith.constant 0 : i32
    %c0_i32_1 = arith.constant 0 : i32
    return %c0_i32, %c0_i32_0 : i32, i32
  }
  func.func @transform_3(%arg0: i32) -> (i32, i32) {
    %c0_i32 = arith.constant 0 : i32
    %c0_i32_0 = arith.constant 0 : i32
    %c0_i32_1 = arith.constant 0 : i32
    return %c0_i32, %c0_i32_0 : i32, i32
  }
  func.func @transform_4(%arg0: i32) -> (i32, i32) {
    %c0_i32 = arith.constant 0 : i32
    %c0_i32_0 = arith.constant 0 : i32
    %c0_i32_1 = arith.constant 0 : i32
    return %c0_i32, %c0_i32_0 : i32, i32
  }
  func.func @transform_5(%arg0: i32) -> (i32, i32) {
    %c0_i32 = arith.constant 0 : i32
    %c0_i32_0 = arith.constant 0 : i32
    %c0_i32_1 = arith.constant 0 : i32
    return %c0_i32, %c0_i32_0 : i32, i32
  }
  func.func @transform_6(%arg0: i32) -> (i32, i32) {
    %c0_i32 = arith.constant 0 : i32
    %c0_i32_0 = arith.constant 0 : i32
    %c0_i32_1 = arith.constant 0 : i32
    return %c0_i32, %c0_i32_0 : i32, i32
  }
  func.func @transform_7(%arg0: i32) -> (i32, i32) {
    %c0_i32 = arith.constant 0 : i32
    %c0_i32_0 = arith.constant 0 : i32
    %c0_i32_1 = arith.constant 0 : i32
    return %c0_i32, %c0_i32_0 : i32, i32
  }
  func.func @transform_8(%arg0: i32) -> (i32, i32) {
    %c0_i32 = arith.constant 0 : i32
    %c0_i32_0 = arith.constant 0 : i32
    %c0_i32_1 = arith.constant 0 : i32
    return %c0_i32, %c0_i32_0 : i32, i32
  }
  func.func @transform_9(%arg0: i32) -> (i32, i32) {
    %c0_i32 = arith.constant 0 : i32
    %c0_i32_0 = arith.constant 0 : i32
    %c0_i32_1 = arith.constant 0 : i32
    return %c0_i32, %c0_i32_0 : i32, i32
  }
  func.func @transform_10(%arg0: i32) -> (i32, i32) {
    %c0_i32 = arith.constant 0 : i32
    %c0_i32_0 = arith.constant 0 : i32
    %c0_i32_1 = arith.constant 0 : i32
    return %c0_i32, %c0_i32_0 : i32, i32
  }
  func.func @transform_11(%arg0: i32) -> (i32, i32) {
    %c0_i32 = arith.constant 0 : i32
    %c0_i32_0 = arith.constant 0 : i32
    %c0_i32_1 = arith.constant 0 : i32
    return %c0_i32, %c0_i32_0 : i32, i32
  }
  func.func @transform_12(%arg0: i32) -> (i32, i32) {
    %c0_i32 = arith.constant 0 : i32
    %c0_i32_0 = arith.constant 0 : i32
    %c0_i32_1 = arith.constant 0 : i32
    return %c0_i32, %c0_i32_0 : i32, i32
  }
  func.func @transform_13(%arg0: i32) -> (i32, i32) {
    %c0_i32 = arith.constant 0 : i32
    %c0_i32_0 = arith.constant 0 : i32
    %c0_i32_1 = arith.constant 0 : i32
    return %c0_i32, %c0_i32_0 : i32, i32
  }
  func.func @transform_14(%arg0: i32) -> (i32, i32, i32) {
    %c0_i32 = arith.constant 0 : i32
    %c0_i32_0 = arith.constant 0 : i32
    %c0_i32_1 = arith.constant 0 : i32
    return %arg0, %c0_i32, %c0_i32_0 : i32, i32, i32
  }
}

</mosaic_0001>

<bundles_post_ra>
// kernel: gin_forward.1
= control target key start
LH: loop header
LB: loop body
LE: loop exit
PB: predicated region body
PF: predicated region fallthrough
CT: control target
= control target key end

     0   :  { %s6509_s0 = inlined_call_operand.vmem [shape: bf16[2,128,128], index: 0, kind: input, shape index: {}]   ;;  %s6510_s1 = inlined_call_operand.vmem [shape: bf16[2,128,16], index: 1, kind: input, shape index: {}]   ;;  %s6511_s2 = inlined_call_operand.vmem [shape: bf16[16,128], index: 2, kind: input, shape index: {}]   ;;  %s6512_s3 = inlined_call_operand.vmem [shape: bf16[128,16], index: 3, kind: input, shape index: {}]   ;;  %s6513_s4 = inlined_call_operand.vmem [shape: bf16[16,32], index: 4, kind: input, shape index: {}]   ;;  %s6514_s5 = inlined_call_operand.vmem [shape: bf16[32,32], index: 5, kind: input, shape index: {}]   ;;  %s6515_s6 = inlined_call_operand.vmem [shape: bf16[32,32], index: 6, kind: input, shape index: {}]   ;;  %s6516_s7 = inlined_call_operand.vmem [shape: bf16[32,32], index: 7, kind: input, shape index: {}]   ;;  %s6517_s8 = inlined_call_operand.vmem [shape: bf16[32,32], index: 8, kind: input, shape index: {}]   ;;  %s6518_s9 = inlined_call_operand.vmem [shape: bf16[32,32], index: 9, kind: input, shape index: {}]   ;;  %s6519_s10 = inlined_call_operand.vmem [shape: f32[6,32], index: 10, kind: input, shape index: {}]   ;;  %s6520_s11 = inlined_call_operand.vmem [shape: bf16[32,32], index: 11, kind: input, shape index: {}]   ;;  %s6521_s12 = inlined_call_operand.vmem [shape: bf16[96,32], index: 12, kind: input, shape index: {}]   ;;  %s6522_s13 = inlined_call_operand.vmem [shape: f32[1,32], index: 13, kind: input, shape index: {}]   ;;  %s6523_s14 = inlined_call_operand.hbm [shape: f32[2,16,32], index: 14, kind: output, shape index: {}]  }
   0x1   :  { %6554 = sst [smem:[#allocation19_spill]] %s6509_s0 }
   0x2   :  { %6555 = sst [smem:[#allocation20_spill]] %s6510_s1 }
   0x3   :  { %19 = vsyncpa [#allocation3], 0 }
   0x4   :  { %21 = vsyncpa [#allocation3 + $0x1], 0  ;;  %s5055_s29 = smov 0   ;;  %s5057_s30 = smov 0  }
   0x5   :  { %s5059_s15 = smov 0   ;;  %s5061_s16 = smov 0  }
   0x6 LB: > { %s5076_s17 = sadd.s32 4294967295, %s4973_s16   ;;  %s3798_s18 = sadd.s32 4294967294, %s4973_s16   ;;  %s4973_s16 = sphi %s5061_s16, %s6634_s16   ;;  %s4969_s15 = sphi %s5059_s15, %s6633_s15   ;;  %s4965_s30 = sphi %s5057_s30, %s6632_s30   ;;  %s4961_s29 = sphi %s5055_s29, %s6631_s29  }
   0x7   : > { %s5080_s19 = sadd.s32 1, %s4973_s16   ;;  %s338_s20 = sadd.s32 1, %s4969_s15 }
   0x8   : > { %s335_s21 = ssub.s32 %s4973_s16, %s5080_s19  ;;  %p348_p0 = scmp.ne.s32.totalorder %s4969_s15, %s4965_s30 }
   0x9   : > { %p336_p1 = scmp.eq.s32.totalorder %s335_s21, 0  ;;  %p349_p2 = scmp.eq.s32.totalorder %s5076_s17, 1 }
   0xa   : > { %p354_p3 = scmp.ne.s32.totalorder %s4965_s30, %s4961_s29  ;;  %p355_p4 = scmp.eq.s32.totalorder %s3798_s18, 1 }
   0xb   : > { %s5091_s22 = scalar_select %p336_p1, %s4969_s15, %s338_s20  }
   0xc   : > { %p5093_p5 = por %p349_p2, %p348_p0  ;;  %p5097_p6 = por %p355_p4, %p354_p3 }
   0xd   : > { %6556 = sst [smem:[#allocation5_spill]] %s5091_s22  ;;  %p3801_p7 = scmp.ge.s32.totalorder %s4973_s16, 1 }
   0xe   : > { %p425_p8 = scmp.lt.s32.totalorder %s4973_s16, 3 }
  0x10   : > { %p426_p9 = pnand %p3801_p7, %p425_p8 }
  0x12   : > { %429 = sbr.rel (%p426_p9) target bundleno = 4811 (0x12cb), region = 76 }
  0x19   : > { %p476_p10 = scmp.lt.s32.totalorder %s5076_s17, 1  ;;  %s6559_s1 = sld [smem:[#allocation20_spill]]  ;;  %v4639_v16 = vld [vmem:[%s6513_s4] sm:$0xff]   ;;  %vm767_vm0 = vcmask 130048   ;;  %v4641_v34 = vld [vmem:[%s6514_s5 + $0x8] sm:$0xff]   ;;  %vm933_vm1 = vcmask 261120  }
  0x1a   : > { %s6560_s0 = sld [smem:[#allocation19_spill]]  ;;  %4176 = vmatprep.subr.bf16.mxu1 %v4639_v16  ;;  %v4640_v17 = vld [vmem:[%s6514_s5] sm:$0xff]   ;;  %vm4976_vm2 = vmmov 0   ;;  %s473_s27 = sand.u32 1, %s4965_s30  }
  0x1b   : > { %s477_s25 = scalar_select %p476_p10, %s5076_s17, 1  ;;  %4177 = vmatpush3.bf16.msra.mxu1 %v4639_v16 }
  0x1c   : > { %4194 = vmatprep.subr.bf16.mxu1 %v4640_v17  ;;  %s3802_s28 = sshll.u32 %s473_s27, 4 }
  0x1d   : > { %s3935_s26 = sshll.u32 %s477_s25, 6  ;;  %s3937_s25 = sshll.u32 %s5076_s17, 8 }
  0x1e   : > { %s6468_s17 = scalar_lea.sflag [#allocation3], %s473_s27 }
  0x1f   : > { %s485_s18 = scalar_lea.vmem %s6559_s1, %s3935_s26  ;;  %s6462_s1 = scalar_lea.hbm %s6523_s14, %s3937_s25 }
  0x20   : > { %s5111_s22 = scalar_lea.vmem %s6560_s0, %s3935_s26  ;;  %v503_v0 = vld [vmem:[%s485_s18] sm:$0xff]   ;;  %v505_v1 = vld [vmem:[%s485_s18 + $0x8] sm:$0xff]   ;;  %v5113_v2 = vld [vmem:[%s485_s18 + $0x10] sm:$0xff]   ;;  %s4977_s0 = smov [#allocation2]  }
  0x21   : > { %4144 = vmatprep.subr.bf16.mxu0 %v503_v0  ;;  %v5116_v3 = vld [vmem:[%s5111_s22] sm:$0xff]   ;;  %v5119_v4 = vld [vmem:[%s485_s18 + $0x18] sm:$0xff]   ;;  %v5125_v6 = vld [vmem:[%s485_s18 + $0x28] sm:$0xff]   ;;  %v540_v18 = vunpack.c.l.bf16 %v505_v1  ;;  %v541_v19 = vunpack.c.h.bf16 %v505_v1  ;;  %v538_v21 = vunpack.c.l.bf16 %v503_v0  ;;  %v539_v22 = vunpack.c.h.bf16 %v503_v0 }
  0x22   : > { %4145 = vmatpush3.bf16.msra.mxu0 %v503_v0  ;;  %4160 = vmatprep.mubr.bf16.mxu0 %v5116_v3  ;;  %v5122_v5 = vld [vmem:[%s485_s18 + $0x20] sm:$0xff]   ;;  %v5129_v7 = vld [vmem:[%s485_s18 + $0x30] sm:$0xff]   ;;  %v5133_v8 = vld [vmem:[%s485_s18 + $0x38] sm:$0xff]   ;;  %v544_v32 = vunpack.c.l.bf16 %v5119_v4  ;;  %v545_v33 = vunpack.c.h.bf16 %v5119_v4  ;;  %v542_v36 = vunpack.c.l.bf16 %v5113_v2  ;;  %v543_v37 = vunpack.c.h.bf16 %v5113_v2  ;;  %s4915_s18 = sshll.u32 %s4977_s0, 4  ;;  %s4916_s18 = int_to_ptr.vmem [resolvable:$false] %s4915_s18 }
  0x23   : > { %4146 = vmatprep.subr.bf16.mxu0 %v505_v1  ;;  %v5141_v9 = vld [vmem:[%s5111_s22 + $0x8] sm:$0xff]   ;;  %v5145_v10 = vld [vmem:[%s5111_s22 + $0x10] sm:$0xff]   ;;  %v5150_v11 = vld [vmem:[%s5111_s22 + $0x18] sm:$0xff]   ;;  %v548_v47 = vunpack.c.l.bf16 %v5125_v6  ;;  %v549_v48 = vunpack.c.h.bf16 %v5125_v6  ;;  %v546_v50 = vunpack.c.l.bf16 %v5122_v5  ;;  %v547_v51 = vunpack.c.h.bf16 %v5122_v5  ;;  %s4917_s20 = scalar_lea.vmem %s4916_s18, 512 }
  0x24   : > { %v5153_v12 = vld [vmem:[%s5111_s22 + $0x20] sm:$0xff]   ;;  %v5158_v13 = vld [vmem:[%s5111_s22 + $0x28] sm:$0xff]   ;;  %v5161_v14 = vld [vmem:[%s5111_s22 + $0x30] sm:$0xff]   ;;  %v552_v61 = vunpack.c.l.bf16 %v5133_v8  ;;  %v553_v62 = vunpack.c.h.bf16 %v5133_v8  ;;  %v550_v0 = vunpack.c.l.bf16 %v5129_v7 }
  0x25   : > { %v5166_v15 = vld [vmem:[%s5111_s22 + $0x38] sm:$0xff]  }
  0x26   : > { %4147 = vmatpush3.bf16.msra.mxu0 %v505_v1  ;;  %v551_v1 = vunpack.c.h.bf16 %v5129_v7 }
  0x27   : > { %4148 = vmatprep.subr.bf16.mxu0 %v5113_v2 }
  0x2a   : > { %4149 = vmatpush3.bf16.msra.mxu0 %v5113_v2 }
  0x2b   : > { %4150 = vmatprep.subr.bf16.mxu0 %v5119_v4 }
  0x2e   : > { %4151 = vmatpush3.bf16.msra.mxu0 %v5119_v4 }
  0x2f   : > { %4152 = vmatprep.subr.bf16.mxu0 %v5122_v5 }
  0x32   : > { %4153 = vmatpush3.bf16.msra.mxu0 %v5122_v5 }
  0x33   : > { %4154 = vmatprep.subr.bf16.mxu0 %v5125_v6 }
  0x36   : > { %4155 = vmatpush3.bf16.msra.mxu0 %v5125_v6 }
  0x37   : > { %4156 = vmatprep.subr.bf16.mxu0 %v5129_v7 }
  0x3a   : > { %4157 = vmatpush3.bf16.msra.mxu0 %v5129_v7 }
  0x3b   : > { %4158 = vmatprep.subr.bf16.mxu0 %v5133_v8 }
  0x3e   : > { %4159 = vmatpush3.bf16.msra.mxu0 %v5133_v8  ;;  %v757_v8 = vlaneseq }
  0x41   : > { %4161 = vmatmul.mubr.bf16.vlgmr.msra.gmra.mrb[0].mxu0 %v5141_v9 }
  0x42   : > { %4164 = vmatprep.mubr.bf16.mxu0 %v5145_v10 }
  0x49   : > { %4165 = vmatmul.mubr.bf16.gmra.mrb[4].mxu0 %v5150_v11 }
  0x4a   : > { %4168 = vmatprep.mubr.bf16.mxu0 %v5153_v12 }
  0x51   : > { %4169 = vmatmul.mubr.bf16.gmra.mrb[8].mxu0 %v5158_v13 }
  0x52   : > { %4172 = vmatprep.mubr.bf16.mxu0 %v5161_v14 }
  0x59   : > { %4173 = vmatmul.mubr.bf16.gmra.mrb[12].mxu0 %v5166_v15 }
 0x114   : > { %v4162_v20 = vpop.f32.mrb[0].mxu0 }
 0x115   : > { %v684_v23 = vpop.f32.mrb[1].mxu0  ;;  %v693_v25 = vadd.f32 %v4162_v20, %v540_v18 }
 0x116   : > { %v4163_v24 = vpop.f32.mrb[2].mxu0  ;;  %v685_v28 = vadd.f32 %v684_v23, %v538_v21  ;;  %v5198_v21 = vshrl.u32 %v757_v8, 7 }
 0x117   : > { %v696_v26 = vadd.f32 %v4163_v24, %v541_v19  ;;  %v687_v27 = vpop.f32.mrb[3].mxu0 }
 0x118   : > { %v688_v29 = vadd.f32 %v687_v27, %v539_v22  ;;  %6561 = vst [vmem:[#allocation6_spill] sm:$0xff] %v5198_v21  ;;  %v759_v7 = vsub.s32 0, %v5198_v21  ;;  %v5204_v22 = vld [vmem:[%s6519_s10] sm:$0x3f] }
 0x119   : > { %v748_v30 = vpack.c.bf16 %v696_v26, %v693_v25 }
 0x11a   : > { %v747_v31 = vpack.c.bf16 %v688_v29, %v685_v28  ;;  %v760_v23 = vrot.slane %v5204_v22, %v759_v7 }
 0x11c   : > { %v4166_v35 = vpop.f32.mrb[4].mxu0  ;;  %4178 = vmatprep.mubr.msk.bf16.mxu1 %vm767_vm0, %v747_v31 }
 0x11d   : > { %v700_v38 = vpop.f32.mrb[5].mxu0  ;;  %4179 = vmatmul.mubr.msk.bf16.vlgmr.msra.gmra.mrb[0].mxu1 %vm767_vm0, %v748_v30  ;;  %v709_v40 = vadd.f32 %v4166_v35, %v544_v32 }
 0x11e   : > { %v4167_v39 = vpop.f32.mrb[6].mxu0  ;;  %4195 = vmatpush3.bf16.msra.mxu1 %v4640_v17  ;;  %v701_v43 = vadd.f32 %v700_v38, %v542_v36 }
 0x11f   : > { %v712_v41 = vadd.f32 %v4167_v39, %v545_v33  ;;  %v703_v42 = vpop.f32.mrb[7].mxu0  ;;  %4196 = vmatprep.subr.bf16.mxu1 %v4641_v34 }
 0x120   : > { %v704_v44 = vadd.f32 %v703_v42, %v543_v37 }
 0x121   : > { %v750_v45 = vpack.c.bf16 %v712_v41, %v709_v40 }
 0x122   : > { %v749_v46 = vpack.c.bf16 %v704_v44, %v701_v43  ;;  %4197 = vmatpush3.bf16.msra.mxu1 %v4641_v34 }
 0x124   : > { %v4170_v49 = vpop.f32.mrb[8].mxu0  ;;  %4182 = vmatprep.mubr.msk.bf16.mxu1 %vm767_vm0, %v749_v46 }
 0x125   : > { %v716_v52 = vpop.f32.mrb[9].mxu0  ;;  %4183 = vmatmul.mubr.msk.bf16.gmra.mrb[4].mxu1 %vm767_vm0, %v750_v45  ;;  %v725_v54 = vadd.f32 %v4170_v49, %v548_v47 }
 0x126   : > { %v4171_v53 = vpop.f32.mrb[10].mxu0  ;;  %v717_v57 = vadd.f32 %v716_v52, %v546_v50 }
 0x127   : > { %v728_v55 = vadd.f32 %v4171_v53, %v549_v48  ;;  %v719_v56 = vpop.f32.mrb[11].mxu0 }
 0x128   : > { %v720_v58 = vadd.f32 %v719_v56, %v547_v51 }
 0x129   : > { %v752_v59 = vpack.c.bf16 %v728_v55, %v725_v54 }
 0x12a   : > { %v751_v60 = vpack.c.bf16 %v720_v58, %v717_v57 }
 0x12c   : > { %v4174_v63 = vpop.f32.mrb[12].mxu0  ;;  %4186 = vmatprep.mubr.msk.bf16.mxu1 %vm767_vm0, %v751_v60 }
 0x12d   : > { %v732_v2 = vpop.f32.mrb[13].mxu0  ;;  %4187 = vmatmul.mubr.msk.bf16.gmra.mrb[8].mxu1 %vm767_vm0, %v752_v59  ;;  %v741_v5 = vadd.f32 %v4174_v63, %v552_v61 }
 0x12e   : > { %v4175_v4 = vpop.f32.mrb[14].mxu0  ;;  %v733_v17 = vadd.f32 %v732_v2, %v550_v0 }
 0x12f   : > { %v744_v6 = vadd.f32 %v4175_v4, %v553_v62  ;;  %v735_v16 = vpop.f32.mrb[15].mxu0 }
 0x130   : > { %v736_v18 = vadd.f32 %v735_v16, %v551_v1 }
 0x131   : > { %v754_v19 = vpack.c.bf16 %v744_v6, %v741_v5 }
 0x132   : > { %v753_v20 = vpack.c.bf16 %v736_v18, %v733_v17 }
 0x134   : > { %4190 = vmatprep.mubr.msk.bf16.mxu1 %vm767_vm0, %v753_v20 }
 0x135   : > { %4191 = vmatmul.mubr.msk.bf16.gmra.mrb[12].mxu1 %vm767_vm0, %v754_v19 }
 0x1f0   : > { %v4180_v24 = vpop.f32.mrb[0].mxu1 }
 0x1f1   : > { %v835_v25 = vadd.f32 %v4180_v24, %v760_v23  ;;  %v826_v26 = vpop.f32.mrb[1].mxu1 }
 0x1f2   : > { %v827_v27 = vadd.f32 %v826_v26, %v760_v23  ;;  %v4181_v28 = vpop.f32.mrb[2].mxu1 }
 0x1f3   : > { %v838_v29 = vadd.f32 %v4181_v28, %v760_v23  ;;  %v829_v30 = vpop.f32.mrb[3].mxu1  ;;  %v891_v32 = vmax.f32 %v835_v25, 0.0  ;;  %v4644_v28 = vld [vmem:[%s6520_s11 + $0x8] sm:$0xff]  }
 0x1f4   : > { %v830_v31 = vadd.f32 %v829_v30, %v760_v23  ;;  %v889_v34 = vmax.f32 %v827_v27, 0.0  ;;  %v6524_v27 = vmov 0.0  }
 0x1f5   : > { %v892_v33 = vmax.f32 %v838_v29, 0.0  ;;  %4214 = vmatprep.subr.bf16.mxu0 %v6524_v27  ;;  %4234 = vmatprep.subr.bf16.mxu1 %v6524_v27  ;;  %v919_v29 = vsub.s32 1, %v5198_v21 }
 0x1f6   : > { %v890_v35 = vmax.f32 %v830_v31, 0.0  ;;  %4230 = vmatprep.mubr.msk.bf16.mxu0 %vm4976_vm2, %v6524_v27 }
 0x1f7   : > { %v906_v36 = vpack.c.bf16 %v892_v33, %v891_v32  ;;  %v920_v30 = vrot.slane %v5204_v22, %v919_v29 }
 0x1f8   : > { %v905_v37 = vpack.c.bf16 %v890_v35, %v889_v34  ;;  %v4184_v38 = vpop.f32.mrb[4].mxu1 }
 0x1f9   : > { %v851_v39 = vadd.f32 %v4184_v38, %v760_v23  ;;  %v842_v40 = vpop.f32.mrb[5].mxu1 }
 0x1fa   : > { %v843_v41 = vadd.f32 %v842_v40, %v760_v23  ;;  %v4185_v42 = vpop.f32.mrb[6].mxu1  ;;  %4198 = vmatprep.mubr.msk.bf16.mxu1 %vm933_vm1, %v905_v37 }
 0x1fb   : > { %v854_v43 = vadd.f32 %v4185_v42, %v760_v23  ;;  %v845_v44 = vpop.f32.mrb[7].mxu1  ;;  %4199 = vmatmul.mubr.msk.bf16.vlgmr.msra.gmra.mrb[16].mxu1 %vm933_vm1, %v906_v36  ;;  %v895_v46 = vmax.f32 %v851_v39, 0.0 }
 0x1fc   : > { %v846_v45 = vadd.f32 %v845_v44, %v760_v23  ;;  %v893_v48 = vmax.f32 %v843_v41, 0.0 }
 0x1fd   : > { %v896_v47 = vmax.f32 %v854_v43, 0.0 }
 0x1fe   : > { %v894_v49 = vmax.f32 %v846_v45, 0.0 }
 0x1ff   : > { %v908_v50 = vpack.c.bf16 %v896_v47, %v895_v46 }
 0x200   : > { %v907_v51 = vpack.c.bf16 %v894_v49, %v893_v48  ;;  %v4188_v52 = vpop.f32.mrb[8].mxu1 }
 0x201   : > { %v867_v53 = vadd.f32 %v4188_v52, %v760_v23  ;;  %v858_v54 = vpop.f32.mrb[9].mxu1 }
 0x202   : > { %v859_v55 = vadd.f32 %v858_v54, %v760_v23  ;;  %v4189_v56 = vpop.f32.mrb[10].mxu1  ;;  %4202 = vmatprep.mubr.msk.bf16.mxu1 %vm933_vm1, %v907_v51 }
 0x203   : > { %v870_v57 = vadd.f32 %v4189_v56, %v760_v23  ;;  %v861_v58 = vpop.f32.mrb[11].mxu1  ;;  %4203 = vmatmul.mubr.msk.bf16.gmra.mrb[20].mxu1 %vm933_vm1, %v908_v50  ;;  %v899_v60 = vmax.f32 %v867_v53, 0.0 }
 0x204   : > { %v862_v59 = vadd.f32 %v861_v58, %v760_v23  ;;  %v897_v62 = vmax.f32 %v859_v55, 0.0 }
 0x205   : > { %v900_v61 = vmax.f32 %v870_v57, 0.0 }
 0x206   : > { %v898_v63 = vmax.f32 %v862_v59, 0.0 }
 0x207   : > { %v910_v0 = vpack.c.bf16 %v900_v61, %v899_v60 }
 0x208   : > { %v909_v1 = vpack.c.bf16 %v898_v63, %v897_v62  ;;  %v4192_v2 = vpop.f32.mrb[12].mxu1 }
 0x209   : > { %v883_v4 = vadd.f32 %v4192_v2, %v760_v23  ;;  %v874_v5 = vpop.f32.mrb[13].mxu1 }
 0x20a   : > { %v875_v6 = vadd.f32 %v874_v5, %v760_v23  ;;  %v4193_v16 = vpop.f32.mrb[14].mxu1  ;;  %4206 = vmatprep.mubr.msk.bf16.mxu1 %vm933_vm1, %v909_v1 }
 0x20b   : > { %v886_v17 = vadd.f32 %v4193_v16, %v760_v23  ;;  %v877_v18 = vpop.f32.mrb[15].mxu1  ;;  %4207 = vmatmul.mubr.msk.bf16.gmra.mrb[24].mxu1 %vm933_vm1, %v910_v0  ;;  %v903_v20 = vmax.f32 %v883_v4, 0.0 }
 0x20c   : > { %v878_v19 = vadd.f32 %v877_v18, %v760_v23  ;;  %v901_v7 = vmax.f32 %v875_v6, 0.0  ;;  %v4643_v23 = vld [vmem:[%s6520_s11] sm:$0xff]  }
 0x20d   : > { %v904_v8 = vmax.f32 %v886_v17, 0.0  ;;  %4235 = vmatpush3.bf16.msra.mxu1 %v4643_v23 }
 0x20e   : > { %v902_v24 = vmax.f32 %v878_v19, 0.0  ;;  %4236 = vmatprep.subr.bf16.mxu1 %v6524_v27 }
 0x20f   : > { %v912_v25 = vpack.c.bf16 %v904_v8, %v903_v20 }
 0x210   : > { %v911_v26 = vpack.c.bf16 %v902_v24, %v901_v7 }
 0x211   : > { %4237 = vmatpush3.bf16.msra.mxu1 %v4644_v28 }
 0x212   : > { %4210 = vmatprep.mubr.msk.bf16.mxu1 %vm933_vm1, %v911_v26  ;;  %4260 = vmatprep.subr.bf16.mxu1 %v6524_v27 }
 0x213   : > { %4211 = vmatmul.mubr.msk.bf16.gmra.mrb[28].mxu1 %vm933_vm1, %v912_v25 }
 0x214   : > { %4238 = vmatprep.mubr.msk.bf16.mxu1 %vm4976_vm2, %v6524_v27 }
 0x2ce   : > { %v4200_v31 = vpop.f32.mrb[16].mxu1 }
 0x2cf   : > { %v1001_v32 = vadd.f32 %v4200_v31, %v920_v30  ;;  %v992_v33 = vpop.f32.mrb[17].mxu1 }
 0x2d0   : > { %v993_v34 = vadd.f32 %v992_v33, %v920_v30  ;;  %v4201_v35 = vpop.f32.mrb[18].mxu1 }
 0x2d1   : > { %v1004_v36 = vadd.f32 %v4201_v35, %v920_v30  ;;  %v995_v37 = vpop.f32.mrb[19].mxu1  ;;  %v1057_v39 = vmax.f32 %v1001_v32, 0.0 }
 0x2d2   : > { %v996_v38 = vadd.f32 %v995_v37, %v920_v30  ;;  %v1055_v41 = vmax.f32 %v993_v34, 0.0 }
 0x2d3   : > { %v1058_v40 = vmax.f32 %v1004_v36, 0.0 }
 0x2d4   : > { %v1056_v42 = vmax.f32 %v996_v38, 0.0 }
 0x2d5   : > { %v5231_v43 = vpack.c.bf16 %v1058_v40, %v1057_v39 }
 0x2d6   : > { %v5233_v44 = vpack.c.bf16 %v1056_v42, %v1055_v41  ;;  %v4204_v45 = vpop.f32.mrb[20].mxu1  ;;  %v4645_v41 = vld [vmem:[%s6512_s3] sm:$0xff]  }
 0x2d7   : > { %v1017_v46 = vadd.f32 %v4204_v45, %v920_v30  ;;  %v1008_v47 = vpop.f32.mrb[21].mxu1 }
 0x2d8   : > { %v1009_v22 = vadd.f32 %v1008_v47, %v920_v30  ;;  %v4205_v48 = vpop.f32.mrb[22].mxu1  ;;  %4215 = vmatpush3.bf16.msra.mxu0 %v5233_v44 }
 0x2d9   : > { %v1020_v49 = vadd.f32 %v4205_v48, %v920_v30  ;;  %v1011_v50 = vpop.f32.mrb[23].mxu1  ;;  %4216 = vmatprep.subr.bf16.mxu0 %v6524_v27  ;;  %v1061_v52 = vmax.f32 %v1017_v46, 0.0 }
 0x2da   : > { %v1012_v51 = vadd.f32 %v1011_v50, %v920_v30  ;;  %v1059_v54 = vmax.f32 %v1009_v22, 0.0  ;;  %v4646_v50 = vld [vmem:[%s6512_s3 + $0x8] sm:$0xff]  }
 0x2db   : > { %v1062_v53 = vmax.f32 %v1020_v49, 0.0 }
 0x2dc   : > { %v1060_v55 = vmax.f32 %v1012_v51, 0.0  ;;  %4217 = vmatpush3.bf16.msra.mxu0 %v5231_v43  ;;  %v4647_v51 = vld [vmem:[%s6512_s3 + $0x10] sm:$0xff]  }
 0x2dd   : > { %v5238_v56 = vpack.c.bf16 %v1062_v53, %v1061_v52  ;;  %4218 = vmatprep.subr.bf16.mxu0 %v6524_v27  ;;  %v4648_v52 = vld [vmem:[%s6512_s3 + $0x18] sm:$0xff]   ;;  %v4649_v53 = vld [vmem:[%s6512_s3 + $0x20] sm:$0xff]  }
 0x2de   : > { %v5241_v57 = vpack.c.bf16 %v1060_v55, %v1059_v54  ;;  %v4208_v58 = vpop.f32.mrb[24].mxu1  ;;  %v4650_v54 = vld [vmem:[%s6512_s3 + $0x28] sm:$0xff]   ;;  %v4651_v55 = vld [vmem:[%s6512_s3 + $0x30] sm:$0xff]  }
 0x2df   : > { %v1033_v59 = vadd.f32 %v4208_v58, %v920_v30  ;;  %v1024_v60 = vpop.f32.mrb[25].mxu1  ;;  %v4652_v58 = vld [vmem:[%s6512_s3 + $0x38] sm:$0xff]  }
 0x2e0   : > { %v1025_v61 = vadd.f32 %v1024_v60, %v920_v30  ;;  %v4209_v62 = vpop.f32.mrb[26].mxu1  ;;  %4219 = vmatpush3.bf16.msra.mxu0 %v5241_v57  ;;  %v5331_v60 = vunpack.c.l.bf16 %v5233_v44 }
 0x2e1   : > { %v1036_v63 = vadd.f32 %v4209_v62, %v920_v30  ;;  %v1027_v0 = vpop.f32.mrb[27].mxu1  ;;  %4220 = vmatprep.subr.bf16.mxu0 %v6524_v27  ;;  %v1065_v2 = vmax.f32 %v1033_v59, 0.0 }
 0x2e2   : > { %v1028_v1 = vadd.f32 %v1027_v0, %v920_v30  ;;  %v1063_v5 = vmax.f32 %v1025_v61, 0.0 }
 0x2e3   : > { %v1066_v4 = vmax.f32 %v1036_v63, 0.0 }
 0x2e4   : > { %v1064_v6 = vmax.f32 %v1028_v1, 0.0  ;;  %4221 = vmatpush3.bf16.msra.mxu0 %v5238_v56 }
 0x2e5   : > { %v5246_v16 = vpack.c.bf16 %v1066_v4, %v1065_v2  ;;  %4222 = vmatprep.subr.bf16.mxu0 %v6524_v27  ;;  %v5347_v2 = vunpack.c.l.bf16 %v5241_v57 }
 0x2e6   : > { %v5249_v17 = vpack.c.bf16 %v1064_v6, %v1063_v5  ;;  %v4212_v18 = vpop.f32.mrb[28].mxu1  ;;  %v5351_v5 = vunpack.c.l.bf16 %v5238_v56 }
 0x2e7   : > { %v1049_v19 = vadd.f32 %v4212_v18, %v920_v30  ;;  %v1040_v20 = vpop.f32.mrb[29].mxu1 }
 0x2e8   : > { %v1041_v8 = vadd.f32 %v1040_v20, %v920_v30  ;;  %v4213_v7 = vpop.f32.mrb[30].mxu1  ;;  %4223 = vmatpush3.bf16.msra.mxu0 %v5249_v17 }
 0x2e9   : > { %v1052_v24 = vadd.f32 %v4213_v7, %v920_v30  ;;  %v1043_v25 = vpop.f32.mrb[31].mxu1  ;;  %4224 = vmatprep.subr.bf16.mxu0 %v6524_v27  ;;  %v1069_v23 = vmax.f32 %v1049_v19, 0.0  ;;  %v5355_v19 = vunpack.c.h.bf16 %v5241_v57  ;;  %v5359_v7 = vunpack.c.h.bf16 %v5238_v56 }
 0x2ea   : > { %v1044_v26 = vadd.f32 %v1043_v25, %v920_v30  ;;  %v1067_v29 = vmax.f32 %v1041_v8, 0.0  ;;  %v5264_v30 = vld [vmem:[%s6511_s2] sm:$0xff]  }
 0x2eb   : > { %v1070_v28 = vmax.f32 %v1052_v24, 0.0 }
 0x2ec   : > { %v1068_v31 = vmax.f32 %v1044_v26, 0.0  ;;  %4225 = vmatpush3.bf16.msra.mxu0 %v5246_v16 }
 0x2ed   : > { %v5254_v32 = vpack.c.bf16 %v1070_v28, %v1069_v23  ;;  %4226 = vmatprep.subr.bf16.mxu0 %v6524_v27 }
 0x2ee   : > { %v5257_v33 = vpack.c.bf16 %v1068_v31, %v1067_v29 }
 0x2f0   : > { %4227 = vmatpush3.bf16.msra.mxu0 %v5257_v33 }
 0x2f1   : > { %4228 = vmatprep.subr.bf16.mxu0 %v6524_v27 }
 0x2f4   : > { %4229 = vmatpush3.bf16.msra.mxu0 %v5254_v32 }
 0x2f7   : > { %4231 = vmatmul.mubr.bf16.vlgmr.msra.gmra.mrb[16].mxu0 %v5264_v30 }
 0x2f8   : > { %4244 = vmatprep.mubr.msk.bf16.mxu0 %vm767_vm0, %v4645_v41 }
 0x3ca   : > { %v1135_v34 = vpop.f32.mrb[16].mxu0 }
 0x3cb   : > { %v4232_v35 = vpop.f32.mrb[17].mxu0  ;;  %v1142_v37 = vmul.f32 0.125, %v1135_v34 }
 0x3cc   : > { %v1138_v36 = vpop.f32.mrb[18].mxu0 }
 0x3cd   : > { %v1143_v38 = vmul.f32 0.125, %v1138_v36  ;;  %v4233_v39 = vpop.f32.mrb[19].mxu0 }
 0x3cf   : > { %v1144_v40 = vpack.c.bf16 %v1143_v38, %v1142_v37  ;;  %v5375_v37 = vunpack.c.h.bf16 %v5249_v17 }
 0x3d1   : > { %4239 = vmatmul.mubr.msk.bf16.vlgmr.msra.gmra.mrb[32].mxu1 %vm933_vm1, %v1144_v40  ;;  %v5379_v40 = vunpack.c.h.bf16 %v5246_v16 }
 0x3d2   : > { %4276 = vmatprep.mubr.msk.bf16.mxu1 %vm4976_vm2, %v6524_v27 }
 0x4a4   : > { %v1198_v42 = vpop.f32.mrb[32].mxu1 }
 0x4a5   : > { %v4240_v45 = vpop.f32.mrb[33].mxu1  ;;  %4675 = vtanh.f32 %v1198_v42 }
 0x4a6   : > { %v1201_v46 = vpop.f32.mrb[34].mxu1 }
 0x4a7   : > { %4677 = vtanh.f32 %v1201_v46  ;;  %v4241_v47 = vpop.f32.mrb[35].mxu1 }
 0x4af   : > { %v4676_v22 = vpop.eup %4675 }
 0x4b1   : > { %v4678_v48 = vpop.eup %4677 }
 0x4b2   : > { %v1207_v49 = vpack.c.bf16 %v4678_v48, %v4676_v22 }
 0x4b4   : > { %4242 = vmatprep.subr.bf16.mxu0 %v1207_v49 }
 0x4b5   : > { %4243 = vmatpush3.bf16.msra.mxu0 %v1207_v49 }
 0x4b6   : > { %4280 = vmatprep.subr.bf16.mxu0 %v5233_v44 }
 0x4b8   : > { %4245 = vmatmul.mubr.msk.bf16.vlgmr.msra.gmra.mrb[20].mxu0 %vm767_vm0, %v4646_v50 }
 0x4b9   : > { %4281 = vmatpush3.bf16.msra.mxu0 %v5233_v44  ;;  %4248 = vmatprep.mubr.msk.bf16.mxu0 %vm767_vm0, %v4647_v51 }
 0x4ba   : > { %4282 = vmatprep.subr.bf16.mxu0 %v5231_v43 }
 0x4bd   : > { %4283 = vmatpush3.bf16.msra.mxu0 %v5231_v43 }
 0x4be   : > { %4284 = vmatprep.subr.bf16.mxu0 %v5241_v57 }
 0x4c0   : > { %4249 = vmatmul.mubr.msk.bf16.gmra.mrb[24].mxu0 %vm767_vm0, %v4648_v52  ;;  %v5395_v52 = vunpack.c.h.bf16 %v5257_v33 }
 0x4c1   : > { %4285 = vmatpush3.bf16.msra.mxu0 %v5241_v57  ;;  %4252 = vmatprep.mubr.msk.bf16.mxu0 %vm767_vm0, %v4649_v53  ;;  %v5366_v57 = vunpack.c.l.bf16 %v5249_v17 }
 0x4c2   : > { %4286 = vmatprep.subr.bf16.mxu0 %v5238_v56 }
 0x4c5   : > { %4287 = vmatpush3.bf16.msra.mxu0 %v5238_v56  ;;  %v5370_v56 = vunpack.c.l.bf16 %v5246_v16 }
 0x4c6   : > { %4288 = vmatprep.subr.bf16.mxu0 %v5249_v17 }
 0x4c8   : > { %4253 = vmatmul.mubr.msk.bf16.gmra.mrb[28].mxu0 %vm767_vm0, %v4650_v54 }
 0x4c9   : > { %4289 = vmatpush3.bf16.msra.mxu0 %v5249_v17  ;;  %4256 = vmatprep.mubr.msk.bf16.mxu0 %vm767_vm0, %v4651_v55  ;;  %v5386_v17 = vunpack.c.l.bf16 %v5257_v33  ;;  %v5399_v55 = vunpack.c.h.bf16 %v5254_v32 }
 0x4ca   : > { %4290 = vmatprep.subr.bf16.mxu0 %v5246_v16 }
 0x4cd   : > { %4291 = vmatpush3.bf16.msra.mxu0 %v5246_v16  ;;  %v5390_v16 = vunpack.c.l.bf16 %v5254_v32 }
 0x4ce   : > { %4292 = vmatprep.subr.bf16.mxu0 %v5257_v33 }
 0x4d0   : > { %4257 = vmatmul.mubr.msk.bf16.gmra.mrb[32].mxu0 %vm767_vm0, %v4652_v58 }
 0x4d1   : > { %4293 = vmatpush3.bf16.msra.mxu0 %v5257_v33  ;;  %4296 = vmatprep.mubr.bf16.mxu0 %v5116_v3  ;;  %v5328_v3 = vunpack.c.l.bf16 %v5231_v43 }
 0x4d2   : > { %4294 = vmatprep.subr.bf16.mxu0 %v5254_v32 }
 0x4d5   : > { %4295 = vmatpush3.bf16.msra.mxu0 %v5254_v32 }
 0x4d8   : > { %4297 = vmatmul.mubr.bf16.vlgmr.msra.gmra.mrb[36].mxu0 %v5141_v9 }
 0x4d9   : > { %4300 = vmatprep.mubr.bf16.mxu0 %v5145_v10 }
 0x4e0   : > { %4301 = vmatmul.mubr.bf16.gmra.mrb[40].mxu0 %v5150_v11  ;;  %v5335_v11 = vunpack.c.h.bf16 %v5231_v43 }
 0x4e1   : > { %4304 = vmatprep.mubr.bf16.mxu0 %v5153_v12 }
 0x4e8   : > { %4305 = vmatmul.mubr.bf16.gmra.mrb[44].mxu0 %v5158_v13 }
 0x4e9   : > { %4308 = vmatprep.mubr.bf16.mxu0 %v5161_v14  ;;  %v5339_v14 = vunpack.c.h.bf16 %v5233_v44 }
 0x4f0   : > { %4309 = vmatmul.mubr.bf16.gmra.mrb[48].mxu0 %v5166_v15 }
 0x58b   : > { %v4246_v59 = vpop.f32.mrb[20].mxu0 }
 0x58c   : > { %v1371_v9 = vmul.f32 %v4246_v59, %v5328_v3  ;;  %v1306_v10 = vpop.f32.mrb[21].mxu0 }
 0x58d   : > { %v1369_v12 = vmul.f32 %v1306_v10, %v5331_v60  ;;  %v4247_v13 = vpop.f32.mrb[22].mxu0 }
 0x58e   : > { %v1372_v15 = vmul.f32 %v4247_v13, %v5335_v11  ;;  %v1309_v61 = vpop.f32.mrb[23].mxu0  ;;  %v1391_v62 = vsel %vm933_vm1, %v1371_v9, 0.0 }
 0x58f   : > { %v1370_v63 = vmul.f32 %v1309_v61, %v5339_v14  ;;  %1392 = vadd.xlane.f32.xlu1 %v1391_v62  ;;  %v1385_v0 = vsel %vm933_vm1, %v1369_v12, 0.0 }
 0x590   : > { %1386 = vadd.xlane.f32.xlu0 %v1385_v0  ;;  %v1394_v43 = vsel %vm933_vm1, %v1372_v15, 0.0 }
 0x591   : > { %v1388_v44 = vsel %vm933_vm1, %v1370_v63, 0.0 }
 0x593   : > { %1395 = vadd.xlane.f32.xlu1 %v1394_v43  ;;  %v4250_v1 = vpop.f32.mrb[24].mxu0 }
 0x594   : > { %v1322_v4 = vpop.f32.mrb[25].mxu0  ;;  %1389 = vadd.xlane.f32.xlu0 %v1388_v44  ;;  %v1375_v8 = vmul.f32 %v4250_v1, %v5351_v5 }
 0x595   : > { %v1373_v6 = vmul.f32 %v1322_v4, %v5347_v2  ;;  %v4251_v18 = vpop.f32.mrb[26].mxu0 }
 0x596   : > { %v1325_v20 = vpop.f32.mrb[27].mxu0  ;;  %v1376_v26 = vmul.f32 %v4251_v18, %v5359_v7  ;;  %v1403_v29 = vsel %vm933_vm1, %v1375_v8, 0.0 }
 0x597   : > { %v1374_v24 = vmul.f32 %v1325_v20, %v5355_v19  ;;  %v1397_v25 = vsel %vm933_vm1, %v1373_v6, 0.0 }
 0x598   : > { %1398 = vadd.xlane.f32.xlu0 %v1397_v25  ;;  %v1406_v36 = vsel %vm933_vm1, %v1376_v26, 0.0 }
 0x599   : > { %v1400_v23 = vsel %vm933_vm1, %v1374_v24, 0.0 }
 0x59a   : > { %1401 = vadd.xlane.f32.xlu1 %v1400_v23 }
 0x59b   : > { %v4254_v28 = vpop.f32.mrb[28].mxu0 }
 0x59c   : > { %v1338_v31 = vpop.f32.mrb[29].mxu0  ;;  %1404 = vadd.xlane.f32.xlu0 %v1403_v29  ;;  %v1379_v39 = vmul.f32 %v4254_v28, %v5370_v56 }
 0x59d   : > { %v1377_v34 = vmul.f32 %v1338_v31, %v5366_v57  ;;  %v4255_v35 = vpop.f32.mrb[30].mxu0 }
 0x59e   : > { %1407 = vadd.xlane.f32.xlu1 %v1406_v36  ;;  %v1341_v38 = vpop.f32.mrb[31].mxu0  ;;  %v1380_v45 = vmul.f32 %v4255_v35, %v5379_v40  ;;  %v1415_v22 = vsel %vm933_vm1, %v1379_v39, 0.0 }
 0x59f   : > { %v1378_v41 = vmul.f32 %v1341_v38, %v5375_v37  ;;  %v1409_v42 = vsel %vm933_vm1, %v1377_v34, 0.0 }
 0x5a0   : > { %1410 = vadd.xlane.f32.xlu0 %v1409_v42  ;;  %v1418_v51 = vsel %vm933_vm1, %v1380_v45, 0.0 }
 0x5a1   : > { %v1412_v46 = vsel %vm933_vm1, %v1378_v41, 0.0 }
 0x5a2   : > { %1413 = vadd.xlane.f32.xlu1 %v1412_v46 }
 0x5a3   : > { %v4258_v47 = vpop.f32.mrb[32].mxu0 }
 0x5a4   : > { %v1354_v48 = vpop.f32.mrb[33].mxu0  ;;  %1416 = vadd.xlane.f32.xlu0 %v1415_v22  ;;  %v1383_v54 = vmul.f32 %v4258_v47, %v5390_v16 }
 0x5a5   : > { %v1381_v49 = vmul.f32 %v1354_v48, %v5386_v17  ;;  %v4259_v50 = vpop.f32.mrb[34].mxu0 }
 0x5a6   : > { %1419 = vadd.xlane.f32.xlu1 %v1418_v51  ;;  %v1357_v53 = vpop.f32.mrb[35].mxu0  ;;  %v1384_v9 = vmul.f32 %v4259_v50, %v5399_v55  ;;  %v1427_v33 = vsel %vm933_vm1, %v1383_v54, 0.0 }
 0x5a7   : > { %v1382_v58 = vmul.f32 %v1357_v53, %v5395_v52  ;;  %v1421_v59 = vsel %vm933_vm1, %v1381_v49, 0.0 }
 0x5a8   : > { %1422 = vadd.xlane.f32.xlu0 %v1421_v59  ;;  %v1430_v61 = vsel %vm933_vm1, %v1384_v9, 0.0  ;;  %v4655_v59 = vld [vmem:[%s6516_s7] sm:$0xff]  }
 0x5a9   : > { %v1424_v10 = vsel %vm933_vm1, %v1382_v58, 0.0  ;;  %4332 = vmatprep.subr.bf16.mxu0 %v4655_v59 }
 0x5aa   : > { %1425 = vadd.xlane.f32.xlu1 %v1424_v10  ;;  %4333 = vmatpush3.bf16.msra.mxu0 %v4655_v59 }
 0x5ab   : > { %v4298_v12 = vpop.f32.mrb[36].mxu0 }
 0x5ac   : > { %v1692_v13 = vpop.f32.mrb[37].mxu0  ;;  %1428 = vadd.xlane.f32.xlu0 %v1427_v33  ;;  %v5408_v32 = vadd.f32 %v4298_v12, %v5328_v3 }
 0x5ad   : > { %v4299_v15 = vpop.f32.mrb[38].mxu0  ;;  %v5414_v0 = vadd.f32 %v1692_v13, %v5331_v60 }
 0x5ae   : > { %v5411_v62 = vadd.f32 %v4299_v15, %v5335_v11  ;;  %v1695_v63 = vpop.f32.mrb[39].mxu0  ;;  %1431 = vadd.xlane.f32.xlu1 %v1430_v61 }
 0x5af   : > { %v5417_v43 = vadd.f32 %v1695_v63, %v5339_v14 }
 0x5b3   : > { %v4302_v4 = vpop.f32.mrb[40].mxu0 }
 0x5b4   : > { %v1708_v6 = vpop.f32.mrb[41].mxu0  ;;  %v5424_v20 = vadd.f32 %v4302_v4, %v5351_v5 }
 0x5b5   : > { %v4303_v18 = vpop.f32.mrb[42].mxu0  ;;  %v5430_v25 = vadd.f32 %v1708_v6, %v5347_v2 }
 0x5b6   : > { %6562 = vst [vmem:[#allocation7_spill] sm:$0xff] %v5424_v20  ;;  %v5427_v8 = vadd.f32 %v4303_v18, %v5359_v7  ;;  %v1711_v24 = vpop.f32.mrb[43].mxu0 }
 0x5b7   : > { %v5433_v26 = vadd.f32 %v1711_v24, %v5355_v19 }
 0x5b8   : > { %6563 = vst [vmem:[#allocation8_spill] sm:$0xff] %v5427_v8 }
 0x5bb   : > { %v4306_v29 = vpop.f32.mrb[44].mxu0 }
 0x5bc   : > { %v1724_v31 = vpop.f32.mrb[45].mxu0  ;;  %v5440_v35 = vadd.f32 %v4306_v29, %v5370_v56 }
 0x5bd   : > { %v4307_v34 = vpop.f32.mrb[46].mxu0  ;;  %v5446_v39 = vadd.f32 %v1724_v31, %v5366_v57 }
 0x5be   : > { %6564 = vst [vmem:[#allocation9_spill] sm:$0xff] %v5440_v35  ;;  %v5443_v36 = vadd.f32 %v4307_v34, %v5379_v40  ;;  %v1727_v38 = vpop.f32.mrb[47].mxu0 }
 0x5bf   : > { %6566 = vst [vmem:[#allocation11_spill] sm:$0xff] %v5446_v39  ;;  %v5449_v41 = vadd.f32 %v1727_v38, %v5375_v37 }
 0x5c0   : > { %6565 = vst [vmem:[#allocation10_spill] sm:$0xff] %v5443_v36 }
 0x5c1   : > { %6567 = vst [vmem:[#allocation12_spill] sm:$0xff] %v5449_v41 }
 0x5c3   : > { %v4310_v46 = vpop.f32.mrb[48].mxu0 }
 0x5c4   : > { %v1740_v47 = vpop.f32.mrb[49].mxu0  ;;  %v5456_v48 = vadd.f32 %v4310_v46, %v5390_v16 }
 0x5c5   : > { %v4311_v22 = vpop.f32.mrb[50].mxu0  ;;  %v5462_v51 = vadd.f32 %v1740_v47, %v5386_v17 }
 0x5c6   : > { %6568 = vst [vmem:[#allocation13_spill] sm:$0xff] %v5456_v48  ;;  %v5459_v49 = vadd.f32 %v4311_v22, %v5399_v55  ;;  %v1743_v50 = vpop.f32.mrb[51].mxu0 }
 0x5c7   : > { %6570 = vst [vmem:[#allocation15_spill] sm:$0xff] %v5462_v51  ;;  %v5465_v53 = vadd.f32 %v1743_v50, %v5395_v52 }
 0x5c8   : > { %6569 = vst [vmem:[#allocation14_spill] sm:$0xff] %v5459_v49 }
 0x5c9   : > { %6571 = vst [vmem:[#allocation16_spill] sm:$0xff] %v5465_v53 }
 0x61c   : > { %v5474_v9 = vpop.xlane.xlu1 %1392 }
 0x61d   : > { %v1435_v10 = vand.u32 2147483647, %v5474_v9  ;;  %v5477_v12 = vpop.xlane.xlu0 %1386  ;;  %vm1499_vm3 = vcmp.ge.f32.partialorder %v5474_v9, 0.0 }
 0x61e   : > { %v1433_v33 = vand.u32 2147483647, %v5477_v12  ;;  %vm1497_vm4 = vcmp.ge.f32.partialorder %v5477_v12, 0.0 }
 0x61f   : > { %v1451_v13 = vsub.f32 0.0, %v1435_v10 }
 0x620   : > { %v1449_v15 = vsub.f32 0.0, %v1433_v33  ;;  %v5480_v61 = vpop.xlane.xlu1 %1395 }
 0x621   : > { %v1469_v63 = vmul.f32 1.442695, %v1451_v13  ;;  %v1436_v4 = vand.u32 2147483647, %v5480_v61  ;;  %v5483_v6 = vpop.xlane.xlu0 %1389  ;;  %vm1500_vm5 = vcmp.ge.f32.partialorder %v5480_v61, 0.0 }
 0x622   : > { %v1465_v18 = vmul.f32 1.442695, %v1449_v15  ;;  %v1434_v24 = vand.u32 2147483647, %v5483_v6  ;;  %vm1498_vm6 = vcmp.ge.f32.partialorder %v5483_v6, 0.0 }
 0x623   : > { %4679 = vpow2.f32 %v1469_v63  ;;  %v1452_v29 = vsub.f32 0.0, %v1436_v4 }
 0x624   : > { %4681 = vpow2.f32 %v1465_v18  ;;  %v1450_v31 = vsub.f32 0.0, %v1434_v24 }
 0x625   : > { %v1471_v34 = vmul.f32 1.442695, %v1452_v29  ;;  %v5486_v38 = vpop.xlane.xlu0 %1398 }
 0x626   : > { %v1467_v46 = vmul.f32 1.442695, %v1450_v31  ;;  %v1437_v47 = vand.u32 2147483647, %v5486_v38  ;;  %vm1501_vm7 = vcmp.ge.f32.partialorder %v5486_v38, 0.0 }
 0x627   : > { %4683 = vpow2.f32 %v1471_v34  ;;  %v5489_v22 = vpop.xlane.xlu1 %1401 }
 0x628   : > { %4685 = vpow2.f32 %v1467_v46  ;;  %v1453_v50 = vsub.f32 0.0, %v1437_v47  ;;  %v1438_v59 = vand.u32 2147483647, %v5489_v22  ;;  %vm1502_vm8 = vcmp.ge.f32.partialorder %v5489_v22, 0.0 }
 0x629   : > { %v5492_v10 = vpop.xlane.xlu0 %1404 }
 0x62a   : > { %v1473_v33 = vmul.f32 1.442695, %v1453_v50  ;;  %v1454_v13 = vsub.f32 0.0, %v1438_v59  ;;  %v1439_v15 = vand.u32 2147483647, %v5492_v10  ;;  %vm1503_vm9 = vcmp.ge.f32.partialorder %v5492_v10, 0.0 }
 0x62b   : > { %v5495_v63 = vpop.xlane.xlu1 %1407 }
 0x62c   : > { %4687 = vpow2.f32 %v1473_v33  ;;  %v1475_v4 = vmul.f32 1.442695, %v1454_v13  ;;  %v1455_v18 = vsub.f32 0.0, %v1439_v15  ;;  %v1440_v24 = vand.u32 2147483647, %v5495_v63 }
 0x62d   : > { %v5498_v29 = vpop.eup %4679  ;;  %v5500_v31 = vpop.xlane.xlu0 %1410  ;;  %vm1504_vm10 = vcmp.ge.f32.partialorder %v5495_v63, 0.0 }
 0x62e   : > { %v4682_v34 = vpop.eup %4681  ;;  %v1515_v46 = vadd.f32 1.0, %v5498_v29  ;;  %4689 = vpow2.f32 %v1475_v4  ;;  %v1477_v47 = vmul.f32 1.442695, %v1455_v18  ;;  %v1456_v50 = vsub.f32 0.0, %v1440_v24 }
 0x62f   : > { %v1513_v59 = vadd.f32 1.0, %v4682_v34  ;;  %v1441_v54 = vand.u32 2147483647, %v5500_v31  ;;  %v5504_v58 = vpop.xlane.xlu1 %1413  ;;  %vm1505_vm11 = vcmp.ge.f32.partialorder %v5500_v31, 0.0 }
 0x630   : > { %4691 = vrcp.f32 %v1515_v46  ;;  %v1479_v33 = vmul.f32 1.442695, %v1456_v50  ;;  %v1442_v13 = vand.u32 2147483647, %v5504_v58  ;;  %vm1506_vm12 = vcmp.ge.f32.partialorder %v5504_v58, 0.0 }
 0x631   : > { %v4684_v15 = vpop.eup %4683  ;;  %4693 = vrcp.f32 %v1513_v59  ;;  %v1457_v42 = vsub.f32 0.0, %v1441_v54  ;;  %v5507_v45 = vpop.xlane.xlu0 %1416 }
 0x632   : > { %v4686_v23 = vpop.eup %4685  ;;  %v1516_v28 = vadd.f32 1.0, %v4684_v15  ;;  %4695 = vpow2.f32 %v1477_v47  ;;  %v1458_v4 = vsub.f32 0.0, %v1442_v13  ;;  %v1443_v18 = vand.u32 2147483647, %v5507_v45 }
 0x633   : > { %v1514_v24 = vadd.f32 1.0, %v4686_v23  ;;  %4697 = vpow2.f32 %v1479_v33  ;;  %v1481_v1 = vmul.f32 1.442695, %v1457_v42  ;;  %v5510_v44 = vpop.xlane.xlu1 %1419  ;;  %vm1507_vm13 = vcmp.ge.f32.partialorder %v5507_v45, 0.0 }
 0x634   : > { %4699 = vrcp.f32 %v1516_v28  ;;  %v1483_v46 = vmul.f32 1.442695, %v1458_v4  ;;  %v1459_v50 = vsub.f32 0.0, %v1443_v18  ;;  %v1444_v27 = vand.u32 2147483647, %v5510_v44 }
 0x635   : > { %4701 = vrcp.f32 %v1514_v24  ;;  %v5513_v54 = vpop.xlane.xlu0 %1422  ;;  %vm1508_vm14 = vcmp.ge.f32.partialorder %v5510_v44, 0.0 }
 0x636   : > { %v5515_v59 = vpop.eup %4687  ;;  %4703 = vpow2.f32 %v1481_v1  ;;  %v1485_v47 = vmul.f32 1.442695, %v1459_v50  ;;  %v1460_v13 = vsub.f32 0.0, %v1444_v27  ;;  %v1445_v21 = vand.u32 2147483647, %v5513_v54 }
 0x637   : > { %v1517_v33 = vadd.f32 1.0, %v5515_v59  ;;  %4705 = vpow2.f32 %v1483_v46  ;;  %v5519_v42 = vpop.xlane.xlu1 %1425  ;;  %vm1509_vm15 = vcmp.ge.f32.partialorder %v5513_v54, 0.0 }
 0x638   : > { %v5521_v28 = vpop.eup %4689  ;;  %4707 = vpow2.f32 %v1485_v47  ;;  %v1487_v4 = vmul.f32 1.442695, %v1460_v13  ;;  %v1461_v18 = vsub.f32 0.0, %v1445_v21  ;;  %v1446_v24 = vand.u32 2147483647, %v5519_v42 }
 0x639   : > { %4709 = vrcp.f32 %v1517_v33  ;;  %v1518_v48 = vadd.f32 1.0, %v5521_v28  ;;  %v5525_v1 = vpop.xlane.xlu0 %1428 }
 0x63a   : > { %v4692_v27 = vpop.eup %4691  ;;  %4711 = vpow2.f32 %v1487_v4  ;;  %v1489_v50 = vmul.f32 1.442695, %v1461_v18  ;;  %v1462_v49 = vsub.f32 0.0, %v1446_v24  ;;  %v1447_v46 = vand.u32 2147483647, %v5525_v1 }
 0x63b   : > { %v4694_v51 = vpop.eup %4693  ;;  %4713 = vrcp.f32 %v1518_v48  ;;  %v5528_v53 = vpop.xlane.xlu1 %1431 }
 0x63c   : > { %v5530_v47 = vpop.eup %4695  ;;  %v1561_v21 = vmul.f32 %v4694_v51, %v4682_v34  ;;  %4715 = vpow2.f32 %v1489_v50  ;;  %v1491_v13 = vmul.f32 1.442695, %v1462_v49  ;;  %v1463_v33 = vsub.f32 0.0, %v1447_v46 }
 0x63d   : > { %v5532_v35 = vpop.eup %4697  ;;  %v1519_v36 = vadd.f32 1.0, %v5530_v47  ;;  %v1448_v4 = vand.u32 2147483647, %v5528_v53  ;;  %v1563_v34 = vmul.f32 %v4692_v27, %v5498_v29 }
 0x63e   : > { %v4700_v18 = vpop.eup %4699  ;;  %v1520_v48 = vadd.f32 1.0, %v5532_v35  ;;  %4717 = vpow2.f32 %v1491_v13  ;;  %v1493_v49 = vmul.f32 1.442695, %v1463_v33  ;;  %v1577_v39 = vsel %vm1497_vm4, %v4694_v51, %v1561_v21 }
 0x63f   : > { %v4702_v24 = vpop.eup %4701  ;;  %v1564_v50 = vmul.f32 %v4700_v18, %v4684_v15  ;;  %4719 = vrcp.f32 %v1519_v36  ;;  %v1464_v20 = vsub.f32 0.0, %v1448_v4  ;;  %v1579_v6 = vsel %vm1499_vm3, %v4692_v27, %v1563_v34 }
 0x640   : > { %v5540_v46 = vpop.eup %4703  ;;  %v1562_v41 = vmul.f32 %v4702_v24, %v4686_v23  ;;  %4721 = vrcp.f32 %v1520_v48  ;;  %v1593_v23 = vmul.f32 %v1577_v39, %v5331_v60  ;;  %vm1510_vm3 = vcmp.ge.f32.partialorder %v5519_v42, 0.0 }
 0x641   : > { %v5542_v8 = vpop.eup %4705  ;;  %v1521_v12 = vadd.f32 1.0, %v5540_v46  ;;  %4723 = vpow2.f32 %v1493_v49  ;;  %v1580_v29 = vsel %vm1500_vm5, %v4700_v18, %v1564_v50  ;;  %v1495_v33 = vmul.f32 1.442695, %v1464_v20 }
 0x642   : > { %v5547_v13 = vpop.eup %4707  ;;  %v1578_v36 = vsel %vm1498_vm6, %v4702_v24, %v1562_v41  ;;  %v1522_v15 = vadd.f32 1.0, %v5542_v8  ;;  %v1596_v41 = vmul.f32 %v1580_v29, %v5335_v11  ;;  %v6572_v11 = vmov 0.0  }
 0x643   : > { %v4710_v51 = vpop.eup %4709  ;;  %v1594_v21 = vmul.f32 %v1578_v36, %v5339_v14  ;;  %4725 = vrcp.f32 %v1521_v12  ;;  %v1523_v61 = vadd.f32 1.0, %v5547_v13  ;;  %v1595_v14 = vmul.f32 %v1579_v6, %v5328_v3 }
 0x644   : > { %v4712_v4 = vpop.eup %4711  ;;  %v1565_v48 = vmul.f32 %v4710_v51, %v5515_v59  ;;  %4727 = vrcp.f32 %v1522_v15  ;;  %vm1511_vm4 = vcmp.ge.f32.partialorder %v5525_v1, 0.0  ;;  %vm1512_vm5 = vcmp.ge.f32.partialorder %v5528_v53, 0.0  ;;  %v4654_v1 = vld [vmem:[%s6515_s6 + $0x8] sm:$0xff]  }
 0x645   : > { %v4714_v18 = vpop.eup %4713  ;;  %v1609_v24 = vpack.c.bf16 %v1594_v21, %v1593_v23  ;;  %4729 = vrcp.f32 %v1523_v61  ;;  %v1524_v20 = vadd.f32 1.0, %v4712_v4  ;;  %v1610_v49 = vpack.c.bf16 %v1596_v41, %v1595_v14 }
 0x646   : > { %v4716_v50 = vpop.eup %4715  ;;  %v1566_v60 = vmul.f32 %v4714_v18, %v5521_v28  ;;  %4731 = vpow2.f32 %v1495_v33  ;;  %v1581_v59 = vsel %vm1501_vm7, %v4710_v51, %v1565_v48  ;;  %v6573_v53 = vpack.c.bf16 %v5417_v43, %v5414_v0  ;;  %v6579_v0 = vld [vmem:[#allocation12_spill] sm:$0xff]  ;;  %v6580_v43 = vld [vmem:[#allocation11_spill] sm:$0xff] }
 0x647   : > { %4733 = vrcp.f32 %v1524_v20  ;;  %v1525_v39 = vadd.f32 1.0, %v4716_v50  ;;  %4261 = vmatpush3.bf16.msra.mxu1 %v1609_v24  ;;  %v1597_v22 = vmul.f32 %v1581_v59, %v5347_v2 }
 0x648   : > { %v4718_v9 = vpop.eup %4717  ;;  %v1582_v27 = vsel %vm1502_vm8, %v4714_v18, %v1566_v60  ;;  %4262 = vmatprep.subr.bf16.mxu1 %v6572_v11 }
 0x649   : > { %v4720_v34 = vpop.eup %4719  ;;  %v1598_v12 = vmul.f32 %v1582_v27, %v5355_v19  ;;  %4735 = vrcp.f32 %v1525_v39  ;;  %v1526_v38 = vadd.f32 1.0, %v4718_v9 }
 0x64a   : > { %v4722_v28 = vpop.eup %4721  ;;  %v1567_v29 = vmul.f32 %v4720_v34, %v5530_v47 }
 0x64b   : > { %v4724_v3 = vpop.eup %4723  ;;  %v1568_v36 = vmul.f32 %v4722_v28, %v5532_v35  ;;  %4737 = vrcp.f32 %v1526_v38  ;;  %4263 = vmatpush3.bf16.msra.mxu1 %v1610_v49  ;;  %v1611_v51 = vpack.c.bf16 %v1598_v12, %v1597_v22  ;;  %v6577_v38 = vld [vmem:[#allocation7_spill] sm:$0xff]  ;;  %v6583_v22 = vld [vmem:[#allocation9_spill] sm:$0xff] }
 0x64c   : > { %v1583_v15 = vsel %vm1503_vm9, %v4720_v34, %v1567_v29  ;;  %v1527_v33 = vadd.f32 1.0, %v4724_v3  ;;  %4264 = vmatprep.subr.bf16.mxu1 %v6572_v11  ;;  %v6581_v29 = vpack.c.bf16 %v6579_v0, %v6580_v43 }
 0x64d   : > { %v4726_v19 = vpop.eup %4725  ;;  %v1584_v23 = vsel %vm1504_vm10, %v4722_v28, %v1568_v36  ;;  %v1599_v35 = vmul.f32 %v1583_v15, %v5351_v5  ;;  %v6586_v36 = vld [vmem:[#allocation15_spill] sm:$0xff]  ;;  %v6589_v15 = vld [vmem:[#allocation13_spill] sm:$0xff] }
 0x64e   : > { %v4728_v21 = vpop.eup %4727  ;;  %v1600_v47 = vmul.f32 %v1584_v23, %v5359_v7  ;;  %v1569_v2 = vmul.f32 %v4726_v19, %v5540_v46  ;;  %4739 = vrcp.f32 %v1527_v33 }
 0x64f   : > { %v4730_v10 = vpop.eup %4729  ;;  %v1570_v61 = vmul.f32 %v4728_v21, %v5542_v8  ;;  %4265 = vmatpush3.bf16.msra.mxu1 %v1611_v51 }
 0x650   : > { %v4732_v63 = vpop.eup %4731  ;;  %v1585_v6 = vsel %vm1505_vm11, %v4726_v19, %v1569_v2  ;;  %v1571_v48 = vmul.f32 %v4730_v10, %v5547_v13  ;;  %4266 = vmatprep.subr.bf16.mxu1 %v6572_v11  ;;  %v1612_v18 = vpack.c.bf16 %v1600_v47, %v1599_v35  ;;  %v4656_v19 = vld [vmem:[%s6516_s7 + $0x8] sm:$0xff]  }
 0x651   : > { %v4734_v7 = vpop.eup %4733  ;;  %v1586_v46 = vsel %vm1506_vm12, %v4728_v21, %v1570_v61  ;;  %v1528_v41 = vadd.f32 1.0, %v4732_v63  ;;  %v1601_v31 = vmul.f32 %v1585_v6, %v5366_v57  ;;  %4334 = vmatprep.subr.bf16.mxu0 %v4656_v19  ;;  %v6592_v21 = vld [vmem:[#allocation6_spill] sm:$0xff] }
 0x652   : > { %v1602_v24 = vmul.f32 %v1586_v46, %v5375_v37  ;;  %v1572_v5 = vmul.f32 %v4734_v7, %v4712_v4  ;;  %v1587_v8 = vsel %vm1507_vm13, %v4730_v10, %v1571_v48  ;;  %4335 = vmatpush3.bf16.msra.mxu0 %v4656_v19  ;;  %v1769_v47 = vsub.s32 2, %v6592_v21  ;;  %v5651_v61 = vld [vmem:[%s6519_s10] sm:$0x3f] }
 0x653   : > { %v4736_v20 = vpop.eup %4735  ;;  %4741 = vrcp.f32 %v1528_v41  ;;  %4267 = vmatpush3.bf16.msra.mxu1 %v1612_v18  ;;  %v1603_v4 = vmul.f32 %v1587_v8, %v5370_v56  ;;  %4398 = vmatprep.subr.bf16.mxu0 %v6572_v11 }
 0x654   : > { %v1588_v58 = vsel %vm1508_vm14, %v4734_v7, %v1572_v5  ;;  %v1573_v13 = vmul.f32 %v4736_v20, %v4716_v50  ;;  %4268 = vmatprep.subr.bf16.mxu1 %v6572_v11  ;;  %v1613_v14 = vpack.c.bf16 %v1602_v24, %v1601_v31 }
 0x655   : > { %v4738_v60 = vpop.eup %4737  ;;  %v1604_v39 = vmul.f32 %v1588_v58, %v5379_v40 }
 0x656   : > { %v1574_v37 = vmul.f32 %v4738_v60, %v4718_v9  ;;  %v1589_v44 = vsel %vm1509_vm15, %v4736_v20, %v1573_v13 }
 0x657   : > { %4269 = vmatpush3.bf16.msra.mxu1 %v1613_v14  ;;  %v1614_v50 = vpack.c.bf16 %v1604_v39, %v1603_v4  ;;  %v1605_v34 = vmul.f32 %v1589_v44, %v5386_v17  ;;  %v4653_v17 = vld [vmem:[%s6515_s6] sm:$0xff]  }
 0x658   : > { %v4740_v57 = vpop.eup %4739  ;;  %v1590_v45 = vsel %vm1510_vm3, %v4738_v60, %v1574_v37  ;;  %4270 = vmatprep.subr.bf16.mxu1 %v6572_v11 }
 0x659   : > { %v1606_v59 = vmul.f32 %v1590_v45, %v5395_v52  ;;  %v1575_v27 = vmul.f32 %v4740_v57, %v4724_v3  ;;  %v6582_v3 = vld [vmem:[#allocation10_spill] sm:$0xff] }
 0x65b   : > { %4271 = vmatpush3.bf16.msra.mxu1 %v1614_v50  ;;  %v1615_v40 = vpack.c.bf16 %v1606_v59, %v1605_v34  ;;  %v1591_v54 = vsel %vm1511_vm4, %v4740_v57, %v1575_v27 }
 0x65c   : > { %4272 = vmatprep.subr.bf16.mxu1 %v6572_v11  ;;  %v1607_v52 = vmul.f32 %v1591_v54, %v5390_v16  ;;  %v6574_v16 = vpack.c.bf16 %v5411_v62, %v5408_v32  ;;  %v6584_v32 = vpack.c.bf16 %v6582_v3, %v6583_v22  ;;  %v6585_v62 = vld [vmem:[#allocation16_spill] sm:$0xff] }
 0x65d   : > { %v4742_v56 = vpop.eup %4741 }
 0x65e   : > { %v1576_v42 = vmul.f32 %v4742_v56, %v4732_v63  ;;  %v1770_v63 = vrot.slane %v5651_v61, %v1769_v47 }
 0x65f   : > { %4273 = vmatpush3.bf16.msra.mxu1 %v1615_v40 }
 0x660   : > { %v1592_v9 = vsel %vm1512_vm5, %v4742_v56, %v1576_v42  ;;  %4274 = vmatprep.subr.bf16.mxu1 %v6572_v11 }
 0x661   : > { %v1608_v49 = vmul.f32 %v1592_v9, %v5399_v55  ;;  %v6575_v55 = vpack.c.bf16 %v5433_v26, %v5430_v25  ;;  %v6587_v25 = vpack.c.bf16 %v6585_v62, %v6586_v36  ;;  %v6588_v26 = vld [vmem:[#allocation14_spill] sm:$0xff] }
 0x662   : > { %v6590_v33 = vpack.c.bf16 %v6588_v26, %v6589_v15 }
 0x663   : > { %v1616_v12 = vpack.c.bf16 %v1608_v49, %v1607_v52 }
 0x665   : > { %4275 = vmatpush3.bf16.msra.mxu1 %v1616_v12 }
 0x666   : > { %4312 = vmatprep.subr.bf16.mxu1 %v4653_v17 }
 0x668   : > { %4277 = vmatmul.mubr.bf16.vlgmr.msra.gmra.mrb[36].mxu1 %v5264_v30  ;;  %v6576_v30 = vld [vmem:[#allocation8_spill] sm:$0xff] }
 0x669   : > { %4313 = vmatpush3.bf16.msra.mxu1 %v4653_v17  ;;  %4316 = vmatprep.mubr.msk.bf16.mxu1 %vm933_vm1, %v6573_v53  ;;  %v6578_v28 = vpack.c.bf16 %v6576_v30, %v6577_v38 }
 0x66a   : > { %4314 = vmatprep.subr.bf16.mxu1 %v4654_v1 }
 0x66d   : > { %4315 = vmatpush3.bf16.msra.mxu1 %v4654_v1 }
 0x66e   : > { %4352 = vmatprep.subr.bf16.mxu1 %v6572_v11 }
 0x670   : > { %4317 = vmatmul.mubr.msk.bf16.vlgmr.msra.gmra.mrb[40].mxu1 %vm933_vm1, %v6574_v16 }
 0x671   : > { %4320 = vmatprep.mubr.msk.bf16.mxu1 %vm933_vm1, %v6575_v55 }
 0x678   : > { %4321 = vmatmul.mubr.msk.bf16.gmra.mrb[44].mxu1 %vm933_vm1, %v6578_v28 }
 0x679   : > { %4324 = vmatprep.mubr.msk.bf16.mxu1 %vm933_vm1, %v6581_v29 }
 0x680   : > { %4325 = vmatmul.mubr.msk.bf16.gmra.mrb[48].mxu1 %vm933_vm1, %v6584_v32 }
 0x681   : > { %4328 = vmatprep.mubr.msk.bf16.mxu1 %vm933_vm1, %v6587_v25 }
 0x688   : > { %4329 = vmatmul.mubr.msk.bf16.gmra.mrb[52].mxu1 %vm933_vm1, %v6590_v33 }
 0x689   : > { %4368 = vmatprep.mubr.msk.bf16.mxu1 %vm4976_vm2, %v6572_v11 }
 0x73b   : > { %v5641_v51 = vpop.f32.mrb[36].mxu1 }
 0x73c   : > { %6591 = vst [vmem:[#allocation8_spill] sm:$0xff] %v5641_v51  ;;  %v4278_v23 = vpop.f32.mrb[37].mxu1 }
 0x73d   : > { %v5644_v2 = vpop.f32.mrb[38].mxu1 }
 0x73e   : > { %6593 = vst [vmem:[#allocation7_spill] sm:$0xff] %v5644_v2  ;;  %v4279_v35 = vpop.f32.mrb[39].mxu1 }
 0x73f   : > { %v1934_v35 = vsub.s32 3, %v6592_v21 }
 0x743   : > { %v4318_v6 = vpop.f32.mrb[40].mxu1 }
 0x744   : > { %v1850_v48 = vadd.f32 %v4318_v6, %v1770_v63  ;;  %v1841_v7 = vpop.f32.mrb[41].mxu1  ;;  %v1935_v6 = vrot.slane %v5651_v61, %v1934_v35  ;;  %v4881_v35 = vld [vmem:[%s6520_s11] sm:$0xff]  }
 0x745   : > { %v1842_v18 = vadd.f32 %v1841_v7, %v1770_v63  ;;  %v4319_v46 = vpop.f32.mrb[42].mxu1 }
 0x746   : > { %v1853_v41 = vadd.f32 %v4319_v46, %v1770_v63  ;;  %v1844_v24 = vpop.f32.mrb[43].mxu1  ;;  %v1906_v20 = vmax.f32 %v1850_v48, 0.0 }
 0x747   : > { %v1845_v5 = vadd.f32 %v1844_v24, %v1770_v63  ;;  %v1904_v8 = vmax.f32 %v1842_v18, 0.0 }
 0x748   : > { %v1907_v31 = vmax.f32 %v1853_v41, 0.0 }
 0x749   : > { %v1905_v58 = vmax.f32 %v1845_v5, 0.0 }
 0x74a   : > { %v1921_v13 = vpack.c.bf16 %v1907_v31, %v1906_v20 }
 0x74b   : > { %v1920_v60 = vpack.c.bf16 %v1905_v58, %v1904_v8  ;;  %v4322_v14 = vpop.f32.mrb[44].mxu1 }
 0x74c   : > { %v1866_v39 = vadd.f32 %v4322_v14, %v1770_v63  ;;  %v1857_v37 = vpop.f32.mrb[45].mxu1 }
 0x74d   : > { %v1858_v4 = vadd.f32 %v1857_v37, %v1770_v63  ;;  %v4323_v57 = vpop.f32.mrb[46].mxu1  ;;  %4336 = vmatprep.mubr.msk.bf16.mxu0 %vm933_vm1, %v1920_v60 }
 0x74e   : > { %v1869_v44 = vadd.f32 %v4323_v57, %v1770_v63  ;;  %v1860_v45 = vpop.f32.mrb[47].mxu1  ;;  %4337 = vmatmul.mubr.msk.bf16.vlgmr.msra.gmra.mrb[52].mxu0 %vm933_vm1, %v1921_v13  ;;  %v1910_v59 = vmax.f32 %v1866_v39, 0.0 }
 0x74f   : > { %v1861_v50 = vadd.f32 %v1860_v45, %v1770_v63  ;;  %v1908_v34 = vmax.f32 %v1858_v4, 0.0 }
 0x750   : > { %v1911_v27 = vmax.f32 %v1869_v44, 0.0 }
 0x751   : > { %v1909_v56 = vmax.f32 %v1861_v50, 0.0 }
 0x752   : > { %v1923_v40 = vpack.c.bf16 %v1911_v27, %v1910_v59 }
 0x753   : > { %v1922_v54 = vpack.c.bf16 %v1909_v56, %v1908_v34  ;;  %v4326_v42 = vpop.f32.mrb[48].mxu1 }
 0x754   : > { %v1882_v9 = vadd.f32 %v4326_v42, %v1770_v63  ;;  %v1873_v52 = vpop.f32.mrb[49].mxu1 }
 0x755   : > { %v1874_v49 = vadd.f32 %v1873_v52, %v1770_v63  ;;  %v4327_v17 = vpop.f32.mrb[50].mxu1  ;;  %4340 = vmatprep.mubr.msk.bf16.mxu0 %vm933_vm1, %v1922_v54 }
 0x756   : > { %v1885_v12 = vadd.f32 %v4327_v17, %v1770_v63  ;;  %v1876_v1 = vpop.f32.mrb[51].mxu1  ;;  %4341 = vmatmul.mubr.msk.bf16.gmra.mrb[56].mxu0 %vm933_vm1, %v1923_v40  ;;  %v1914_v16 = vmax.f32 %v1882_v9, 0.0 }
 0x757   : > { %v1877_v53 = vadd.f32 %v1876_v1, %v1770_v63  ;;  %v1912_v30 = vmax.f32 %v1874_v49, 0.0 }
 0x758   : > { %v1915_v55 = vmax.f32 %v1885_v12, 0.0 }
 0x759   : > { %v1913_v38 = vmax.f32 %v1877_v53, 0.0 }
 0x75a   : > { %v1925_v28 = vpack.c.bf16 %v1915_v55, %v1914_v16 }
 0x75b   : > { %v1924_v0 = vpack.c.bf16 %v1913_v38, %v1912_v30  ;;  %v4330_v43 = vpop.f32.mrb[52].mxu1 }
 0x75c   : > { %v1898_v29 = vadd.f32 %v4330_v43, %v1770_v63  ;;  %v1889_v3 = vpop.f32.mrb[53].mxu1 }
 0x75d   : > { %v1890_v22 = vadd.f32 %v1889_v3, %v1770_v63  ;;  %v4331_v32 = vpop.f32.mrb[54].mxu1  ;;  %4344 = vmatprep.mubr.msk.bf16.mxu0 %vm933_vm1, %v1924_v0 }
 0x75e   : > { %v1901_v62 = vadd.f32 %v4331_v32, %v1770_v63  ;;  %v1892_v36 = vpop.f32.mrb[55].mxu1  ;;  %4345 = vmatmul.mubr.msk.bf16.gmra.mrb[60].mxu0 %vm933_vm1, %v1925_v28  ;;  %v1918_v26 = vmax.f32 %v1898_v29, 0.0 }
 0x75f   : > { %v1893_v25 = vadd.f32 %v1892_v36, %v1770_v63  ;;  %v1916_v33 = vmax.f32 %v1890_v22, 0.0 }
 0x760   : > { %v1919_v15 = vmax.f32 %v1901_v62, 0.0 }
 0x761   : > { %v1917_v19 = vmax.f32 %v1893_v25, 0.0 }
 0x762   : > { %v1927_v23 = vpack.c.bf16 %v1919_v15, %v1918_v26 }
 0x763   : > { %v1926_v47 = vpack.c.bf16 %v1917_v19, %v1916_v33 }
 0x765   : > { %4348 = vmatprep.mubr.msk.bf16.mxu0 %vm933_vm1, %v1926_v47  ;;  %v5701_v47 = vld [vmem:[%s6511_s2] sm:$0xff]  }
 0x766   : > { %4349 = vmatmul.mubr.msk.bf16.gmra.mrb[64].mxu0 %vm933_vm1, %v1927_v23 }
 0x767   : > { %4414 = vmatprep.mubr.msk.bf16.mxu0 %vm4976_vm2, %v6572_v11 }
 0x821   : > { %v4338_v48 = vpop.f32.mrb[52].mxu0 }
 0x822   : > { %v2015_v7 = vadd.f32 %v4338_v48, %v1935_v6  ;;  %v2006_v63 = vpop.f32.mrb[53].mxu0 }
 0x823   : > { %v2007_v18 = vadd.f32 %v2006_v63, %v1935_v6  ;;  %v4339_v46 = vpop.f32.mrb[54].mxu0 }
 0x824   : > { %v2018_v41 = vadd.f32 %v4339_v46, %v1935_v6  ;;  %v2009_v24 = vpop.f32.mrb[55].mxu0  ;;  %v2071_v20 = vmax.f32 %v2015_v7, 0.0 }
 0x825   : > { %v2010_v5 = vadd.f32 %v2009_v24, %v1935_v6  ;;  %v2069_v8 = vmax.f32 %v2007_v18, 0.0 }
 0x826   : > { %v2072_v31 = vmax.f32 %v2018_v41, 0.0 }
 0x827   : > { %v2070_v58 = vmax.f32 %v2010_v5, 0.0  ;;  %v4883_v5 = vld [vmem:[%s6512_s3] sm:$0xff]  }
 0x828   : > { %v5666_v13 = vpack.c.bf16 %v2072_v31, %v2071_v20 }
 0x829   : > { %v5668_v60 = vpack.c.bf16 %v2070_v58, %v2069_v8  ;;  %v4342_v14 = vpop.f32.mrb[56].mxu0 }
 0x82a   : > { %v2031_v39 = vadd.f32 %v4342_v14, %v1935_v6  ;;  %v2022_v37 = vpop.f32.mrb[57].mxu0 }
 0x82b   : > { %v2023_v61 = vadd.f32 %v2022_v37, %v1935_v6  ;;  %v4343_v4 = vpop.f32.mrb[58].mxu0  ;;  %4353 = vmatpush3.bf16.msra.mxu1 %v5668_v60 }
 0x82c   : > { %v2034_v57 = vadd.f32 %v4343_v4, %v1935_v6  ;;  %v2025_v44 = vpop.f32.mrb[59].mxu0  ;;  %4354 = vmatprep.subr.bf16.mxu1 %v6572_v11  ;;  %v2075_v50 = vmax.f32 %v2031_v39, 0.0  ;;  %v4885_v4 = vld [vmem:[%s6512_s3 + $0x10] sm:$0xff]  }
 0x82d   : > { %v2026_v45 = vadd.f32 %v2025_v44, %v1935_v6  ;;  %v2073_v27 = vmax.f32 %v2023_v61, 0.0  ;;  %v4884_v61 = vld [vmem:[%s6512_s3 + $0x8] sm:$0xff]   ;;  %v4887_v44 = vld [vmem:[%s6512_s3 + $0x20] sm:$0xff]  }
 0x82e   : > { %v2076_v59 = vmax.f32 %v2034_v57, 0.0  ;;  %v4886_v57 = vld [vmem:[%s6512_s3 + $0x18] sm:$0xff]  }
 0x82f   : > { %v2074_v34 = vmax.f32 %v2026_v45, 0.0  ;;  %4355 = vmatpush3.bf16.msra.mxu1 %v5666_v13  ;;  %v4888_v45 = vld [vmem:[%s6512_s3 + $0x28] sm:$0xff]  }
 0x830   : > { %v5673_v56 = vpack.c.bf16 %v2076_v59, %v2075_v50  ;;  %4356 = vmatprep.subr.bf16.mxu1 %v6572_v11  ;;  %v4889_v50 = vld [vmem:[%s6512_s3 + $0x30] sm:$0xff]   ;;  %v4890_v59 = vld [vmem:[%s6512_s3 + $0x38] sm:$0xff]  }
 0x831   : > { %v5676_v40 = vpack.c.bf16 %v2074_v34, %v2073_v27  ;;  %v4346_v54 = vpop.f32.mrb[60].mxu0  ;;  %v4891_v27 = vld [vmem:[%s5111_s22] sm:$0xff]   ;;  %v4892_v34 = vld [vmem:[%s5111_s22 + $0x8] sm:$0xff]  }
 0x832   : > { %v2047_v42 = vadd.f32 %v4346_v54, %v1935_v6  ;;  %v2038_v9 = vpop.f32.mrb[61].mxu0  ;;  %v4893_v54 = vld [vmem:[%s5111_s22 + $0x10] sm:$0xff]  }
 0x833   : > { %v2039_v52 = vadd.f32 %v2038_v9, %v1935_v6  ;;  %v4347_v49 = vpop.f32.mrb[62].mxu0  ;;  %4357 = vmatpush3.bf16.msra.mxu1 %v5676_v40  ;;  %v4895_v9 = vld [vmem:[%s5111_s22 + $0x20] sm:$0xff]  }
 0x834   : > { %v2050_v17 = vadd.f32 %v4347_v49, %v1935_v6  ;;  %v2041_v12 = vpop.f32.mrb[63].mxu0  ;;  %4358 = vmatprep.subr.bf16.mxu1 %v6572_v11  ;;  %v2079_v53 = vmax.f32 %v2047_v42, 0.0  ;;  %v4894_v42 = vld [vmem:[%s5111_s22 + $0x18] sm:$0xff]   ;;  %v4897_v49 = vld [vmem:[%s5111_s22 + $0x30] sm:$0xff]  }
 0x835   : > { %v2042_v1 = vadd.f32 %v2041_v12, %v1935_v6  ;;  %v2077_v55 = vmax.f32 %v2039_v52, 0.0  ;;  %v4896_v52 = vld [vmem:[%s5111_s22 + $0x28] sm:$0xff]  }
 0x836   : > { %v2080_v16 = vmax.f32 %v2050_v17, 0.0  ;;  %v4898_v17 = vld [vmem:[%s5111_s22 + $0x38] sm:$0xff]   ;;  %s475_s22 = scalar_lea.vmem [#allocation2], %s3802_s28 }
 0x837   : > { %v2078_v30 = vmax.f32 %v2042_v1, 0.0  ;;  %4359 = vmatpush3.bf16.msra.mxu1 %v5673_v56  ;;  %v5774_v1 = vunpack.c.l.bf16 %v5668_v60  ;;  %s3724_s21 = sshll.u32 %s475_s22, 4  ;;  %s6464_s21 = int_to_ptr.vmem [resolvable:$true] %s3724_s21 }
 0x838   : > { %v5681_v38 = vpack.c.bf16 %v2080_v16, %v2079_v53  ;;  %4360 = vmatprep.subr.bf16.mxu1 %v6572_v11  ;;  %v5777_v16 = vunpack.c.l.bf16 %v5666_v13  ;;  %s4911_s28 = scalar_lea.vmem %s6464_s21, 256  ;;  %p4918_p0 = scmp.lt.s32.totalorder %s6464_s21, %s4916_s18 }
 0x839   : > { %v5684_v28 = vpack.c.bf16 %v2078_v30, %v2077_v55  ;;  %v4350_v0 = vpop.f32.mrb[64].mxu0  ;;  %p4912_p11 = scmp.ne.s32.totalorder %s6464_s21, %s4911_s28  ;;  %p4919_p1 = scmp.lt.s32.totalorder %s4917_s20, %s4911_s28 }
 0x83a   : > { %v2063_v43 = vadd.f32 %v4350_v0, %v1935_v6  ;;  %v2054_v29 = vpop.f32.mrb[65].mxu0  ;;  %v5781_v0 = vunpack.c.h.bf16 %v5668_v60 }
 0x83b   : > { %v2055_v3 = vadd.f32 %v2054_v29, %v1935_v6  ;;  %v4351_v22 = vpop.f32.mrb[66].mxu0  ;;  %4361 = vmatpush3.bf16.msra.mxu1 %v5684_v28  ;;  %p4913_p12 = pnand %p4912_p11, %p5093_p5  ;;  %p4920_p2 = por %p4919_p1, %p4918_p0 }
 0x83c   : > { %v2066_v32 = vadd.f32 %v4351_v22, %v1935_v6  ;;  %v2057_v62 = vpop.f32.mrb[67].mxu0  ;;  %4362 = vmatprep.subr.bf16.mxu1 %v6572_v11  ;;  %v2083_v25 = vmax.f32 %v2063_v43, 0.0 }
 0x83d   : > { %v2058_v36 = vadd.f32 %v2057_v62, %v1935_v6  ;;  %v2081_v15 = vmax.f32 %v2055_v3, 0.0  ;;  %v4882_v6 = vld [vmem:[%s6520_s11 + $0x8] sm:$0xff]   ;;  %v5785_v3 = vunpack.c.h.bf16 %v5666_v13  ;;  %p4914_p13 = pneg %p4913_p12 }
 0x83e   : > { %v2084_v26 = vmax.f32 %v2066_v32, 0.0 }
 0x83f   : > { %v2082_v33 = vmax.f32 %v2058_v36, 0.0  ;;  %4363 = vmatpush3.bf16.msra.mxu1 %v5681_v38  ;;  %p4921_p3 = pnand %p4920_p2, %p4914_p13 }
 0x840   : > { %v5689_v19 = vpack.c.bf16 %v2084_v26, %v2083_v25  ;;  %4364 = vmatprep.subr.bf16.mxu1 %v6572_v11 }
 0x841   : > { %v5692_v23 = vpack.c.bf16 %v2082_v33, %v2081_v15 }
 0x843   : > { %4365 = vmatpush3.bf16.msra.mxu1 %v5692_v23 }
 0x844   : > { %4366 = vmatprep.subr.bf16.mxu1 %v6572_v11 }
 0x847   : > { %4367 = vmatpush3.bf16.msra.mxu1 %v5689_v19 }
 0x848   : > { %4372 = vmatprep.subr.bf16.mxu1 %v6572_v11 }
 0x84a   : > { %4369 = vmatmul.mubr.bf16.vlgmr.msra.gmra.mrb[56].mxu1 %v5701_v47 }
 0x84b   : > { %4373 = vmatpush3.bf16.msra.mxu1 %v4881_v35  ;;  %4376 = vmatprep.mubr.msk.bf16.mxu1 %vm4976_vm2, %v6572_v11 }
 0x84c   : > { %4374 = vmatprep.subr.bf16.mxu1 %v6572_v11 }
 0x84f   : > { %4375 = vmatpush3.bf16.msra.mxu1 %v4882_v6  ;;  %v5800_v6 = vunpack.c.h.bf16 %v5676_v40 }
 0x91d   : > { %v2143_v48 = vpop.f32.mrb[56].mxu1 }
 0x91e   : > { %v4370_v7 = vpop.f32.mrb[57].mxu1  ;;  %v2150_v18 = vmul.f32 0.125, %v2143_v48 }
 0x91f   : > { %v2146_v63 = vpop.f32.mrb[58].mxu1 }
 0x920   : > { %v2151_v46 = vmul.f32 0.125, %v2146_v63  ;;  %v4371_v41 = vpop.f32.mrb[59].mxu1 }
 0x922   : > { %v2152_v24 = vpack.c.bf16 %v2151_v46, %v2150_v18  ;;  %v5805_v18 = vunpack.c.h.bf16 %v5673_v56 }
 0x924   : > { %4377 = vmatmul.mubr.msk.bf16.vlgmr.msra.gmra.mrb[60].mxu1 %vm933_vm1, %v2152_v24 }
 0x925   : > { %4382 = vmatprep.mubr.msk.bf16.mxu1 %vm767_vm0, %v4883_v5 }
 0x9f7   : > { %v2190_v20 = vpop.f32.mrb[60].mxu1 }
 0x9f8   : > { %v4378_v31 = vpop.f32.mrb[61].mxu1  ;;  %4743 = vtanh.f32 %v2190_v20  ;;  %v5812_v20 = vunpack.c.l.bf16 %v5684_v28 }
 0x9f9   : > { %v2193_v8 = vpop.f32.mrb[62].mxu1 }
 0x9fa   : > { %4745 = vtanh.f32 %v2193_v8  ;;  %v4379_v58 = vpop.f32.mrb[63].mxu1 }
 0xa02   : > { %v4744_v14 = vpop.eup %4743 }
 0xa04   : > { %v4746_v39 = vpop.eup %4745 }
 0xa05   : > { %v2199_v37 = vpack.c.bf16 %v4746_v39, %v4744_v14  ;;  %v5820_v39 = vunpack.c.h.bf16 %v5684_v28 }
 0xa07   : > { %4380 = vmatprep.subr.bf16.mxu1 %v2199_v37 }
 0xa08   : > { %4381 = vmatpush3.bf16.msra.mxu1 %v2199_v37 }
 0xa09   : > { %4418 = vmatprep.subr.bf16.mxu1 %v5668_v60 }
 0xa0b   : > { %4383 = vmatmul.mubr.msk.bf16.vlgmr.msra.gmra.mrb[64].mxu1 %vm767_vm0, %v4884_v61 }
 0xa0c   : > { %4419 = vmatpush3.bf16.msra.mxu1 %v5668_v60  ;;  %4386 = vmatprep.mubr.msk.bf16.mxu1 %vm767_vm0, %v4885_v4  ;;  %v5792_v60 = vunpack.c.l.bf16 %v5676_v40 }
 0xa0d   : > { %4420 = vmatprep.subr.bf16.mxu1 %v5666_v13 }
 0xa10   : > { %4421 = vmatpush3.bf16.msra.mxu1 %v5666_v13  ;;  %v5796_v13 = vunpack.c.l.bf16 %v5673_v56 }
 0xa11   : > { %4422 = vmatprep.subr.bf16.mxu1 %v5676_v40 }
 0xa13   : > { %4387 = vmatmul.mubr.msk.bf16.gmra.mrb[68].mxu1 %vm767_vm0, %v4886_v57  ;;  %v5825_v57 = vunpack.c.h.bf16 %v5681_v38 }
 0xa14   : > { %4423 = vmatpush3.bf16.msra.mxu1 %v5676_v40  ;;  %4390 = vmatprep.mubr.msk.bf16.mxu1 %vm767_vm0, %v4887_v44 }
 0xa15   : > { %4424 = vmatprep.subr.bf16.mxu1 %v5673_v56 }
 0xa18   : > { %4425 = vmatpush3.bf16.msra.mxu1 %v5673_v56  ;;  %v5816_v56 = vunpack.c.l.bf16 %v5681_v38 }
 0xa19   : > { %4426 = vmatprep.subr.bf16.mxu1 %v5684_v28 }
 0xa1b   : > { %4391 = vmatmul.mubr.msk.bf16.gmra.mrb[72].mxu1 %vm767_vm0, %v4888_v45 }
 0xa1c   : > { %4427 = vmatpush3.bf16.msra.mxu1 %v5684_v28  ;;  %4394 = vmatprep.mubr.msk.bf16.mxu1 %vm767_vm0, %v4889_v50 }
 0xa1d   : > { %4428 = vmatprep.subr.bf16.mxu1 %v5681_v38 }
 0xa20   : > { %4429 = vmatpush3.bf16.msra.mxu1 %v5681_v38  ;;  %v5836_v38 = vunpack.c.l.bf16 %v5689_v19 }
 0xa21   : > { %4430 = vmatprep.subr.bf16.mxu1 %v5692_v23 }
 0xa23   : > { %4395 = vmatmul.mubr.msk.bf16.gmra.mrb[76].mxu1 %vm767_vm0, %v4890_v59 }
 0xa24   : > { %4431 = vmatpush3.bf16.msra.mxu1 %v5692_v23  ;;  %4434 = vmatprep.mubr.bf16.mxu1 %v4891_v27  ;;  %v5832_v27 = vunpack.c.l.bf16 %v5692_v23 }
 0xa25   : > { %4432 = vmatprep.subr.bf16.mxu1 %v5689_v19 }
 0xa28   : > { %4433 = vmatpush3.bf16.msra.mxu1 %v5689_v19 }
 0xa29   : > { %4490 = vmatprep.subr.bf16.mxu1 %v6572_v11 }
 0xa2b   : > { %4435 = vmatmul.mubr.bf16.vlgmr.msra.gmra.mrb[80].mxu1 %v4892_v34 }
 0xa2c   : > { %4438 = vmatprep.mubr.bf16.mxu1 %v4893_v54 }
 0xa33   : > { %4439 = vmatmul.mubr.bf16.gmra.mrb[84].mxu1 %v4894_v42 }
 0xa34   : > { %4442 = vmatprep.mubr.bf16.mxu1 %v4895_v9 }
 0xa3b   : > { %4443 = vmatmul.mubr.bf16.gmra.mrb[88].mxu1 %v4896_v52  ;;  %v5840_v52 = vunpack.c.h.bf16 %v5692_v23 }
 0xa3c   : > { %4446 = vmatprep.mubr.bf16.mxu1 %v4897_v49 }
 0xa43   : > { %4447 = vmatmul.mubr.bf16.gmra.mrb[92].mxu1 %v4898_v17 }
 0xa44   : > { %4506 = vmatprep.mubr.msk.bf16.mxu1 %vm4976_vm2, %v6572_v11 }
 0xade   : > { %v4384_v12 = vpop.f32.mrb[64].mxu1 }
 0xadf   : > { %v2234_v53 = vpop.f32.mrb[65].mxu1  ;;  %v2299_v29 = vmul.f32 %v4384_v12, %v5777_v16 }
 0xae0   : > { %v2297_v55 = vmul.f32 %v2234_v53, %v5774_v1  ;;  %v4385_v30 = vpop.f32.mrb[66].mxu1  ;;  %v5845_v53 = vunpack.c.h.bf16 %v5689_v19 }
 0xae1   : > { %v2237_v43 = vpop.f32.mrb[67].mxu1  ;;  %v2300_v62 = vmul.f32 %v4385_v30, %v5785_v3  ;;  %v2319_v26 = vsel %vm933_vm1, %v2299_v29, 0.0 }
 0xae2   : > { %v2298_v22 = vmul.f32 %v2237_v43, %v5781_v0  ;;  %v2313_v32 = vsel %vm933_vm1, %v2297_v55, 0.0 }
 0xae3   : > { %2314 = vadd.xlane.f32.xlu0 %v2313_v32  ;;  %v2322_v48 = vsel %vm933_vm1, %v2300_v62, 0.0 }
 0xae4   : > { %v2316_v36 = vsel %vm933_vm1, %v2298_v22, 0.0 }
 0xae5   : > { %2317 = vadd.xlane.f32.xlu1 %v2316_v36 }
 0xae6   : > { %v4388_v25 = vpop.f32.mrb[68].mxu1 }
 0xae7   : > { %v2250_v15 = vpop.f32.mrb[69].mxu1  ;;  %2320 = vadd.xlane.f32.xlu0 %v2319_v26  ;;  %v2303_v63 = vmul.f32 %v4388_v25, %v5796_v13 }
 0xae8   : > { %v2301_v33 = vmul.f32 %v2250_v15, %v5792_v60  ;;  %v4389_v35 = vpop.f32.mrb[70].mxu1 }
 0xae9   : > { %v2253_v7 = vpop.f32.mrb[71].mxu1  ;;  %2323 = vadd.xlane.f32.xlu1 %v2322_v48  ;;  %v2304_v24 = vmul.f32 %v4389_v35, %v5805_v18  ;;  %v2331_v31 = vsel %vm933_vm1, %v2303_v63, 0.0 }
 0xaea   : > { %v2302_v46 = vmul.f32 %v2253_v7, %v5800_v6  ;;  %v2325_v41 = vsel %vm933_vm1, %v2301_v33, 0.0 }
 0xaeb   : > { %2326 = vadd.xlane.f32.xlu0 %v2325_v41  ;;  %v2334_v37 = vsel %vm933_vm1, %v2304_v24, 0.0 }
 0xaec   : > { %v2328_v5 = vsel %vm933_vm1, %v2302_v46, 0.0 }
 0xaed   : > { %2329 = vadd.xlane.f32.xlu1 %v2328_v5 }
 0xaee   : > { %v4392_v40 = vpop.f32.mrb[72].mxu1 }
 0xaef   : > { %v2266_v8 = vpop.f32.mrb[73].mxu1  ;;  %2332 = vadd.xlane.f32.xlu0 %v2331_v31  ;;  %v2307_v4 = vmul.f32 %v4392_v40, %v5816_v56 }
 0xaf0   : > { %v2305_v58 = vmul.f32 %v2266_v8, %v5812_v20  ;;  %v4393_v14 = vpop.f32.mrb[74].mxu1 }
 0xaf1   : > { %v2269_v61 = vpop.f32.mrb[75].mxu1  ;;  %2335 = vadd.xlane.f32.xlu1 %v2334_v37  ;;  %v2308_v50 = vmul.f32 %v4393_v14, %v5825_v57  ;;  %v2343_v34 = vsel %vm933_vm1, %v2307_v4, 0.0 }
 0xaf2   : > { %v2306_v44 = vmul.f32 %v2269_v61, %v5820_v39  ;;  %v2337_v45 = vsel %vm933_vm1, %v2305_v58, 0.0 }
 0xaf3   : > { %2338 = vadd.xlane.f32.xlu0 %v2337_v45  ;;  %v2346_v49 = vsel %vm933_vm1, %v2308_v50, 0.0 }
 0xaf4   : > { %v2340_v59 = vsel %vm933_vm1, %v2306_v44, 0.0 }
 0xaf5   : > { %2341 = vadd.xlane.f32.xlu1 %v2340_v59 }
 0xaf6   : > { %v4396_v28 = vpop.f32.mrb[76].mxu1 }
 0xaf7   : > { %v2282_v54 = vpop.f32.mrb[77].mxu1  ;;  %2344 = vadd.xlane.f32.xlu0 %v2343_v34  ;;  %v2311_v12 = vmul.f32 %v4396_v28, %v5836_v38 }
 0xaf8   : > { %v2309_v42 = vmul.f32 %v2282_v54, %v5832_v27  ;;  %v4397_v9 = vpop.f32.mrb[78].mxu1 }
 0xaf9   : > { %v2285_v17 = vpop.f32.mrb[79].mxu1  ;;  %2347 = vadd.xlane.f32.xlu1 %v2346_v49  ;;  %v2312_v43 = vmul.f32 %v4397_v9, %v5845_v53  ;;  %v2355_v22 = vsel %vm933_vm1, %v2311_v12, 0.0 }
 0xafa   : > { %v2310_v55 = vmul.f32 %v2285_v17, %v5840_v52  ;;  %v2349_v30 = vsel %vm933_vm1, %v2309_v42, 0.0 }
 0xafb   : > { %2350 = vadd.xlane.f32.xlu0 %v2349_v30  ;;  %v2358_v36 = vsel %vm933_vm1, %v2312_v43, 0.0 }
 0xafc   : > { %v2352_v29 = vsel %vm933_vm1, %v2310_v55, 0.0 }
 0xafd   : > { %2353 = vadd.xlane.f32.xlu1 %v2352_v29 }
 0xafe   : > { %v4436_v23 = vpop.f32.mrb[80].mxu1 }
 0xaff   : > { %v2620_v32 = vpop.f32.mrb[81].mxu1  ;;  %2356 = vadd.xlane.f32.xlu0 %v2355_v22  ;;  %v5854_v19 = vadd.f32 %v4436_v23, %v5777_v16 }
 0xb00   : > { %v4437_v62 = vpop.f32.mrb[82].mxu1  ;;  %v5860_v15 = vadd.f32 %v2620_v32, %v5774_v1 }
 0xb01   : > { %v5857_v25 = vadd.f32 %v4437_v62, %v5785_v3  ;;  %v2623_v26 = vpop.f32.mrb[83].mxu1  ;;  %2359 = vadd.xlane.f32.xlu1 %v2358_v36 }
 0xb02   : > { %v5863_v33 = vadd.f32 %v2623_v26, %v5781_v0 }
 0xb06   : > { %v4440_v7 = vpop.f32.mrb[84].mxu1 }
 0xb07   : > { %v2636_v63 = vpop.f32.mrb[85].mxu1  ;;  %v5870_v41 = vadd.f32 %v4440_v7, %v5796_v13 }
 0xb08   : > { %v4441_v46 = vpop.f32.mrb[86].mxu1  ;;  %v5876_v40 = vadd.f32 %v2636_v63, %v5792_v60 }
 0xb09   : > { %6594 = vst [vmem:[#allocation12_spill] sm:$0xff] %v5870_v41  ;;  %v5873_v24 = vadd.f32 %v4441_v46, %v5805_v18  ;;  %v2639_v5 = vpop.f32.mrb[87].mxu1 }
 0xb0a   : > { %v5879_v31 = vadd.f32 %v2639_v5, %v5800_v6 }
 0xb0b   : > { %6595 = vst [vmem:[#allocation11_spill] sm:$0xff] %v5873_v24 }
 0xb0e   : > { %v4444_v14 = vpop.f32.mrb[88].mxu1 }
 0xb0f   : > { %v2652_v37 = vpop.f32.mrb[89].mxu1  ;;  %v5886_v4 = vadd.f32 %v4444_v14, %v5816_v56 }
 0xb10   : > { %v4445_v61 = vpop.f32.mrb[90].mxu1  ;;  %v5892_v50 = vadd.f32 %v2652_v37, %v5812_v20 }
 0xb11   : > { %6596 = vst [vmem:[#allocation10_spill] sm:$0xff] %v5886_v4  ;;  %v5889_v44 = vadd.f32 %v4445_v61, %v5825_v57  ;;  %v2655_v45 = vpop.f32.mrb[91].mxu1 }
 0xb12   : > { %6598 = vst [vmem:[#allocation16_spill] sm:$0xff] %v5892_v50  ;;  %v5895_v59 = vadd.f32 %v2655_v45, %v5820_v39 }
 0xb13   : > { %6597 = vst [vmem:[#allocation9_spill] sm:$0xff] %v5889_v44 }
 0xb14   : > { %6599 = vst [vmem:[#allocation15_spill] sm:$0xff] %v5895_v59 }
 0xb16   : > { %v4448_v54 = vpop.f32.mrb[92].mxu1 }
 0xb17   : > { %v2668_v42 = vpop.f32.mrb[93].mxu1  ;;  %v5902_v49 = vadd.f32 %v4448_v54, %v5836_v38 }
 0xb18   : > { %v4449_v9 = vpop.f32.mrb[94].mxu1  ;;  %v5908_v55 = vadd.f32 %v2668_v42, %v5832_v27 }
 0xb19   : > { %6600 = vst [vmem:[#allocation14_spill] sm:$0xff] %v5902_v49  ;;  %v5905_v17 = vadd.f32 %v4449_v9, %v5845_v53  ;;  %v2671_v12 = vpop.f32.mrb[95].mxu1 }
 0xb1a   : > { %6602 = vst [vmem:[#allocation17_spill] sm:$0xff] %v5908_v55  ;;  %v5911_v30 = vadd.f32 %v2671_v12, %v5840_v52 }
 0xb1b   : > { %6601 = vst [vmem:[#allocation13_spill] sm:$0xff] %v5905_v17 }
 0xb1c   : > { %6603 = vst [vmem:[#allocation18_spill] sm:$0xff] %v5911_v30 }
 0xb70   : > { %v5917_v23 = vpop.xlane.xlu0 %2314 }
 0xb71   : > { %v2361_v22 = vand.u32 2147483647, %v5917_v23  ;;  %vm2425_vm6 = vcmp.ge.f32.partialorder %v5917_v23, 0.0 }
 0xb72   : > { %v5920_v32 = vpop.xlane.xlu1 %2317 }
 0xb73   : > { %v2377_v62 = vsub.f32 0.0, %v2361_v22  ;;  %v2362_v36 = vand.u32 2147483647, %v5920_v32  ;;  %vm2426_vm7 = vcmp.ge.f32.partialorder %v5920_v32, 0.0 }
 0xb74   : > { %v5923_v26 = vpop.xlane.xlu0 %2320 }
 0xb75   : > { %v2393_v7 = vmul.f32 1.442695, %v2377_v62  ;;  %v2378_v63 = vsub.f32 0.0, %v2362_v36  ;;  %v2363_v46 = vand.u32 2147483647, %v5923_v26  ;;  %vm2427_vm8 = vcmp.ge.f32.partialorder %v5923_v26, 0.0 }
 0xb76   : > { %v5926_v5 = vpop.xlane.xlu1 %2323 }
 0xb77   : > { %4747 = vpow2.f32 %v2393_v7  ;;  %v2395_v14 = vmul.f32 1.442695, %v2378_v63  ;;  %v2379_v37 = vsub.f32 0.0, %v2363_v46  ;;  %v2364_v61 = vand.u32 2147483647, %v5926_v5 }
 0xb78   : > { %v5929_v45 = vpop.xlane.xlu0 %2326  ;;  %vm2428_vm9 = vcmp.ge.f32.partialorder %v5926_v5, 0.0 }
 0xb79   : > { %4749 = vpow2.f32 %v2395_v14  ;;  %v2397_v54 = vmul.f32 1.442695, %v2379_v37  ;;  %v2380_v42 = vsub.f32 0.0, %v2364_v61  ;;  %v2365_v9 = vand.u32 2147483647, %v5929_v45 }
 0xb7a   : > { %v5932_v12 = vpop.xlane.xlu1 %2329  ;;  %vm2429_vm10 = vcmp.ge.f32.partialorder %v5929_v45, 0.0 }
 0xb7b   : > { %4751 = vpow2.f32 %v2397_v54  ;;  %v2399_v22 = vmul.f32 1.442695, %v2380_v42  ;;  %v2381_v62 = vsub.f32 0.0, %v2365_v9  ;;  %v2366_v36 = vand.u32 2147483647, %v5932_v12 }
 0xb7c   : > { %v5935_v10 = vpop.xlane.xlu0 %2332  ;;  %vm2430_vm11 = vcmp.ge.f32.partialorder %v5932_v12, 0.0 }
 0xb7d   : > { %4753 = vpow2.f32 %v2399_v22  ;;  %v2401_v7 = vmul.f32 1.442695, %v2381_v62  ;;  %v2382_v63 = vsub.f32 0.0, %v2366_v36  ;;  %v2367_v46 = vand.u32 2147483647, %v5935_v10 }
 0xb7e   : > { %v5938_v43 = vpop.xlane.xlu1 %2335  ;;  %vm2431_vm12 = vcmp.ge.f32.partialorder %v5935_v10, 0.0 }
 0xb7f   : > { %4755 = vpow2.f32 %v2401_v7  ;;  %v2403_v14 = vmul.f32 1.442695, %v2382_v63  ;;  %v2383_v37 = vsub.f32 0.0, %v2367_v46  ;;  %v2368_v61 = vand.u32 2147483647, %v5938_v43 }
 0xb80   : > { %v5941_v29 = vpop.xlane.xlu0 %2338  ;;  %vm2432_vm13 = vcmp.ge.f32.partialorder %v5938_v43, 0.0 }
 0xb81   : > { %v4748_v54 = vpop.eup %4747  ;;  %4757 = vpow2.f32 %v2403_v14  ;;  %v2405_v42 = vmul.f32 1.442695, %v2383_v37  ;;  %v2384_v9 = vsub.f32 0.0, %v2368_v61  ;;  %v2369_v28 = vand.u32 2147483647, %v5941_v29 }
 0xb82   : > { %v2441_v22 = vadd.f32 1.0, %v4748_v54  ;;  %v5944_v62 = vpop.xlane.xlu1 %2341  ;;  %vm2433_vm14 = vcmp.ge.f32.partialorder %v5941_v29, 0.0 }
 0xb83   : > { %v5946_v36 = vpop.eup %4749  ;;  %4759 = vpow2.f32 %v2405_v42  ;;  %v2407_v34 = vmul.f32 1.442695, %v2384_v9  ;;  %v2385_v7 = vsub.f32 0.0, %v2369_v28  ;;  %v2370_v63 = vand.u32 2147483647, %v5944_v62 }
 0xb84   : > { %4761 = vrcp.f32 %v2441_v22  ;;  %v2442_v46 = vadd.f32 1.0, %v5946_v36  ;;  %v5950_v8 = vpop.xlane.xlu0 %2344  ;;  %vm2434_vm15 = vcmp.ge.f32.partialorder %v5944_v62, 0.0 }
 0xb85   : > { %v5952_v14 = vpop.eup %4751  ;;  %4763 = vpow2.f32 %v2407_v34  ;;  %v2409_v37 = vmul.f32 1.442695, %v2385_v7  ;;  %v2386_v61 = vsub.f32 0.0, %v2370_v63  ;;  %v2371_v58 = vand.u32 2147483647, %v5950_v8 }
 0xb86   : > { %4765 = vrcp.f32 %v2442_v46  ;;  %v2443_v35 = vadd.f32 1.0, %v5952_v14  ;;  %v5956_v42 = vpop.xlane.xlu1 %2347  ;;  %vm2435_vm3 = vcmp.ge.f32.partialorder %v5950_v8, 0.0 }
 0xb87   : > { %v5958_v28 = vpop.eup %4753  ;;  %4767 = vpow2.f32 %v2409_v37  ;;  %v2411_v9 = vmul.f32 1.442695, %v2386_v61  ;;  %v2387_v22 = vsub.f32 0.0, %v2371_v58  ;;  %v2372_v48 = vand.u32 2147483647, %v5956_v42 }
 0xb88   : > { %4769 = vrcp.f32 %v2443_v35  ;;  %v2444_v51 = vadd.f32 1.0, %v5958_v28  ;;  %v5962_v34 = vpop.xlane.xlu0 %2350  ;;  %vm2436_vm4 = vcmp.ge.f32.partialorder %v5956_v42, 0.0 }
 0xb89   : > { %v5964_v7 = vpop.eup %4755  ;;  %4771 = vpow2.f32 %v2411_v9  ;;  %v2413_v63 = vmul.f32 1.442695, %v2387_v22  ;;  %v2388_v46 = vsub.f32 0.0, %v2372_v48  ;;  %v2373_v2 = vand.u32 2147483647, %v5962_v34 }
 0xb8a   : > { %4773 = vrcp.f32 %v2444_v51  ;;  %v2445_v21 = vadd.f32 1.0, %v5964_v7  ;;  %v5968_v37 = vpop.xlane.xlu1 %2353  ;;  %vm2437_vm5 = vcmp.ge.f32.partialorder %v5962_v34, 0.0 }
 0xb8b   : > { %v5970_v58 = vpop.eup %4757  ;;  %4775 = vpow2.f32 %v2413_v63  ;;  %v2415_v35 = vmul.f32 1.442695, %v2388_v46  ;;  %v2389_v61 = vsub.f32 0.0, %v2373_v2  ;;  %v2374_v49 = vand.u32 2147483647, %v5968_v37 }
 0xb8c   : > { %4777 = vrcp.f32 %v2445_v21  ;;  %v2446_v17 = vadd.f32 1.0, %v5970_v58  ;;  %v5974_v9 = vpop.xlane.xlu0 %2356 }
 0xb8d   : > { %v5976_v48 = vpop.eup %4759  ;;  %4779 = vpow2.f32 %v2415_v35  ;;  %v2417_v51 = vmul.f32 1.442695, %v2389_v61  ;;  %v2390_v22 = vsub.f32 0.0, %v2374_v49  ;;  %v2375_v55 = vand.u32 2147483647, %v5974_v9 }
 0xb8e   : > { %v4762_v30 = vpop.eup %4761  ;;  %4781 = vrcp.f32 %v2446_v17  ;;  %v2447_v2 = vadd.f32 1.0, %v5976_v48  ;;  %v5981_v63 = vpop.xlane.xlu1 %2359 }
 0xb8f   : > { %v5983_v21 = vpop.eup %4763  ;;  %v2489_v46 = vmul.f32 %v4762_v30, %v4748_v54  ;;  %4783 = vpow2.f32 %v2417_v51  ;;  %v2419_v4 = vmul.f32 1.442695, %v2390_v22  ;;  %v2391_v44 = vsub.f32 0.0, %v2375_v55 }
 0xb90   : > { %v4766_v50 = vpop.eup %4765  ;;  %4785 = vrcp.f32 %v2447_v2  ;;  %v2448_v49 = vadd.f32 1.0, %v5983_v21  ;;  %v2376_v35 = vand.u32 2147483647, %v5981_v63 }
 0xb91   : > { %v5988_v23 = vpop.eup %4767  ;;  %v2505_v17 = vsel %vm2425_vm6, %v4762_v30, %v2489_v46  ;;  %v2490_v61 = vmul.f32 %v4766_v50, %v5946_v36  ;;  %4787 = vpow2.f32 %v2419_v4  ;;  %v2421_v59 = vmul.f32 1.442695, %v2391_v44 }
 0xb92   : > { %v4770_v41 = vpop.eup %4769  ;;  %4789 = vrcp.f32 %v2448_v49  ;;  %v2449_v55 = vadd.f32 1.0, %v5988_v23  ;;  %v2392_v54 = vsub.f32 0.0, %v2376_v35  ;;  %v2521_v22 = vmul.f32 %v2505_v17, %v5774_v1 }
 0xb93   : > { %v5993_v51 = vpop.eup %4771  ;;  %v2506_v2 = vsel %vm2426_vm7, %v4766_v50, %v2490_v61  ;;  %v2491_v30 = vmul.f32 %v4770_v41, %v5952_v14  ;;  %4791 = vpow2.f32 %v2421_v59  ;;  %vm2438_vm6 = vcmp.ge.f32.partialorder %v5968_v37, 0.0 }
 0xb94   : > { %v4774_v36 = vpop.eup %4773  ;;  %v2522_v4 = vmul.f32 %v2506_v2, %v5781_v0  ;;  %4793 = vrcp.f32 %v2449_v55  ;;  %v2450_v44 = vadd.f32 1.0, %v5993_v51  ;;  %v2423_v26 = vmul.f32 1.442695, %v2392_v54 }
 0xb95   : > { %v6001_v46 = vpop.eup %4775  ;;  %v2507_v49 = vsel %vm2427_vm8, %v4770_v41, %v2491_v30  ;;  %v2492_v35 = vmul.f32 %v4774_v36, %v5958_v28  ;;  %vm2439_vm7 = vcmp.ge.f32.partialorder %v5974_v9, 0.0  ;;  %vm2440_vm8 = vcmp.ge.f32.partialorder %v5981_v63, 0.0  ;;  %v4658_v9 = vld [vmem:[%s6517_s8 + $0x8] sm:$0xff]  }
 0xb96   : > { %v4778_v24 = vpop.eup %4777  ;;  %v2537_v1 = vpack.c.bf16 %v2522_v4, %v2521_v22  ;;  %4795 = vrcp.f32 %v2450_v44  ;;  %v2451_v50 = vadd.f32 1.0, %v6001_v46  ;;  %v2523_v41 = vmul.f32 %v2507_v49, %v5777_v16 }
 0xb97   : > { %v6006_v59 = vpop.eup %4779  ;;  %v2508_v32 = vsel %vm2428_vm9, %v4774_v36, %v2492_v35  ;;  %v2493_v0 = vmul.f32 %v4778_v24, %v5964_v7  ;;  %4797 = vpow2.f32 %v2423_v26  ;;  %v6604_v63 = vpack.c.bf16 %v5863_v33, %v5860_v15  ;;  %v6607_v15 = vld [vmem:[#allocation11_spill] sm:$0xff]  ;;  %v6608_v33 = vld [vmem:[#allocation12_spill] sm:$0xff] }
 0xb98   : > { %v4782_v14 = vpop.eup %4781  ;;  %v2524_v28 = vmul.f32 %v2508_v32, %v5785_v3  ;;  %4799 = vrcp.f32 %v2451_v50  ;;  %v2452_v17 = vadd.f32 1.0, %v6006_v59  ;;  %4399 = vmatpush3.bf16.msra.mxu0 %v2537_v1 }
 0xb99   : > { %v4784_v5 = vpop.eup %4783  ;;  %v2509_v61 = vsel %vm2429_vm10, %v4778_v24, %v2493_v0  ;;  %v2494_v55 = vmul.f32 %v4782_v14, %v5970_v58  ;;  %4400 = vmatprep.subr.bf16.mxu0 %v6572_v11 }
 0xb9a   : > { %v4786_v54 = vpop.eup %4785  ;;  %v2538_v45 = vpack.c.bf16 %v2524_v28, %v2523_v41  ;;  %4801 = vrcp.f32 %v2452_v17  ;;  %v2453_v7 = vadd.f32 1.0, %v4784_v5  ;;  %v2525_v30 = vmul.f32 %v2509_v61, %v5792_v60 }
 0xb9b   : > { %v4788_v22 = vpop.eup %4787  ;;  %v2510_v16 = vsel %vm2430_vm11, %v4782_v14, %v2494_v55  ;;  %v2495_v3 = vmul.f32 %v4786_v54, %v5976_v48 }
 0xb9c   : > { %v4790_v2 = vpop.eup %4789  ;;  %v2526_v24 = vmul.f32 %v2510_v16, %v5800_v6  ;;  %4803 = vrcp.f32 %v2453_v7  ;;  %v2454_v58 = vadd.f32 1.0, %v4788_v22  ;;  %4401 = vmatpush3.bf16.msra.mxu0 %v2538_v45 }
 0xb9d   : > { %v4792_v36 = vpop.eup %4791  ;;  %v2511_v4 = vsel %vm2431_vm12, %v4786_v54, %v2495_v3  ;;  %v2496_v12 = vmul.f32 %v4790_v2, %v5983_v21  ;;  %4402 = vmatprep.subr.bf16.mxu0 %v6572_v11 }
 0xb9e   : > { %v4794_v44 = vpop.eup %4793  ;;  %v2539_v26 = vpack.c.bf16 %v2526_v24, %v2525_v30  ;;  %4805 = vrcp.f32 %v2454_v58  ;;  %v2455_v10 = vadd.f32 1.0, %v4792_v36  ;;  %v2527_v6 = vmul.f32 %v2511_v4, %v5796_v13  ;;  %v6610_v30 = vld [vmem:[#allocation15_spill] sm:$0xff]  ;;  %v6611_v24 = vld [vmem:[#allocation16_spill] sm:$0xff]  ;;  %v6616_v4 = vld [vmem:[#allocation18_spill] sm:$0xff] }
 0xb9f   : > { %v2512_v48 = vsel %vm2432_vm13, %v4790_v2, %v2496_v12  ;;  %v2497_v60 = vmul.f32 %v4794_v44, %v5988_v23  ;;  %v6609_v2 = vpack.c.bf16 %v6607_v15, %v6608_v33  ;;  %v6612_v58 = vpack.c.bf16 %v6610_v30, %v6611_v24  ;;  %v6619_v12 = vld [vmem:[#allocation13_spill] sm:$0xff] }
 0xba0   : > { %v4796_v49 = vpop.eup %4795  ;;  %v2528_v35 = vmul.f32 %v2512_v48, %v5805_v18  ;;  %4807 = vrcp.f32 %v2455_v10  ;;  %4403 = vmatpush3.bf16.msra.mxu0 %v2539_v26  ;;  %v4660_v10 = vld [vmem:[%s6518_s9 + $0x8] sm:$0xff]  }
 0xba1   : > { %v4798_v21 = vpop.eup %4797  ;;  %v2513_v1 = vsel %vm2433_vm14, %v4794_v44, %v2497_v60  ;;  %v2498_v50 = vmul.f32 %v4796_v49, %v5993_v51  ;;  %4404 = vmatprep.subr.bf16.mxu0 %v6572_v11  ;;  %v6620_v44 = vld [vmem:[#allocation14_spill] sm:$0xff] }
 0xba2   : > { %v4800_v43 = vpop.eup %4799  ;;  %v2540_v32 = vpack.c.bf16 %v2528_v35, %v2527_v6  ;;  %v2456_v23 = vadd.f32 1.0, %v4798_v21  ;;  %v2529_v18 = vmul.f32 %v2513_v1, %v5812_v20  ;;  %v6621_v26 = vpack.c.bf16 %v6619_v12, %v6620_v44 }
 0xba3   : > { %v2514_v0 = vsel %vm2434_vm15, %v4796_v49, %v2498_v50  ;;  %v2499_v13 = vmul.f32 %v4800_v43, %v6001_v46  ;;  %v6622_v49 = vld [vmem:[#allocation6_spill] sm:$0xff] }
 0xba4   : > { %v4802_v14 = vpop.eup %4801  ;;  %v2530_v29 = vmul.f32 %v2514_v0, %v5820_v39  ;;  %4809 = vrcp.f32 %v2456_v23  ;;  %4405 = vmatpush3.bf16.msra.mxu0 %v2540_v32  ;;  %v2697_v6 = vsub.s32 4, %v6622_v49  ;;  %v6106_v50 = vld [vmem:[%s6519_s10] sm:$0x3f] }
 0xba5   : > { %v2515_v51 = vsel %vm2435_vm3, %v4800_v43, %v2499_v13  ;;  %v2500_v41 = vmul.f32 %v4802_v14, %v6006_v59  ;;  %4406 = vmatprep.subr.bf16.mxu0 %v6572_v11 }
 0xba6   : > { %v4804_v28 = vpop.eup %4803  ;;  %v2541_v62 = vpack.c.bf16 %v2530_v29, %v2529_v18  ;;  %v2531_v20 = vmul.f32 %v2515_v51, %v5816_v56  ;;  %v2698_v43 = vrot.slane %v6106_v50, %v2697_v6 }
 0xba7   : > { %v2516_v17 = vsel %vm2436_vm4, %v4802_v14, %v2500_v41  ;;  %v2501_v46 = vmul.f32 %v4804_v28, %v4784_v5 }
 0xba8   : > { %v4806_v61 = vpop.eup %4805  ;;  %v2532_v39 = vmul.f32 %v2516_v17, %v5825_v57  ;;  %4407 = vmatpush3.bf16.msra.mxu0 %v2541_v62 }
 0xba9   : > { %v2517_v8 = vsel %vm2437_vm5, %v4804_v28, %v2501_v46  ;;  %v2502_v55 = vmul.f32 %v4806_v61, %v4788_v22  ;;  %4408 = vmatprep.subr.bf16.mxu0 %v6572_v11 }
 0xbaa   : > { %v4808_v59 = vpop.eup %4807  ;;  %v2542_v54 = vpack.c.bf16 %v2532_v39, %v2531_v20  ;;  %v2533_v5 = vmul.f32 %v2517_v8, %v5832_v27 }
 0xbab   : > { %v2518_v45 = vsel %vm2438_vm6, %v4806_v61, %v2502_v55  ;;  %v2503_v42 = vmul.f32 %v4808_v59, %v4792_v36  ;;  %v6613_v36 = vld [vmem:[#allocation9_spill] sm:$0xff] }
 0xbac   : > { %v2534_v7 = vmul.f32 %v2518_v45, %v5840_v52  ;;  %4409 = vmatpush3.bf16.msra.mxu0 %v2542_v54  ;;  %v4657_v52 = vld [vmem:[%s6517_s8] sm:$0xff]  }
 0xbad   : > { %4410 = vmatprep.subr.bf16.mxu0 %v6572_v11  ;;  %v2519_v34 = vsel %vm2439_vm7, %v4808_v59, %v2503_v42 }
 0xbae   : > { %v4810_v56 = vpop.eup %4809  ;;  %v2543_v57 = vpack.c.bf16 %v2534_v7, %v2533_v5  ;;  %v2535_v37 = vmul.f32 %v2519_v34, %v5836_v38  ;;  %v4659_v38 = vld [vmem:[%s6518_s9] sm:$0xff]  }
 0xbaf   : > { %v2504_v22 = vmul.f32 %v4810_v56, %v4798_v21 }
 0xbb0   : > { %4411 = vmatpush3.bf16.msra.mxu0 %v2543_v57 }
 0xbb1   : > { %v2520_v16 = vsel %vm2440_vm8, %v4810_v56, %v2504_v22  ;;  %4412 = vmatprep.subr.bf16.mxu0 %v6572_v11 }
 0xbb2   : > { %v2536_v27 = vmul.f32 %v2520_v16, %v5845_v53  ;;  %v6605_v53 = vpack.c.bf16 %v5857_v25, %v5854_v19  ;;  %v6614_v19 = vld [vmem:[#allocation10_spill] sm:$0xff] }
 0xbb3   : > { %v6615_v25 = vpack.c.bf16 %v6613_v36, %v6614_v19 }
 0xbb4   : > { %v2544_v3 = vpack.c.bf16 %v2536_v27, %v2535_v37 }
 0xbb6   : > { %4413 = vmatpush3.bf16.msra.mxu0 %v2544_v3 }
 0xbb7   : > { %4450 = vmatprep.subr.bf16.mxu0 %v4657_v52 }
 0xbb9   : > { %4415 = vmatmul.mubr.bf16.vlgmr.msra.gmra.mrb[68].mxu0 %v5701_v47  ;;  %v6606_v47 = vpack.c.bf16 %v5879_v31, %v5876_v40  ;;  %v6617_v40 = vld [vmem:[#allocation17_spill] sm:$0xff] }
 0xbba   : > { %4451 = vmatpush3.bf16.msra.mxu0 %v4657_v52  ;;  %4454 = vmatprep.mubr.msk.bf16.mxu0 %vm933_vm1, %v6604_v63  ;;  %v6618_v31 = vpack.c.bf16 %v6616_v4, %v6617_v40 }
 0xbbb   : > { %4452 = vmatprep.subr.bf16.mxu0 %v4658_v9 }
 0xbbe   : > { %4453 = vmatpush3.bf16.msra.mxu0 %v4658_v9 }
 0xbbf   : > { %4470 = vmatprep.subr.bf16.mxu0 %v4659_v38 }
 0xbc1   : > { %4455 = vmatmul.mubr.msk.bf16.vlgmr.msra.gmra.mrb[72].mxu0 %vm933_vm1, %v6605_v53 }
 0xbc2   : > { %4458 = vmatprep.mubr.msk.bf16.mxu0 %vm933_vm1, %v6606_v47  ;;  %4471 = vmatpush3.bf16.msra.mxu0 %v4659_v38 }
 0xbc3   : > { %4472 = vmatprep.subr.bf16.mxu0 %v4660_v10 }
 0xbc6   : > { %4473 = vmatpush3.bf16.msra.mxu0 %v4660_v10 }
 0xbc7   : > { %4536 = vmatprep.subr.bf16.mxu0 %v6572_v11 }
 0xbc9   : > { %4459 = vmatmul.mubr.msk.bf16.gmra.mrb[76].mxu0 %vm933_vm1, %v6609_v2 }
 0xbca   : > { %4462 = vmatprep.mubr.msk.bf16.mxu0 %vm933_vm1, %v6612_v58 }
 0xbd1   : > { %4463 = vmatmul.mubr.msk.bf16.gmra.mrb[80].mxu0 %vm933_vm1, %v6615_v25 }
 0xbd2   : > { %4466 = vmatprep.mubr.msk.bf16.mxu0 %vm933_vm1, %v6618_v31 }
 0xbd9   : > { %4467 = vmatmul.mubr.msk.bf16.gmra.mrb[84].mxu0 %vm933_vm1, %v6621_v26 }
 0xc8c   : > { %v6096_v48 = vpop.f32.mrb[68].mxu0 }
 0xc8d   : > { %v4416_v60 = vpop.f32.mrb[69].mxu0 }
 0xc8e   : > { %v6099_v35 = vpop.f32.mrb[70].mxu0 }
 0xc8f   : > { %v4417_v1 = vpop.f32.mrb[71].mxu0 }
 0xc90   : > { %v2862_v1 = vsub.s32 5, %v6622_v49 }
 0xc94   : > { %v4456_v32 = vpop.f32.mrb[72].mxu0 }
 0xc95   : > { %v2778_v23 = vadd.f32 %v4456_v32, %v2698_v43  ;;  %v2769_v0 = vpop.f32.mrb[73].mxu0  ;;  %v2863_v32 = vrot.slane %v6106_v50, %v2862_v1  ;;  %v4902_v1 = vld [vmem:[%s6520_s11 + $0x8] sm:$0xff]  }
 0xc96   : > { %v2770_v13 = vadd.f32 %v2769_v0, %v2698_v43  ;;  %v4457_v14 = vpop.f32.mrb[74].mxu0 }
 0xc97   : > { %v2781_v18 = vadd.f32 %v4457_v14, %v2698_v43  ;;  %v2772_v29 = vpop.f32.mrb[75].mxu0  ;;  %v2834_v41 = vmax.f32 %v2778_v23, 0.0 }
 0xc98   : > { %v2773_v51 = vadd.f32 %v2772_v29, %v2698_v43  ;;  %v2832_v62 = vmax.f32 %v2770_v13, 0.0 }
 0xc99   : > { %v2835_v28 = vmax.f32 %v2781_v18, 0.0 }
 0xc9a   : > { %v2833_v17 = vmax.f32 %v2773_v51, 0.0 }
 0xc9b   : > { %v2849_v46 = vpack.c.bf16 %v2835_v28, %v2834_v41 }
 0xc9c   : > { %v2848_v61 = vpack.c.bf16 %v2833_v17, %v2832_v62  ;;  %v4460_v20 = vpop.f32.mrb[76].mxu0 }
 0xc9d   : > { %v2794_v39 = vadd.f32 %v4460_v20, %v2698_v43  ;;  %v2785_v8 = vpop.f32.mrb[77].mxu0 }
 0xc9e   : > { %v2786_v55 = vadd.f32 %v2785_v8, %v2698_v43  ;;  %v4461_v59 = vpop.f32.mrb[78].mxu0  ;;  %4474 = vmatprep.mubr.msk.bf16.mxu0 %vm933_vm1, %v2848_v61 }
 0xc9f   : > { %v2797_v54 = vadd.f32 %v4461_v59, %v2698_v43  ;;  %v2788_v45 = vpop.f32.mrb[79].mxu0  ;;  %4475 = vmatmul.mubr.msk.bf16.vlgmr.msra.gmra.mrb[88].mxu0 %vm933_vm1, %v2849_v46  ;;  %v2838_v5 = vmax.f32 %v2794_v39, 0.0 }
 0xca0   : > { %v2789_v42 = vadd.f32 %v2788_v45, %v2698_v43  ;;  %v2836_v56 = vmax.f32 %v2786_v55, 0.0 }
 0xca1   : > { %v2839_v7 = vmax.f32 %v2797_v54, 0.0 }
 0xca2   : > { %v2837_v57 = vmax.f32 %v2789_v42, 0.0 }
 0xca3   : > { %v2851_v34 = vpack.c.bf16 %v2839_v7, %v2838_v5 }
 0xca4   : > { %v2850_v22 = vpack.c.bf16 %v2837_v57, %v2836_v56  ;;  %v4464_v16 = vpop.f32.mrb[80].mxu0 }
 0xca5   : > { %v2810_v37 = vadd.f32 %v4464_v16, %v2698_v43  ;;  %v2801_v27 = vpop.f32.mrb[81].mxu0 }
 0xca6   : > { %v2802_v52 = vadd.f32 %v2801_v27, %v2698_v43  ;;  %v4465_v3 = vpop.f32.mrb[82].mxu0  ;;  %4478 = vmatprep.mubr.msk.bf16.mxu0 %vm933_vm1, %v2850_v22 }
 0xca7   : > { %v2813_v9 = vadd.f32 %v4465_v3, %v2698_v43  ;;  %v2804_v63 = vpop.f32.mrb[83].mxu0  ;;  %4479 = vmatmul.mubr.msk.bf16.gmra.mrb[92].mxu0 %vm933_vm1, %v2851_v34  ;;  %v2842_v53 = vmax.f32 %v2810_v37, 0.0 }
 0xca8   : > { %v2805_v38 = vadd.f32 %v2804_v63, %v2698_v43  ;;  %v2840_v15 = vmax.f32 %v2802_v52, 0.0 }
 0xca9   : > { %v2843_v47 = vmax.f32 %v2813_v9, 0.0 }
 0xcaa   : > { %v2841_v33 = vmax.f32 %v2805_v38, 0.0 }
 0xcab   : > { %v2853_v2 = vpack.c.bf16 %v2843_v47, %v2842_v53 }
 0xcac   : > { %v2852_v30 = vpack.c.bf16 %v2841_v33, %v2840_v15  ;;  %v4468_v24 = vpop.f32.mrb[84].mxu0 }
 0xcad   : > { %v2826_v58 = vadd.f32 %v4468_v24, %v2698_v43  ;;  %v2817_v36 = vpop.f32.mrb[85].mxu0 }
 0xcae   : > { %v2818_v19 = vadd.f32 %v2817_v36, %v2698_v43  ;;  %v4469_v25 = vpop.f32.mrb[86].mxu0  ;;  %4482 = vmatprep.mubr.msk.bf16.mxu0 %vm933_vm1, %v2852_v30 }
 0xcaf   : > { %v2829_v4 = vadd.f32 %v4469_v25, %v2698_v43  ;;  %v2820_v40 = vpop.f32.mrb[87].mxu0  ;;  %4483 = vmatmul.mubr.msk.bf16.gmra.mrb[96].mxu0 %vm933_vm1, %v2853_v2  ;;  %v2846_v12 = vmax.f32 %v2826_v58, 0.0 }
 0xcb0   : > { %v2821_v31 = vadd.f32 %v2820_v40, %v2698_v43  ;;  %v2844_v26 = vmax.f32 %v2818_v19, 0.0 }
 0xcb1   : > { %v2847_v44 = vmax.f32 %v2829_v4, 0.0 }
 0xcb2   : > { %v2845_v10 = vmax.f32 %v2821_v31, 0.0 }
 0xcb3   : > { %v2855_v60 = vpack.c.bf16 %v2847_v44, %v2846_v12 }
 0xcb4   : > { %v2854_v6 = vpack.c.bf16 %v2845_v10, %v2844_v26 }
 0xcb6   : > { %4486 = vmatprep.mubr.msk.bf16.mxu0 %vm933_vm1, %v2854_v6  ;;  %v4901_v6 = vld [vmem:[%s6520_s11] sm:$0xff]  }
 0xcb7   : > { %4487 = vmatmul.mubr.msk.bf16.gmra.mrb[100].mxu0 %vm933_vm1, %v2855_v60  ;;  %v6156_v60 = vld [vmem:[%s6511_s2] sm:$0xff]  }
 0xcb8   : > { %4552 = vmatprep.mubr.msk.bf16.mxu0 %vm4976_vm2, %v6572_v11 }
 0xd72   : > { %v4476_v23 = vpop.f32.mrb[88].mxu0 }
 0xd73   : > { %v2943_v0 = vadd.f32 %v4476_v23, %v2863_v32  ;;  %v2934_v43 = vpop.f32.mrb[89].mxu0 }
 0xd74   : > { %v2935_v13 = vadd.f32 %v2934_v43, %v2863_v32  ;;  %v4477_v14 = vpop.f32.mrb[90].mxu0 }
 0xd75   : > { %v2946_v18 = vadd.f32 %v4477_v14, %v2863_v32  ;;  %v2937_v29 = vpop.f32.mrb[91].mxu0  ;;  %v2999_v41 = vmax.f32 %v2943_v0, 0.0 }
 0xd76   : > { %v2938_v51 = vadd.f32 %v2937_v29, %v2863_v32  ;;  %v2997_v62 = vmax.f32 %v2935_v13, 0.0  ;;  %v4903_v29 = vld [vmem:[%s6512_s3] sm:$0xff]  }
 0xd77   : > { %v3000_v28 = vmax.f32 %v2946_v18, 0.0 }
 0xd78   : > { %v2998_v17 = vmax.f32 %v2938_v51, 0.0 }
 0xd79   : > { %v6121_v46 = vpack.c.bf16 %v3000_v28, %v2999_v41 }
 0xd7a   : > { %v6123_v61 = vpack.c.bf16 %v2998_v17, %v2997_v62  ;;  %v4480_v20 = vpop.f32.mrb[92].mxu0 }
 0xd7b   : > { %v2959_v49 = vadd.f32 %v4480_v20, %v2863_v32  ;;  %v2950_v39 = vpop.f32.mrb[93].mxu0 }
 0xd7c   : > { %v2951_v50 = vadd.f32 %v2950_v39, %v2863_v32  ;;  %v4481_v8 = vpop.f32.mrb[94].mxu0  ;;  %4491 = vmatpush3.bf16.msra.mxu1 %v6123_v61  ;;  %v4904_v39 = vld [vmem:[%s6512_s3 + $0x8] sm:$0xff]  }
 0xd7d   : > { %v2962_v55 = vadd.f32 %v4481_v8, %v2863_v32  ;;  %v2953_v59 = vpop.f32.mrb[95].mxu0  ;;  %4492 = vmatprep.subr.bf16.mxu1 %v6572_v11  ;;  %v3003_v45 = vmax.f32 %v2959_v49, 0.0  ;;  %v4906_v8 = vld [vmem:[%s6512_s3 + $0x18] sm:$0xff]  }
 0xd7e   : > { %v2954_v54 = vadd.f32 %v2953_v59, %v2863_v32  ;;  %v3001_v5 = vmax.f32 %v2951_v50, 0.0  ;;  %v4905_v50 = vld [vmem:[%s6512_s3 + $0x10] sm:$0xff]   ;;  %v4908_v59 = vld [vmem:[%s6512_s3 + $0x28] sm:$0xff]  }
 0xd7f   : > { %v3004_v42 = vmax.f32 %v2962_v55, 0.0  ;;  %v4907_v55 = vld [vmem:[%s6512_s3 + $0x20] sm:$0xff]  }
 0xd80   : > { %v3002_v7 = vmax.f32 %v2954_v54, 0.0  ;;  %4493 = vmatpush3.bf16.msra.mxu1 %v6121_v46  ;;  %v4909_v54 = vld [vmem:[%s6512_s3 + $0x30] sm:$0xff]  }
 0xd81   : > { %v6128_v56 = vpack.c.bf16 %v3004_v42, %v3003_v45  ;;  %4494 = vmatprep.subr.bf16.mxu1 %v6572_v11  ;;  %v4910_v45 = vld [vmem:[%s6512_s3 + $0x38] sm:$0xff]  }
 0xd82   : > { %v6131_v57 = vpack.c.bf16 %v3002_v7, %v3001_v5  ;;  %v4484_v34 = vpop.f32.mrb[96].mxu0  ;;  %v3021_v5 = vunpack.c.l.bf16 %v6123_v61 }
 0xd83   : > { %v2975_v22 = vadd.f32 %v4484_v34, %v2863_v32  ;;  %v2966_v16 = vpop.f32.mrb[97].mxu0  ;;  %v3023_v34 = vunpack.c.l.bf16 %v6121_v46 }
 0xd84   : > { %v2967_v37 = vadd.f32 %v2966_v16, %v2863_v32  ;;  %v4485_v27 = vpop.f32.mrb[98].mxu0  ;;  %4495 = vmatpush3.bf16.msra.mxu1 %v6131_v57 }
 0xd85   : > { %v2978_v52 = vadd.f32 %v4485_v27, %v2863_v32  ;;  %v2969_v3 = vpop.f32.mrb[99].mxu0  ;;  %4496 = vmatprep.subr.bf16.mxu1 %v6572_v11  ;;  %v3007_v63 = vmax.f32 %v2975_v22, 0.0 }
 0xd86   : > { %v2970_v9 = vadd.f32 %v2969_v3, %v2863_v32  ;;  %v3005_v53 = vmax.f32 %v2967_v37, 0.0  ;;  %v3022_v37 = vunpack.c.h.bf16 %v6123_v61  ;;  %v3024_v3 = vunpack.c.h.bf16 %v6121_v46 }
 0xd87   : > { %v3008_v38 = vmax.f32 %v2978_v52, 0.0 }
 0xd88   : > { %v3006_v47 = vmax.f32 %v2970_v9, 0.0  ;;  %4497 = vmatpush3.bf16.msra.mxu1 %v6128_v56 }
 0xd89   : > { %v6136_v15 = vpack.c.bf16 %v3008_v38, %v3007_v63  ;;  %4498 = vmatprep.subr.bf16.mxu1 %v6572_v11 }
 0xd8a   : > { %v6139_v33 = vpack.c.bf16 %v3006_v47, %v3005_v53  ;;  %v4488_v2 = vpop.f32.mrb[100].mxu0 }
 0xd8b   : > { %v2991_v30 = vadd.f32 %v4488_v2, %v2863_v32  ;;  %v2982_v24 = vpop.f32.mrb[101].mxu0  ;;  %v3025_v2 = vunpack.c.l.bf16 %v6131_v57 }
 0xd8c   : > { %v2983_v58 = vadd.f32 %v2982_v24, %v2863_v32  ;;  %v4489_v36 = vpop.f32.mrb[102].mxu0  ;;  %4499 = vmatpush3.bf16.msra.mxu1 %v6139_v33 }
 0xd8d   : > { %v2994_v19 = vadd.f32 %v4489_v36, %v2863_v32  ;;  %v2985_v25 = vpop.f32.mrb[103].mxu0  ;;  %4500 = vmatprep.subr.bf16.mxu1 %v6572_v11  ;;  %v3011_v40 = vmax.f32 %v2991_v30, 0.0 }
 0xd8e   : > { %v2986_v4 = vadd.f32 %v2985_v25, %v2863_v32  ;;  %v3009_v12 = vmax.f32 %v2983_v58, 0.0  ;;  %v3027_v58 = vunpack.c.l.bf16 %v6128_v56  ;;  %v3026_v25 = vunpack.c.h.bf16 %v6131_v57 }
 0xd8f   : > { %v3012_v31 = vmax.f32 %v2994_v19, 0.0 }
 0xd90   : > { %v3010_v44 = vmax.f32 %v2986_v4, 0.0  ;;  %4501 = vmatpush3.bf16.msra.mxu1 %v6136_v15 }
 0xd91   : > { %v6144_v26 = vpack.c.bf16 %v3012_v31, %v3011_v40  ;;  %4502 = vmatprep.subr.bf16.mxu1 %v6572_v11 }
 0xd92   : > { %v6147_v10 = vpack.c.bf16 %v3010_v44, %v3009_v12  ;;  %v3028_v12 = vunpack.c.h.bf16 %v6128_v56 }
 0xd94   : > { %4503 = vmatpush3.bf16.msra.mxu1 %v6147_v10 }
 0xd95   : > { %4504 = vmatprep.subr.bf16.mxu1 %v6572_v11 }
 0xd98   : > { %4505 = vmatpush3.bf16.msra.mxu1 %v6144_v26 }
 0xd99   : > { %4510 = vmatprep.subr.bf16.mxu1 %v6572_v11 }
 0xd9b   : > { %4507 = vmatmul.mubr.bf16.vlgmr.msra.gmra.mrb[96].mxu1 %v6156_v60 }
 0xd9c   : > { %4511 = vmatpush3.bf16.msra.mxu1 %v4901_v6  ;;  %4514 = vmatprep.mubr.msk.bf16.mxu1 %vm4976_vm2, %v6572_v11 }
 0xd9d   : > { %4512 = vmatprep.subr.bf16.mxu1 %v6572_v11 }
 0xda0   : > { %4513 = vmatpush3.bf16.msra.mxu1 %v4902_v1 }
 0xe6e   : > { %v3071_v32 = vpop.f32.mrb[96].mxu1 }
 0xe6f   : > { %v4508_v23 = vpop.f32.mrb[97].mxu1  ;;  %v3078_v43 = vmul.f32 0.125, %v3071_v32 }
 0xe70   : > { %v3074_v0 = vpop.f32.mrb[98].mxu1 }
 0xe71   : > { %v3079_v13 = vmul.f32 0.125, %v3074_v0  ;;  %v4509_v14 = vpop.f32.mrb[99].mxu1  ;;  %v3029_v0 = vunpack.c.l.bf16 %v6139_v33 }
 0xe72   : > { %v3031_v14 = vunpack.c.l.bf16 %v6136_v15 }
 0xe73   : > { %v3080_v18 = vpack.c.bf16 %v3079_v13, %v3078_v43 }
 0xe75   : > { %4515 = vmatmul.mubr.msk.bf16.vlgmr.msra.gmra.mrb[100].mxu1 %vm933_vm1, %v3080_v18 }
 0xe76   : > { %4520 = vmatprep.mubr.msk.bf16.mxu1 %vm767_vm0, %v4903_v29 }
 0xf48   : > { %v3118_v51 = vpop.f32.mrb[100].mxu1 }
 0xf49   : > { %v4516_v41 = vpop.f32.mrb[101].mxu1  ;;  %4811 = vtanh.f32 %v3118_v51  ;;  %v3030_v51 = vunpack.c.h.bf16 %v6139_v33 }
 0xf4a   : > { %v3121_v28 = vpop.f32.mrb[102].mxu1 }
 0xf4b   : > { %4813 = vtanh.f32 %v3121_v28  ;;  %v4517_v62 = vpop.f32.mrb[103].mxu1 }
 0xf53   : > { %v4812_v17 = vpop.eup %4811 }
 0xf55   : > { %v4814_v20 = vpop.eup %4813 }
 0xf56   : > { %v3127_v49 = vpack.c.bf16 %v4814_v20, %v4812_v17  ;;  %v3032_v17 = vunpack.c.h.bf16 %v6136_v15 }
 0xf58   : > { %4518 = vmatprep.subr.bf16.mxu1 %v3127_v49 }
 0xf59   : > { %4519 = vmatpush3.bf16.msra.mxu1 %v3127_v49 }
 0xf5c   : > { %4521 = vmatmul.mubr.msk.bf16.vlgmr.msra.gmra.mrb[104].mxu1 %vm767_vm0, %v4904_v39 }
 0xf5d   : > { %4524 = vmatprep.mubr.msk.bf16.mxu1 %vm767_vm0, %v4905_v50 }
 0xf64   : > { %4525 = vmatmul.mubr.msk.bf16.gmra.mrb[108].mxu1 %vm767_vm0, %v4906_v8 }
 0xf65   : > { %4528 = vmatprep.mubr.msk.bf16.mxu1 %vm767_vm0, %v4907_v55  ;;  %v3033_v55 = vunpack.c.l.bf16 %v6147_v10 }
 0xf6c   : > { %4529 = vmatmul.mubr.msk.bf16.gmra.mrb[112].mxu1 %vm767_vm0, %v4908_v59 }
 0xf6d   : > { %4532 = vmatprep.mubr.msk.bf16.mxu1 %vm767_vm0, %v4909_v54 }
 0xf74   : > { %4533 = vmatmul.mubr.msk.bf16.gmra.mrb[116].mxu1 %vm767_vm0, %v4910_v45  ;;  %v6552_v45 = vunpack.c.l.bf16 %v6144_v26 }
0x102f   : > { %v4522_v42 = vpop.f32.mrb[104].mxu1 }
0x1030   : > { %v3162_v7 = vpop.f32.mrb[105].mxu1  ;;  %v3227_v52 = vmul.f32 %v4522_v42, %v3023_v34 }
0x1031   : > { %v3225_v22 = vmul.f32 %v3162_v7, %v3021_v5  ;;  %v4523_v16 = vpop.f32.mrb[106].mxu1 }
0x1032   : > { %v3165_v27 = vpop.f32.mrb[107].mxu1  ;;  %v3228_v38 = vmul.f32 %v4523_v16, %v3024_v3  ;;  %v3247_v30 = vsel %vm933_vm1, %v3227_v52, 0.0 }
0x1033   : > { %v3226_v9 = vmul.f32 %v3165_v27, %v3022_v37  ;;  %v3241_v63 = vsel %vm933_vm1, %v3225_v22, 0.0  ;;  %v6553_v22 = vunpack.c.h.bf16 %v6147_v10 }
0x1034   : > { %3242 = vadd.xlane.f32.xlu0 %v3241_v63  ;;  %v3250_v4 = vsel %vm933_vm1, %v3228_v38, 0.0 }
0x1035   : > { %v3244_v53 = vsel %vm933_vm1, %v3226_v9, 0.0  ;;  %v6551_v9 = vunpack.c.h.bf16 %v6144_v26 }
0x1036   : > { %3245 = vadd.xlane.f32.xlu1 %v3244_v53 }
0x1037   : > { %v4526_v47 = vpop.f32.mrb[108].mxu1 }
0x1038   : > { %v3178_v24 = vpop.f32.mrb[109].mxu1  ;;  %3248 = vadd.xlane.f32.xlu0 %v3247_v30  ;;  %v3231_v31 = vmul.f32 %v4526_v47, %v3027_v58 }
0x1039   : > { %v3229_v36 = vmul.f32 %v3178_v24, %v3025_v2  ;;  %v4527_v19 = vpop.f32.mrb[110].mxu1 }
0x103a   : > { %v3181_v40 = vpop.f32.mrb[111].mxu1  ;;  %3251 = vadd.xlane.f32.xlu1 %v3250_v4  ;;  %v3232_v1 = vmul.f32 %v4527_v19, %v3028_v12  ;;  %v3259_v43 = vsel %vm933_vm1, %v3231_v31, 0.0 }
0x103b   : > { %v3230_v44 = vmul.f32 %v3181_v40, %v3026_v25  ;;  %v3253_v6 = vsel %vm933_vm1, %v3229_v36, 0.0 }
0x103c   : > { %3254 = vadd.xlane.f32.xlu0 %v3253_v6  ;;  %v3262_v41 = vsel %vm933_vm1, %v3232_v1, 0.0 }
0x103d   : > { %v3256_v32 = vsel %vm933_vm1, %v3230_v44, 0.0 }
0x103e   : > { %3257 = vadd.xlane.f32.xlu1 %v3256_v32 }
0x103f   : > { %v4530_v23 = vpop.f32.mrb[112].mxu1 }
0x1040   : > { %v3194_v13 = vpop.f32.mrb[113].mxu1  ;;  %3260 = vadd.xlane.f32.xlu0 %v3259_v43  ;;  %v3235_v62 = vmul.f32 %v4530_v23, %v3031_v14 }
0x1041   : > { %v3233_v18 = vmul.f32 %v3194_v13, %v3029_v0  ;;  %v4531_v29 = vpop.f32.mrb[114].mxu1 }
0x1042   : > { %v3197_v28 = vpop.f32.mrb[115].mxu1  ;;  %3263 = vadd.xlane.f32.xlu1 %v3262_v41  ;;  %v3236_v39 = vmul.f32 %v4531_v29, %v3032_v17  ;;  %v3271_v59 = vsel %vm933_vm1, %v3235_v62, 0.0 }
0x1043   : > { %v3234_v20 = vmul.f32 %v3197_v28, %v3030_v51  ;;  %v3265_v49 = vsel %vm933_vm1, %v3233_v18, 0.0 }
0x1044   : > { %3266 = vadd.xlane.f32.xlu0 %v3265_v49  ;;  %v3274_v16 = vsel %vm933_vm1, %v3236_v39, 0.0 }
0x1045   : > { %v3268_v50 = vsel %vm933_vm1, %v3234_v20, 0.0 }
0x1046   : > { %3269 = vadd.xlane.f32.xlu1 %v3268_v50 }
0x1047   : > { %v4534_v8 = vpop.f32.mrb[116].mxu1 }
0x1048   : > { %v3210_v54 = vpop.f32.mrb[117].mxu1  ;;  %3272 = vadd.xlane.f32.xlu0 %v3271_v59  ;;  %v3239_v52 = vmul.f32 %v4534_v8, %v6552_v45 }
0x1049   : > { %v3237_v42 = vmul.f32 %v3210_v54, %v3033_v55  ;;  %v4535_v7 = vpop.f32.mrb[118].mxu1 }
0x104a   : > { %v3213_v27 = vpop.f32.mrb[119].mxu1  ;;  %3275 = vadd.xlane.f32.xlu1 %v3274_v16  ;;  %v3240_v53 = vmul.f32 %v4535_v7, %v6551_v9  ;;  %v3283_v30 = vsel %vm933_vm1, %v3239_v52, 0.0 }
0x104b   : > { %v3238_v63 = vmul.f32 %v3213_v27, %v6553_v22  ;;  %v3277_v38 = vsel %vm933_vm1, %v3237_v42, 0.0 }
0x104c   : > { %3278 = vadd.xlane.f32.xlu0 %v3277_v38  ;;  %v3286_v24 = vsel %vm933_vm1, %v3240_v53, 0.0 }
0x104d   : > { %v3280_v47 = vsel %vm933_vm1, %v3238_v63, 0.0 }
0x104e   : > { %3281 = vadd.xlane.f32.xlu1 %v3280_v47 }
0x1050   : > { %3284 = vadd.xlane.f32.xlu0 %v3283_v30 }
0x1052   : > { %3287 = vadd.xlane.f32.xlu1 %v3286_v24 }
0x10c1   : > { %v6265_v36 = vpop.xlane.xlu0 %3242 }
0x10c2   : > { %v3289_v19 = vand.u32 2147483647, %v6265_v36  ;;  %vm3353_vm0 = vcmp.ge.f32.partialorder %v6265_v36, 0.0 }
0x10c3   : > { %v6268_v4 = vpop.xlane.xlu1 %3245 }
0x10c4   : > { %v3305_v40 = vsub.f32 0.0, %v3289_v19  ;;  %v3290_v31 = vand.u32 2147483647, %v6268_v4  ;;  %vm3354_vm9 = vcmp.ge.f32.partialorder %v6268_v4, 0.0 }
0x10c5   : > { %v6271_v44 = vpop.xlane.xlu0 %3248 }
0x10c6   : > { %v3321_v6 = vmul.f32 1.442695, %v3305_v40  ;;  %v3306_v1 = vsub.f32 0.0, %v3290_v31  ;;  %v3291_v32 = vand.u32 2147483647, %v6271_v44  ;;  %vm3355_vm10 = vcmp.ge.f32.partialorder %v6271_v44, 0.0 }
0x10c7   : > { %v6274_v23 = vpop.xlane.xlu1 %3251 }
0x10c8   : > { %4815 = vpow2.f32 %v3321_v6  ;;  %v3323_v43 = vmul.f32 1.442695, %v3306_v1  ;;  %v3307_v13 = vsub.f32 0.0, %v3291_v32  ;;  %v3292_v18 = vand.u32 2147483647, %v6274_v23 }
0x10c9   : > { %v6277_v29 = vpop.xlane.xlu0 %3254  ;;  %vm3356_vm11 = vcmp.ge.f32.partialorder %v6274_v23, 0.0 }
0x10ca   : > { %4817 = vpow2.f32 %v3323_v43  ;;  %v3325_v41 = vmul.f32 1.442695, %v3307_v13  ;;  %v3308_v28 = vsub.f32 0.0, %v3292_v18  ;;  %v3293_v62 = vand.u32 2147483647, %v6277_v29 }
0x10cb   : > { %v6280_v20 = vpop.xlane.xlu1 %3257  ;;  %vm3357_vm12 = vcmp.ge.f32.partialorder %v6277_v29, 0.0 }
0x10cc   : > { %4819 = vpow2.f32 %v3325_v41  ;;  %v3327_v49 = vmul.f32 1.442695, %v3308_v28  ;;  %v3309_v39 = vsub.f32 0.0, %v3293_v62  ;;  %v3294_v50 = vand.u32 2147483647, %v6280_v20 }
0x10cd   : > { %v6283_v8 = vpop.xlane.xlu0 %3260  ;;  %vm3358_vm13 = vcmp.ge.f32.partialorder %v6280_v20, 0.0 }
0x10ce   : > { %4821 = vpow2.f32 %v3327_v49  ;;  %v3329_v59 = vmul.f32 1.442695, %v3309_v39  ;;  %v3310_v54 = vsub.f32 0.0, %v3294_v50  ;;  %v3295_v42 = vand.u32 2147483647, %v6283_v8 }
0x10cf   : > { %v6286_v7 = vpop.xlane.xlu1 %3263  ;;  %vm3359_vm14 = vcmp.ge.f32.partialorder %v6283_v8, 0.0 }
0x10d0   : > { %4823 = vpow2.f32 %v3329_v59  ;;  %v3331_v16 = vmul.f32 1.442695, %v3310_v54  ;;  %v3311_v27 = vsub.f32 0.0, %v3295_v42  ;;  %v3296_v52 = vand.u32 2147483647, %v6286_v7 }
0x10d1   : > { %v6289_v63 = vpop.xlane.xlu0 %3266  ;;  %vm3360_vm15 = vcmp.ge.f32.partialorder %v6286_v7, 0.0 }
0x10d2   : > { %v4816_v38 = vpop.eup %4815  ;;  %4825 = vpow2.f32 %v3331_v16  ;;  %v3333_v53 = vmul.f32 1.442695, %v3311_v27  ;;  %v3312_v47 = vsub.f32 0.0, %v3296_v52  ;;  %v3297_v30 = vand.u32 2147483647, %v6289_v63 }
0x10d3   : > { %v3369_v24 = vadd.f32 1.0, %v4816_v38  ;;  %v6292_v19 = vpop.xlane.xlu1 %3269  ;;  %vm3361_vm3 = vcmp.ge.f32.partialorder %v6289_v63, 0.0 }
0x10d4   : > { %v6294_v40 = vpop.eup %4817  ;;  %4827 = vpow2.f32 %v3333_v53  ;;  %v3335_v31 = vmul.f32 1.442695, %v3312_v47  ;;  %v3313_v6 = vsub.f32 0.0, %v3297_v30  ;;  %v3298_v1 = vand.u32 2147483647, %v6292_v19 }
0x10d5   : > { %4829 = vrcp.f32 %v3369_v24  ;;  %v3370_v32 = vadd.f32 1.0, %v6294_v40  ;;  %v6298_v43 = vpop.xlane.xlu0 %3272  ;;  %vm3362_vm4 = vcmp.ge.f32.partialorder %v6292_v19, 0.0 }
0x10d6   : > { %v6300_v13 = vpop.eup %4819  ;;  %4831 = vpow2.f32 %v3335_v31  ;;  %v3337_v18 = vmul.f32 1.442695, %v3313_v6  ;;  %v3314_v41 = vsub.f32 0.0, %v3298_v1  ;;  %v3299_v28 = vand.u32 2147483647, %v6298_v43 }
0x10d7   : > { %4833 = vrcp.f32 %v3370_v32  ;;  %v3371_v62 = vadd.f32 1.0, %v6300_v13  ;;  %v6304_v49 = vpop.xlane.xlu1 %3275  ;;  %vm3363_vm5 = vcmp.ge.f32.partialorder %v6298_v43, 0.0 }
0x10d8   : > { %v6306_v39 = vpop.eup %4821  ;;  %4835 = vpow2.f32 %v3337_v18  ;;  %v3339_v50 = vmul.f32 1.442695, %v3314_v41  ;;  %v3315_v59 = vsub.f32 0.0, %v3299_v28  ;;  %v3300_v54 = vand.u32 2147483647, %v6304_v49 }
0x10d9   : > { %4837 = vrcp.f32 %v3371_v62  ;;  %v3372_v42 = vadd.f32 1.0, %v6306_v39  ;;  %v6310_v16 = vpop.xlane.xlu0 %3278  ;;  %vm3364_vm6 = vcmp.ge.f32.partialorder %v6304_v49, 0.0 }
0x10da   : > { %v6312_v27 = vpop.eup %4823  ;;  %4839 = vpow2.f32 %v3339_v50  ;;  %v3341_v52 = vmul.f32 1.442695, %v3315_v59  ;;  %v3316_v53 = vsub.f32 0.0, %v3300_v54  ;;  %v3301_v47 = vand.u32 2147483647, %v6310_v16 }
0x10db   : > { %4841 = vrcp.f32 %v3372_v42  ;;  %v3373_v30 = vadd.f32 1.0, %v6312_v27  ;;  %v6316_v24 = vpop.xlane.xlu1 %3281  ;;  %vm3365_vm7 = vcmp.ge.f32.partialorder %v6310_v16, 0.0 }
0x10dc   : > { %v6318_v31 = vpop.eup %4825  ;;  %4843 = vpow2.f32 %v3341_v52  ;;  %v3343_v6 = vmul.f32 1.442695, %v3316_v53  ;;  %v3317_v1 = vsub.f32 0.0, %v3301_v47  ;;  %v3302_v32 = vand.u32 2147483647, %v6316_v24 }
0x10dd   : > { %4845 = vrcp.f32 %v3373_v30  ;;  %v3374_v18 = vadd.f32 1.0, %v6318_v31  ;;  %v6322_v41 = vpop.xlane.xlu0 %3284  ;;  %vm3366_vm8 = vcmp.ge.f32.partialorder %v6316_v24, 0.0 }
0x10de   : > { %v6324_v28 = vpop.eup %4827  ;;  %4847 = vpow2.f32 %v3343_v6  ;;  %v3345_v62 = vmul.f32 1.442695, %v3317_v1  ;;  %v3318_v50 = vsub.f32 0.0, %v3302_v32  ;;  %v3303_v59 = vand.u32 2147483647, %v6322_v41 }
0x10df   : > { %v4830_v54 = vpop.eup %4829  ;;  %4849 = vrcp.f32 %v3374_v18  ;;  %v3375_v42 = vadd.f32 1.0, %v6324_v28  ;;  %v6329_v52 = vpop.xlane.xlu1 %3287 }
0x10e0   : > { %v6331_v53 = vpop.eup %4831  ;;  %v3417_v47 = vmul.f32 %v4830_v54, %v4816_v38  ;;  %4851 = vpow2.f32 %v3345_v62  ;;  %v3347_v30 = vmul.f32 1.442695, %v3318_v50  ;;  %v3319_v21 = vsub.f32 0.0, %v3303_v59 }
0x10e1   : > { %v4834_v9 = vpop.eup %4833  ;;  %4853 = vrcp.f32 %v3375_v42  ;;  %v3376_v6 = vadd.f32 1.0, %v6331_v53  ;;  %v3304_v1 = vand.u32 2147483647, %v6329_v52 }
0x10e2   : > { %v6336_v36 = vpop.eup %4835  ;;  %v3433_v32 = vsel %vm3353_vm0, %v4830_v54, %v3417_v47  ;;  %v3418_v18 = vmul.f32 %v4834_v9, %v6294_v40  ;;  %4855 = vpow2.f32 %v3347_v30  ;;  %v3349_v45 = vmul.f32 1.442695, %v3319_v21 }
0x10e3   : > { %v4838_v22 = vpop.eup %4837  ;;  %4857 = vrcp.f32 %v3376_v6  ;;  %v3377_v38 = vadd.f32 1.0, %v6336_v36  ;;  %v3320_v62 = vsub.f32 0.0, %v3304_v1  ;;  %v3449_v59 = vmul.f32 %v3433_v32, %v3021_v5 }
0x10e4   : > { %v6341_v50 = vpop.eup %4839  ;;  %v3434_v42 = vsel %vm3354_vm9, %v4834_v9, %v3418_v18  ;;  %v3419_v54 = vmul.f32 %v4838_v22, %v6300_v13  ;;  %4859 = vpow2.f32 %v3349_v45  ;;  %vm3367_vm0 = vcmp.ge.f32.partialorder %v6322_v41, 0.0  ;;  %v4661_v41 = vld [vmem:[%s6521_s12 + $0x10] sm:$0xff]  }
0x10e5   : > { %v4842_v40 = vpop.eup %4841  ;;  %v3450_v21 = vmul.f32 %v3434_v42, %v3022_v37  ;;  %4861 = vrcp.f32 %v3377_v38  ;;  %v3378_v44 = vadd.f32 1.0, %v6341_v50  ;;  %v3351_v47 = vmul.f32 1.442695, %v3320_v62 }
0x10e6   : > { %v6351_v30 = vpop.eup %4843  ;;  %v3435_v6 = vsel %vm3355_vm10, %v4838_v22, %v3419_v54  ;;  %v3420_v1 = vmul.f32 %v4842_v40, %v6306_v39  ;;  %vm3368_vm9 = vcmp.ge.f32.partialorder %v6329_v52, 0.0  ;;  %v4662_v52 = vld [vmem:[%s6521_s12 + $0x18] sm:$0xff]  }
0x10e7   : > { %v4846_v5 = vpop.eup %4845  ;;  %v3465_v32 = vpack.c.bf16 %v3450_v21, %v3449_v59  ;;  %4863 = vrcp.f32 %v3378_v44  ;;  %v3379_v45 = vadd.f32 1.0, %v6351_v30  ;;  %v3451_v22 = vmul.f32 %v3435_v6, %v3023_v34 }
0x10e8   : > { %v6356_v9 = vpop.eup %4847  ;;  %v3436_v61 = vsel %vm3356_vm11, %v4842_v40, %v3420_v1  ;;  %v3421_v37 = vmul.f32 %v4846_v5, %v6312_v27  ;;  %4865 = vpow2.f32 %v3351_v47 }
0x10e9   : > { %v4850_v4 = vpop.eup %4849  ;;  %v3452_v13 = vmul.f32 %v3436_v61, %v3024_v3  ;;  %4867 = vrcp.f32 %v3379_v45  ;;  %v3380_v23 = vadd.f32 1.0, %v6356_v9  ;;  %4537 = vmatpush3.bf16.msra.mxu0 %v3465_v32 }
0x10ea   : > { %v4852_v39 = vpop.eup %4851  ;;  %v3437_v18 = vsel %vm3357_vm12, %v4846_v5, %v3421_v37  ;;  %v3422_v38 = vmul.f32 %v4850_v4, %v6318_v31  ;;  %4538 = vmatprep.subr.bf16.mxu0 %v6572_v11 }
0x10eb   : > { %v4854_v29 = vpop.eup %4853  ;;  %v3466_v27 = vpack.c.bf16 %v3452_v13, %v3451_v22  ;;  %4869 = vrcp.f32 %v3380_v23  ;;  %v3381_v62 = vadd.f32 1.0, %v4852_v39  ;;  %v3453_v42 = vmul.f32 %v3437_v18, %v3025_v2 }
0x10ec   : > { %v4856_v34 = vpop.eup %4855  ;;  %v3438_v59 = vsel %vm3358_vm13, %v4850_v4, %v3422_v38  ;;  %v3423_v46 = vmul.f32 %v4854_v29, %v6324_v28 }
0x10ed   : > { %v4858_v3 = vpop.eup %4857  ;;  %v3454_v31 = vmul.f32 %v3438_v59, %v3026_v25  ;;  %4871 = vrcp.f32 %v3381_v62  ;;  %v3382_v54 = vadd.f32 1.0, %v4856_v34  ;;  %4539 = vmatpush3.bf16.msra.mxu0 %v3466_v27  ;;  %v4665_v59 = vld [vmem:[%s6521_s12 + $0x20] sm:$0xff]  }
0x10ee   : > { %v4860_v40 = vpop.eup %4859  ;;  %v3439_v20 = vsel %vm3359_vm14, %v4854_v29, %v3423_v46  ;;  %v3424_v21 = vmul.f32 %v4858_v3, %v6331_v53  ;;  %4540 = vmatprep.subr.bf16.mxu0 %v6572_v11 }
0x10ef   : > { %v4862_v44 = vpop.eup %4861  ;;  %v3467_v8 = vpack.c.bf16 %v3454_v31, %v3453_v42  ;;  %4873 = vrcp.f32 %v3382_v54  ;;  %v3383_v28 = vadd.f32 1.0, %v4860_v40  ;;  %v3455_v25 = vmul.f32 %v3439_v20, %v3027_v58 }
0x10f0   : > { %v3440_v47 = vsel %vm3360_vm15, %v4858_v3, %v3424_v21  ;;  %v3425_v2 = vmul.f32 %v4862_v44, %v6336_v36  ;;  %v4666_v3 = vld [vmem:[%s6521_s12 + $0x28] sm:$0xff]  }
0x10f1   : > { %v4864_v57 = vpop.eup %4863  ;;  %v3456_v6 = vmul.f32 %v3440_v47, %v3028_v12  ;;  %4875 = vrcp.f32 %v3383_v28  ;;  %4541 = vmatpush3.bf16.msra.mxu0 %v3467_v8 }
0x10f2   : > { %v4866_v53 = vpop.eup %4865  ;;  %v3441_v1 = vsel %vm3361_vm3, %v4862_v44, %v3425_v2  ;;  %v3426_v7 = vmul.f32 %v4864_v57, %v6341_v50  ;;  %4542 = vmatprep.subr.bf16.mxu0 %v6572_v11 }
0x10f3   : > { %v4868_v5 = vpop.eup %4867  ;;  %v3468_v32 = vpack.c.bf16 %v3456_v6, %v3455_v25  ;;  %v3384_v36 = vadd.f32 1.0, %v4866_v53  ;;  %v3457_v12 = vmul.f32 %v3441_v1, %v3029_v0  ;;  %v3929_v1 = vld [vmem:[%s6522_s13] ss:$0 sm:$0xff] }
0x10f4   : > { %v3442_v45 = vsel %vm3362_vm4, %v4864_v57, %v3426_v7  ;;  %v3427_v58 = vmul.f32 %v4868_v5, %v6351_v30 }
0x10f5   : > { %v4870_v56 = vpop.eup %4869  ;;  %v3458_v63 = vmul.f32 %v3442_v45, %v3030_v51  ;;  %4877 = vrcp.f32 %v3384_v36  ;;  %4543 = vmatpush3.bf16.msra.mxu0 %v3468_v32 }
0x10f6   : > { %v3443_v50 = vsel %vm3363_vm5, %v4868_v5, %v3427_v58  ;;  %v3428_v61 = vmul.f32 %v4870_v56, %v6356_v9  ;;  %4544 = vmatprep.subr.bf16.mxu0 %v6572_v11 }
0x10f7   : > { %v4872_v19 = vpop.eup %4871  ;;  %v3469_v37 = vpack.c.bf16 %v3458_v63, %v3457_v12  ;;  %v3459_v33 = vmul.f32 %v3443_v50, %v3031_v14  ;;  %v6623_v14 = vunpack.c.h.bf16 %v6147_v10  ;;  %v6625_v10 = vunpack.c.h.bf16 %v6144_v26 }
0x10f8   : > { %v3444_v30 = vsel %vm3364_vm6, %v4870_v56, %v3428_v61  ;;  %v3429_v4 = vmul.f32 %v4872_v19, %v4852_v39 }
0x10f9   : > { %v4874_v22 = vpop.eup %4873  ;;  %v3460_v0 = vmul.f32 %v3444_v30, %v3032_v17  ;;  %4545 = vmatpush3.bf16.msra.mxu0 %v3469_v37 }
0x10fa   : > { %v3445_v51 = vsel %vm3365_vm7, %v4872_v19, %v3429_v4  ;;  %v3430_v43 = vmul.f32 %v4874_v22, %v4856_v34  ;;  %4546 = vmatprep.subr.bf16.mxu0 %v6572_v11  ;;  %v4664_v34 = vld [vmem:[%s6521_s12 + $0x8] sm:$0xff]  }
0x10fb   : > { %v4876_v9 = vpop.eup %4875  ;;  %v3470_v13 = vpack.c.bf16 %v3460_v0, %v3459_v33  ;;  %v3461_v39 = vmul.f32 %v3445_v51, %v3033_v55  ;;  %v6624_v55 = vunpack.c.l.bf16 %v6144_v26  ;;  %v4663_v26 = vld [vmem:[%s6521_s12] sm:$0xff]  }
0x10fc   : > { %v3446_v49 = vsel %vm3366_vm8, %v4874_v22, %v3430_v43  ;;  %v3431_v23 = vmul.f32 %v4876_v9, %v4860_v40 }
0x10fd   : > { %v3462_v15 = vmul.f32 %v3446_v49, %v6623_v14  ;;  %4547 = vmatpush3.bf16.msra.mxu0 %v3470_v13 }
0x10fe   : > { %4548 = vmatprep.subr.bf16.mxu0 %v6572_v11  ;;  %v3447_v18 = vsel %vm3367_vm0, %v4876_v9, %v3431_v23 }
0x10ff   : > { %v4878_v17 = vpop.eup %4877  ;;  %v3471_v16 = vpack.c.bf16 %v3462_v15, %v3461_v39  ;;  %v3463_v29 = vmul.f32 %v3447_v18, %v6624_v55 }
0x1100   : > { %v3432_v38 = vmul.f32 %v4878_v17, %v4866_v53 }
0x1101   : > { %4549 = vmatpush3.bf16.msra.mxu0 %v3471_v16 }
0x1102   : > { %v3448_v24 = vsel %vm3368_vm9, %v4878_v17, %v3432_v38  ;;  %4550 = vmatprep.subr.bf16.mxu0 %v6572_v11 }
0x1103   : > { %v3464_v27 = vmul.f32 %v3448_v24, %v6625_v10 }
0x1105   : > { %v3472_v62 = vpack.c.bf16 %v3464_v27, %v3463_v29 }
0x1107   : > { %4551 = vmatpush3.bf16.msra.mxu0 %v3472_v62 }
0x1108   : > { %4556 = vmatprep.subr.bf16.mxu0 %v6572_v11 }
0x110a   : > { %4553 = vmatmul.mubr.bf16.vlgmr.msra.gmra.mrb[104].mxu0 %v6156_v60  ;;  %v6626_v60 = vpack.c.bf16 %v6099_v35, %v6096_v48  ;;  %v6627_v48 = vld [vmem:[#allocation7_spill] sm:$0xff]  ;;  %v6628_v35 = vld [vmem:[#allocation8_spill] sm:$0xff] }
0x110b   : > { %4557 = vmatpush3.bf16.msra.mxu0 %v4661_v41  ;;  %4560 = vmatprep.mubr.msk.bf16.mxu0 %vm4976_vm2, %v6572_v11  ;;  %v6629_v46 = vpack.c.bf16 %v6627_v48, %v6628_v35 }
0x110c   : > { %4558 = vmatprep.subr.bf16.mxu0 %v6572_v11 }
0x110f   : > { %4559 = vmatpush3.bf16.msra.mxu0 %v4662_v52 }
0x1110   : > { %4564 = vmatprep.subr.bf16.mxu0 %v6572_v11 }
0x1112   : > { %4561 = vmatmul.mubr.msk.bf16.vlgmr.msra.gmra.mrb[108].mxu0 %vm933_vm1, %v6626_v60 }
0x1113   : > { %4565 = vmatpush3.bf16.msra.mxu0 %v4663_v26  ;;  %4568 = vmatprep.mubr.msk.bf16.mxu0 %vm4976_vm2, %v6572_v11 }
0x1114   : > { %4566 = vmatprep.subr.bf16.mxu0 %v6572_v11 }
0x1117   : > { %4567 = vmatpush3.bf16.msra.mxu0 %v4664_v34 }
0x1118   : > { %4572 = vmatprep.subr.bf16.mxu0 %v6572_v11 }
0x111a   : > { %4569 = vmatmul.mubr.msk.bf16.vlgmr.msra.gmra.mrb[112].mxu0 %vm933_vm1, %v6629_v46 }
0x111b   : > { %4573 = vmatpush3.bf16.msra.mxu0 %v4665_v59  ;;  %4576 = vmatprep.mubr.msk.bf16.mxu0 %vm4976_vm2, %v6572_v11 }
0x111c   : > { %4574 = vmatprep.subr.bf16.mxu0 %v6572_v11 }
0x111f   : > { %4575 = vmatpush3.bf16.msra.mxu0 %v4666_v3 }
0x11dd   : > { %v3507_v42 = vpop.f32.mrb[104].mxu0 }
0x11de   : > { %v4554_v31 = vpop.f32.mrb[105].mxu0 }
0x11df   : > { %v3510_v54 = vpop.f32.mrb[106].mxu0 }
0x11e0   : > { %v3640_v40 = vpack.c.bf16 %v3510_v54, %v3507_v42  ;;  %v4555_v20 = vpop.f32.mrb[107].mxu0 }
0x11e2   : > { %4577 = vmatmul.mubr.msk.bf16.vlgmr.msra.gmra.mrb[116].mxu0 %vm933_vm1, %v3640_v40 }
0x11e5   : > { %v3577_v21 = vpop.f32.mrb[108].mxu0 }
0x11e6   : > { %v4562_v44 = vpop.f32.mrb[109].mxu0 }
0x11e7   : > { %v3580_v8 = vpop.f32.mrb[110].mxu0 }
0x11e8   : > { %v4563_v28 = vpop.f32.mrb[111].mxu0 }
0x11ed   : > { %v3633_v47 = vpop.f32.mrb[112].mxu0 }
0x11ee   : > { %v3634_v11 = vadd.f32 %v3633_v47, %v3577_v21  ;;  %v4570_v2 = vpop.f32.mrb[113].mxu0 }
0x11ef   : > { %v3636_v57 = vpop.f32.mrb[114].mxu0 }
0x11f0   : > { %v3637_v25 = vadd.f32 %v3636_v57, %v3580_v8  ;;  %v4571_v6 = vpop.f32.mrb[115].mxu0 }
0x12b5   : > { %v3690_v53 = vpop.f32.mrb[116].mxu0 }
0x12b6   : > { %v3697_v7 = vadd.f32 %v3690_v53, %v3634_v11  ;;  %v4578_v5 = vpop.f32.mrb[117].mxu0 }
0x12b7   : > { %v3693_v32 = vpop.f32.mrb[118].mxu0 }
0x12b8   : > { %v3706_v36 = vadd.f32 %v3929_v1, %v3697_v7  ;;  %v3698_v45 = vadd.f32 %v3693_v32, %v3637_v25  ;;  %v4579_v58 = vpop.f32.mrb[119].mxu0 }
0x12ba   : > { %3708 = vst.msk [vmem:[%s475_s22] sm:$0xff] %vm933_vm1, %v3706_v36  ;;  %v3707_v56 = vadd.f32 %v3929_v1, %v3698_v45 }
0x12bc   : > { %3709 = vst.msk [vmem:[%s475_s22 + $0x8] sm:$0xff] %vm933_vm1, %v3707_v56 }
0x12bd   : > { %4924 = shalt.err (!%p4921_p3)
}
0x12be   : > { %s4925_s27 = scalar_lea.hbm %s6462_s1, 256  ;;  %s4929_s26 = scalar_lea.hbm %s6523_s14, 512 }
0x12bf   : > { %p4926_p4 = scmp.ne.s32.totalorder %s6462_s1, %s4925_s27  ;;  %p4930_p9 = scmp.lt.u32.totalorder %s6462_s1, %s6523_s14 }
0x12c0   : > { %p4931_p10 = scmp.lt.u32.totalorder %s4929_s26, %s4925_s27  ;;  %p4933_p12 = scmp.lt.u32.totalorder %s4925_s27, %s6462_s1 }
0x12c1   : > { %p4927_p7 = pnand %p4926_p4, %p5093_p5 }
0x12c2   : > { %p4932_p11 = por %p4931_p10, %p4930_p9 }
0x12c3   : > { %p4928_p8 = pneg %p4927_p7 }
0x12c4   : > { %p4934_p13 = por %p4933_p12, %p4932_p11 }
0x12c6   : > { %p4935_p0 = pnand %p4934_p13, %p4928_p8 }
0x12c8   : > { %4938 = shalt.err (!%p4935_p0)
}
0x12c9   : > { %s4978_s28 = smov 128   ;;  %s4979_s20 = smov 8  }
0x12ca   : > { %4580 = dma.vmem_to_hbm [thread:$0]  (%p5093_p5), %s6464_s21, 256, %s6462_s1, %s6468_s17, %s4978_s28, %s4978_s28, %s4979_s20  }
0x12cb PF: > { %p4586_p1 = scmp.ge.s32.totalorder %s4973_s16, 2  ;;  %s3739_s22 = sand.u32 1, %s4961_s29  }
0x12cc   : > { %s3740_s27 = scalar_lea.sflag [#allocation3], %s3739_s22 }
0x12cd   : > { %p4583_p2 = pnand %p4586_p1, %p5097_p6 }
0x12cf   : > { %4956 = dma.done.wait (!%p4583_p2), %s3740_s27, 256  }
0x12d0   : > { %4958 = vsyncadd (!%p4583_p2), %s3740_s27, 4294967040  ;;  %s6630_s25 = sld [smem:[#allocation5_spill]]  ;;  %p24_p3 = scmp.ge.s32.totalorder %s5080_s19, 4  }
0x12d1   : > { %s6631_s29 = smov %s4965_s30  ;;  %s6632_s30 = smov %s4969_s15 }
0x12d2   : > { %s6634_s16 = smov %s5080_s19  ;;  %26 = sbr.rel (!%p24_p3) target bundleno = 6 (0x6), region = 114 }
0x12d6   : > { %s6633_s15 = smov %s6630_s25 }
0x12d9   :  { %3745 = vsyncpa [#allocation3], 1 }
0x12da   :  { %3747 = vsyncpa [#allocation3 + $0x1], 1 }

</bundles_post_ra>
